<compile_context>
chip_gen: v5e
topology: v5e:2x2
jax: 0.10.0
libtpu: 0.0.40
codegen_flags: <defaults>
</compile_context>

<pallas_src>
import functools

import jax
import jax.numpy as jnp
from jax.experimental import pallas as pl
from jax.experimental.pallas import tpu as pltpu


def coordnet_kernel(
    aff_ref,            # SMEM scalar-prefetch: (B, 12) f32 rows = [A00..A02,c0, A10..,c1, A20..,c2]
    points_ref,         # (1, 3, TN) f32
    w1_ref, b1_ref, w2_ref, b2_ref, w3_ref, b3_ref,   # backbone (stand-in MLP)
    wh_ref, bn1_ref, bs_ref,                          # fused head: rows [0:nh) nocs hidden, then seg
    wn2_ref, bn2_ref,                                 # nocs output layer
    out_ref,            # (1, OUT_ROWS, TN) fused output slab
    *, seg_dim, nocs_dim, nh_dim, epi_bf16,
):
    f32 = jnp.float32
    bf16 = jnp.bfloat16
    ep = bf16 if epi_bf16 else f32    # epilogue (bias + ReLU) dtype

    b = pl.program_id(0)

    # ---- canonicalization: 12 SMEM scalars -> scalar x vector FMAs (VPU) ----
    p = points_ref[0]                          # (3, TN) f32
    p0, p1, p2 = p[0:1, :], p[1:2, :], p[2:3, :]

    def cam_row(i):
        return (aff_ref[b, 4 * i + 0] * p0
                + aff_ref[b, 4 * i + 1] * p1
                + aff_ref[b, 4 * i + 2] * p2
                + aff_ref[b, 4 * i + 3])

    cam = jnp.concatenate([cam_row(0), cam_row(1), cam_row(2)], axis=0)   # (3, TN) f32

    # ---- backbone: shared per-point MLP 3 -> 64 -> 128 -> 128 (bf16 MXU) ----
    def dense_relu(w_ref, b_ref, x_bf16):
        acc = jnp.dot(w_ref[...], x_bf16, preferred_element_type=f32)
        y = jnp.maximum(acc.astype(ep) + b_ref[...], 0.0)    # epilogue in `ep`
        return y.astype(bf16)                                  # no-op when ep == bf16

    h = dense_relu(w1_ref, b1_ref, cam.astype(bf16))
    h = dense_relu(w2_ref, b2_ref, h)
    feat = dense_relu(w3_ref, b3_ref, h)

    # ---- fused head: one MXU matmul yields nocs-hidden rows + seg logits ----
    hm = jnp.dot(wh_ref[...], feat, preferred_element_type=f32)           # (nh+seg, TN) f32

    nocs_hidden = jnp.maximum(hm[0:nh_dim, :].astype(ep) + bn1_ref[...], 0.0).astype(bf16)
    logits = hm[nh_dim:nh_dim + seg_dim, :] + bs_ref[...]                 # f32 (stability)

    # ---- seg head: stable softmax over channel dim (VALU pairwise reduce, exact divide)
    m = logits[0:1, :]
    for r in range(1, seg_dim):
        m = jnp.maximum(m, logits[r:r + 1, :])
    e = jnp.exp(logits - m)
    denom = e[0:1, :]
    for r in range(1, seg_dim):
        denom = denom + e[r:r + 1, :]
    seg = e / denom

    # ---- nocs head: 128 -> 3*num_parts, sigmoid - 0.5 ------------------------
    nocs = jax.nn.sigmoid(
        jnp.dot(wn2_ref[...], nocs_hidden, preferred_element_type=f32) + bn2_ref[...]
    ) - 0.5

    # ---- single fused, lane-dense output slab (no padded rows) ---------------
    out_ref[0, 0:3, :] = cam
    out_ref[0, 3:3 + seg_dim, :] = seg
    out_ref[0, 3 + seg_dim:3 + seg_dim + nocs_dim, :] = nocs


@functools.partial(jax.jit, static_argnames=("num_parts", "tile_n", "bf16_epilogue"))
def coordnet_forward(points, points_mean, translation, rotation, scale, params,
                     num_parts=2, tile_n=2048, bf16_epilogue=True):
    """Returns the fused output slab (B, 3+seg_dim+nocs_dim, N).

    Slicing into {points, seg, nocs} is left to the consumer (see split_outputs)
    so the jitted forward ends with a single HBM writeback of the slab.
    """
    B, C, N = points.shape
    if C != 3:
        raise ValueError("points must be (B, 3, N)")
    if N % 128 != 0:
        raise ValueError(f"N={N} must be a multiple of 128 for lane-dense tiles.")

    seg_dim = num_parts + 1          # extra_dims = 1
    nocs_dim = 3 * num_parts
    out_rows = 3 + seg_dim + nocs_dim   # no sublane padding

    # ---- N-tile selection: big lane-dense tile, divisor of N, multiple of 128 ----
    tn = max(128, min(int(tile_n), N))
    tn -= tn % 128
    while N % tn != 0:
        tn -= 128
    # v7x has 2 TensorCores: keep at least 2 parallel grid steps when possible.
    while B * (N // tn) < 2 and tn >= 256 and (tn // 2) % 128 == 0 and N % (tn // 2) == 0:
        tn //= 2
    grid = (B, N // tn)

    f32, bf16 = jnp.float32, jnp.bfloat16
    ep = bf16 if bf16_epilogue else f32
    (w1, b1, w2, b2, w3, b3, ws, bs, wn1, bn1, wn2, bn2) = params
    nh_dim = wn1.shape[0]

    # Per-batch affine folded in the wrapper:
    #   cam = R^T ((pts + mean) - t) / scale = A @ pts + c     -> 12 SMEM scalars/batch
    scale_f = scale.reshape(B, 1, 1).astype(f32)
    A = jnp.swapaxes(rotation.astype(f32), -1, -2) / scale_f              # (B, 3, 3)
    c = jnp.matmul(A, (points_mean - translation).astype(f32))            # (B, 3, 1)
    affine = jnp.concatenate([A, c], axis=-1).reshape(B, 12)              # (B, 12)

    # Fuse seg-logit and nocs-hidden weights into one matmul; bf16 weight storage.
    wh = jnp.concatenate([wn1, ws], axis=0).astype(bf16)    # (nh_dim + seg_dim, 128)
    w1b, w2b, w3b, wn2b = (w1.astype(bf16), w2.astype(bf16),
                           w3.astype(bf16), wn2.astype(bf16))
    b1e, b2e, b3e, bn1e = (b1.astype(ep), b2.astype(ep), b3.astype(ep), bn1.astype(ep))
    bsf, bn2f = bs.astype(f32), bn2.astype(f32)

    def const_spec(shape):
        # weight array resident across the whole grid (constant block index)
        return pl.BlockSpec(shape, lambda b, n, aff: tuple(0 for _ in shape))

    in_specs = [
        pl.BlockSpec((1, 3, tn), lambda b, n, aff: (b, 0, n)),        # points tile
        const_spec(w1b.shape), const_spec(b1e.shape),
        const_spec(w2b.shape), const_spec(b2e.shape),
        const_spec(w3b.shape), const_spec(b3e.shape),
        const_spec(wh.shape), const_spec(bn1e.shape), const_spec(bsf.shape),
        const_spec(wn2b.shape), const_spec(bn2f.shape),
    ]
    out_specs = pl.BlockSpec((1, out_rows, tn), lambda b, n, aff: (b, 0, n))
    out_shape = jax.ShapeDtypeStruct((B, out_rows, N), f32)

    kernel = functools.partial(
        coordnet_kernel,
        seg_dim=seg_dim, nocs_dim=nocs_dim, nh_dim=nh_dim, epi_bf16=bf16_epilogue)

    # Advisory cost estimate for XLA's scheduler.
    matmul_flops_per_pt = 2 * (w1.shape[0] * w1.shape[1]
                               + w2.shape[0] * w2.shape[1]
                               + w3.shape[0] * w3.shape[1]
                               + wh.shape[0] * wh.shape[1]
                               + wn2.shape[0] * wn2.shape[1])
    weight_bytes = 2 * (w1b.size + w2b.size + w3b.size + wh.size + wn2b.size)
    cost = pl.CostEstimate(
        flops=int(B * N * (matmul_flops_per_pt + 24)),
        transcendentals=int(B * N * (seg_dim + nocs_dim)),
        bytes_accessed=int(4 * B * N * (3 + out_rows) + 4 * B * 12 + weight_bytes),
    )

    compiler_kwargs = dict(dimension_semantics=("parallel", "parallel"))
    if tn > 2048:
        # Large tiles: raise the scoped-VMEM limit (still within v7x's 64 MiB).
        compiler_kwargs["vmem_limit_bytes"] = 64 * 1024 * 1024

    slab = pl.pallas_call(
        kernel,
        out_shape=out_shape,
        grid_spec=pltpu.PrefetchScalarGridSpec(
            num_scalar_prefetch=1,
            grid=grid,
            in_specs=in_specs,
            out_specs=out_specs,
        ),
        compiler_params=pltpu.CompilerParams(**compiler_kwargs),
        cost_estimate=cost,
    )(affine, points.astype(f32),
      w1b, b1e, w2b, b2e, w3b, b3e, wh, bn1e, bsf, wn2b, bn2f)

    return slab


def split_outputs(slab, num_parts=2):
    """Consumer-side (non-jit) views of the fused slab."""
    seg_dim = num_parts + 1
    nocs_dim = 3 * num_parts
    return {
        "points": slab[:, 0:3, :],
        "seg": slab[:, 3:3 + seg_dim, :],
        "nocs": slab[:, 3 + seg_dim:3 + seg_dim + nocs_dim, :],
    }


def coordnet_reference(points, points_mean, translation, rotation, scale, params,
                       num_parts=2, bf16_epilogue=True):
    """Pure-JAX reference with the same bf16 matmul / epilogue precision as the kernel."""
    f32, bf16 = jnp.float32, jnp.bfloat16
    ep = bf16 if bf16_epilogue else f32
    (w1, b1, w2, b2, w3, b3, ws, bs, wn1, bn1, wn2, bn2) = params
    B = points.shape[0]
    scale_f = scale.reshape(B, 1, 1).astype(f32)
    A = jnp.swapaxes(rotation.astype(f32), -1, -2) / scale_f
    c = jnp.matmul(A, (points_mean - translation).astype(f32))
    cam = jnp.matmul(A, points.astype(f32)) + c

    def mm(w, x):
        return jnp.einsum("oc,bcn->bon", w.astype(bf16), x.astype(bf16),
                          preferred_element_type=f32)

    def dense_relu(w, b, x):
        return jnp.maximum(mm(w, x).astype(ep) + b.astype(ep), 0.0).astype(f32)

    h = dense_relu(w1, b1, cam)
    h = dense_relu(w2, b2, h)
    feat = dense_relu(w3, b3, h)
    seg = jax.nn.softmax(mm(ws, feat) + bs, axis=1)
    nh = dense_relu(wn1, bn1, feat)
    nocs = jax.nn.sigmoid(mm(wn2, nh) + bn2) - 0.5
    return {"seg": seg, "nocs": nocs, "points": cam}


def init_params(key, backbone_out_dim=128, num_parts=2):
    """Deterministic synthetic parameters (no checkpoint)."""
    seg_dim = num_parts + 1
    nocs_dim = 3 * num_parts
    dims = [
        (64, 3), (64, 1),                                # backbone layer 1
        (128, 64), (128, 1),                             # backbone layer 2
        (backbone_out_dim, 128), (backbone_out_dim, 1),  # backbone layer 3
        (seg_dim, backbone_out_dim), (seg_dim, 1),       # seg head
        (128, backbone_out_dim), (128, 1),               # nocs hidden
        (nocs_dim, 128), (nocs_dim, 1),                  # nocs out
    ]
    keys = jax.random.split(key, len(dims))
    params = []
    for k, shp in zip(keys, dims):
        fan_in = shp[1] if shp[1] > 1 else shp[0]
        params.append(
            jax.random.normal(k, shp, dtype=jnp.float32) / jnp.sqrt(jnp.float32(fan_in))
        )
    return tuple(params)


if __name__ == "__main__":
    B, N, num_parts = 2, 1024, 2

    # bf16 bias/ReLU epilogue only where the VPU has bf16 arithmetic (v6e / v7x).
    kind = jax.devices()[0].device_kind.lower()
    bf16_epi = not any(tag in kind for tag in ("v2", "v3", "v4", "v5"))

    root = jax.random.PRNGKey(0)
    kp, km, kt, kr, ks, kw = jax.random.split(root, 6)

    points = jax.random.normal(kp, (B, 3, N), dtype=jnp.float32)
    points_mean = jax.random.normal(km, (B, 3, 1), dtype=jnp.float32)
    translation = 0.1 * jax.random.normal(kt, (B, 3, 1), dtype=jnp.float32)
    # a (not necessarily orthonormal) per-batch 3x3 matrix; semantics only need matmul
    rotation = jnp.eye(3, dtype=jnp.float32)[None] + 0.05 * jax.random.normal(
        kr, (B, 3, 3), dtype=jnp.float32
    )
    scale = 0.5 + jax.random.uniform(ks, (B,), dtype=jnp.float32)

    params = init_params(kw, backbone_out_dim=128, num_parts=num_parts)

    slab = coordnet_forward(points, points_mean, translation, rotation, scale,
                            params, num_parts=num_parts, tile_n=2048,
                            bf16_epilogue=bf16_epi)
    jax.block_until_ready(slab)

    out = split_outputs(slab, num_parts=num_parts)
    ref = coordnet_reference(points, points_mean, translation, rotation, scale,
                             params, num_parts=num_parts, bf16_epilogue=bf16_epi)

    seg_dim = num_parts + 1
    nocs_dim = 3 * num_parts
    assert slab.shape == (B, 3 + seg_dim + nocs_dim, N)
    assert out["points"].shape == (B, 3, N)
    assert out["seg"].shape == (B, seg_dim, N)
    assert out["nocs"].shape == (B, nocs_dim, N)
    assert bool(jnp.all(jnp.isfinite(slab)))
    # exact in-kernel softmax: channel sums must be ~1
    assert bool(jnp.allclose(jnp.sum(out["seg"], axis=1), 1.0, atol=1e-3))
    # match the pure-JAX reference (same bf16 matmul / epilogue precision)
    assert bool(jnp.allclose(out["points"], ref["points"], atol=1e-4, rtol=1e-4))
    assert bool(jnp.allclose(out["seg"], ref["seg"], atol=1e-2))
    assert bool(jnp.allclose(out["nocs"], ref["nocs"], atol=1e-2))

    print("KERNEL_OK")
</pallas_src>

<mosaic_0001>
module attributes {stable_mosaic.version = 11 : i64} {
  func.func @coordnet_kernel(%arg0: i32, %arg1: i32, %arg2: memref<2x12xf32, #tpu.memory_space<smem>>, %arg3: memref<1x3x1024xf32, #tpu.memory_space<vmem>>, %arg4: memref<64x3xbf16, #tpu.memory_space<vmem>>, %arg5: memref<64x1xbf16, #tpu.memory_space<vmem>>, %arg6: memref<128x64xbf16, #tpu.memory_space<vmem>>, %arg7: memref<128x1xbf16, #tpu.memory_space<vmem>>, %arg8: memref<128x128xbf16, #tpu.memory_space<vmem>>, %arg9: memref<128x1xbf16, #tpu.memory_space<vmem>>, %arg10: memref<131x128xbf16, #tpu.memory_space<vmem>>, %arg11: memref<128x1xbf16, #tpu.memory_space<vmem>>, %arg12: memref<3x1xf32, #tpu.memory_space<vmem>>, %arg13: memref<6x128xbf16, #tpu.memory_space<vmem>>, %arg14: memref<6x1xf32, #tpu.memory_space<vmem>>, %arg15: memref<1x12x1024xf32, #tpu.memory_space<vmem>>) attributes {dimension_semantics = [#tpu.dimension_semantics<parallel>, #tpu.dimension_semantics<parallel>], iteration_bounds = array<i64: 2, 1>, scalar_prefetch = 1 : i64, scratch_operands = 0 : i64, tpu.core_type = #tpu.core_type<tc>, window_params = [{transform_indices = @transform_0, window_bounds = array<i64: 1, 3, 1024>}, {pipeline_mode = #tpu.pipeline_mode<synchronous>, transform_indices = @transform_1, window_bounds = array<i64: 64, 3>}, {pipeline_mode = #tpu.pipeline_mode<synchronous>, transform_indices = @transform_2, window_bounds = array<i64: 64, 1>}, {pipeline_mode = #tpu.pipeline_mode<synchronous>, transform_indices = @transform_3, window_bounds = array<i64: 128, 64>}, {pipeline_mode = #tpu.pipeline_mode<synchronous>, transform_indices = @transform_4, window_bounds = array<i64: 128, 1>}, {pipeline_mode = #tpu.pipeline_mode<synchronous>, transform_indices = @transform_5, window_bounds = array<i64: 128, 128>}, {pipeline_mode = #tpu.pipeline_mode<synchronous>, transform_indices = @transform_6, window_bounds = array<i64: 128, 1>}, {pipeline_mode = #tpu.pipeline_mode<synchronous>, transform_indices = @transform_7, window_bounds = array<i64: 131, 128>}, {pipeline_mode = #tpu.pipeline_mode<synchronous>, transform_indices = @transform_8, window_bounds = array<i64: 128, 1>}, {pipeline_mode = #tpu.pipeline_mode<synchronous>, transform_indices = @transform_9, window_bounds = array<i64: 3, 1>}, {pipeline_mode = #tpu.pipeline_mode<synchronous>, transform_indices = @transform_10, window_bounds = array<i64: 6, 128>}, {pipeline_mode = #tpu.pipeline_mode<synchronous>, transform_indices = @transform_11, window_bounds = array<i64: 6, 1>}, {transform_indices = @transform_12, window_bounds = array<i64: 1, 12, 1024>}]} {
    %c0 = arith.constant 0 : index
    %c0_0 = arith.constant 0 : index
    %c0_1 = arith.constant 0 : index
    %0 = vector.load %arg3[%c0, %c0_0, %c0_1] : memref<1x3x1024xf32, #tpu.memory_space<vmem>>, vector<1x3x1024xf32>
    %1 = vector.shape_cast %0 : vector<1x3x1024xf32> to vector<3x1024xf32>
    %2 = vector.extract_strided_slice %1 {offsets = [0, 0], sizes = [1, 1024], strides = [1, 1]} : vector<3x1024xf32> to vector<1x1024xf32>
    %3 = vector.extract_strided_slice %1 {offsets = [1, 0], sizes = [1, 1024], strides = [1, 1]} : vector<3x1024xf32> to vector<1x1024xf32>
    %4 = vector.extract_strided_slice %1 {offsets = [2, 0], sizes = [1, 1024], strides = [1, 1]} : vector<3x1024xf32> to vector<1x1024xf32>
    %5 = arith.index_cast %arg0 : i32 to index
    %c0_2 = arith.constant 0 : index
    %6 = memref.load %arg2[%5, %c0_2] : memref<2x12xf32, #tpu.memory_space<smem>>
    %7 = vector.broadcast %6 : f32 to vector<1x1024xf32>
    %8 = arith.mulf %7, %2 : vector<1x1024xf32>
    %9 = arith.index_cast %arg0 : i32 to index
    %c1 = arith.constant 1 : index
    %10 = memref.load %arg2[%9, %c1] : memref<2x12xf32, #tpu.memory_space<smem>>
    %11 = vector.broadcast %10 : f32 to vector<1x1024xf32>
    %12 = arith.mulf %11, %3 : vector<1x1024xf32>
    %13 = arith.addf %8, %12 : vector<1x1024xf32>
    %14 = arith.index_cast %arg0 : i32 to index
    %c2 = arith.constant 2 : index
    %15 = memref.load %arg2[%14, %c2] : memref<2x12xf32, #tpu.memory_space<smem>>
    %16 = vector.broadcast %15 : f32 to vector<1x1024xf32>
    %17 = arith.mulf %16, %4 : vector<1x1024xf32>
    %18 = arith.addf %13, %17 : vector<1x1024xf32>
    %19 = arith.index_cast %arg0 : i32 to index
    %c3 = arith.constant 3 : index
    %20 = memref.load %arg2[%19, %c3] : memref<2x12xf32, #tpu.memory_space<smem>>
    %21 = vector.broadcast %20 : f32 to vector<1x1024xf32>
    %22 = arith.addf %18, %21 : vector<1x1024xf32>
    %23 = arith.index_cast %arg0 : i32 to index
    %c4 = arith.constant 4 : index
    %24 = memref.load %arg2[%23, %c4] : memref<2x12xf32, #tpu.memory_space<smem>>
    %25 = vector.broadcast %24 : f32 to vector<1x1024xf32>
    %26 = arith.mulf %25, %2 : vector<1x1024xf32>
    %27 = arith.index_cast %arg0 : i32 to index
    %c5 = arith.constant 5 : index
    %28 = memref.load %arg2[%27, %c5] : memref<2x12xf32, #tpu.memory_space<smem>>
    %29 = vector.broadcast %28 : f32 to vector<1x1024xf32>
    %30 = arith.mulf %29, %3 : vector<1x1024xf32>
    %31 = arith.addf %26, %30 : vector<1x1024xf32>
    %32 = arith.index_cast %arg0 : i32 to index
    %c6 = arith.constant 6 : index
    %33 = memref.load %arg2[%32, %c6] : memref<2x12xf32, #tpu.memory_space<smem>>
    %34 = vector.broadcast %33 : f32 to vector<1x1024xf32>
    %35 = arith.mulf %34, %4 : vector<1x1024xf32>
    %36 = arith.addf %31, %35 : vector<1x1024xf32>
    %37 = arith.index_cast %arg0 : i32 to index
    %c7 = arith.constant 7 : index
    %38 = memref.load %arg2[%37, %c7] : memref<2x12xf32, #tpu.memory_space<smem>>
    %39 = vector.broadcast %38 : f32 to vector<1x1024xf32>
    %40 = arith.addf %36, %39 : vector<1x1024xf32>
    %41 = arith.index_cast %arg0 : i32 to index
    %c8 = arith.constant 8 : index
    %42 = memref.load %arg2[%41, %c8] : memref<2x12xf32, #tpu.memory_space<smem>>
    %43 = vector.broadcast %42 : f32 to vector<1x1024xf32>
    %44 = arith.mulf %43, %2 : vector<1x1024xf32>
    %45 = arith.index_cast %arg0 : i32 to index
    %c9 = arith.constant 9 : index
    %46 = memref.load %arg2[%45, %c9] : memref<2x12xf32, #tpu.memory_space<smem>>
    %47 = vector.broadcast %46 : f32 to vector<1x1024xf32>
    %48 = arith.mulf %47, %3 : vector<1x1024xf32>
    %49 = arith.addf %44, %48 : vector<1x1024xf32>
    %50 = arith.index_cast %arg0 : i32 to index
    %c10 = arith.constant 10 : index
    %51 = memref.load %arg2[%50, %c10] : memref<2x12xf32, #tpu.memory_space<smem>>
    %52 = vector.broadcast %51 : f32 to vector<1x1024xf32>
    %53 = arith.mulf %52, %4 : vector<1x1024xf32>
    %54 = arith.addf %49, %53 : vector<1x1024xf32>
    %55 = arith.index_cast %arg0 : i32 to index
    %c11 = arith.constant 11 : index
    %56 = memref.load %arg2[%55, %c11] : memref<2x12xf32, #tpu.memory_space<smem>>
    %57 = vector.broadcast %56 : f32 to vector<1x1024xf32>
    %58 = arith.addf %54, %57 : vector<1x1024xf32>
    %59 = tpu.concatenate %22, %40, %58 in 0 : vector<1x1024xf32>, vector<1x1024xf32>, vector<1x1024xf32> -> vector<3x1024xf32>
    %60 = arith.truncf %59 : vector<3x1024xf32> to vector<3x1024xbf16>
    %c0_3 = arith.constant 0 : index
    %c0_4 = arith.constant 0 : index
    %61 = vector.load %arg4[%c0_3, %c0_4] : memref<64x3xbf16, #tpu.memory_space<vmem>>, vector<64x3xbf16>
    %cst = arith.constant dense<0.000000e+00> : vector<64x1024xf32>
    %62 = tpu.matmul %61, %60, %cst {dimension_numbers = #tpu.dot_dimension_numbers<[1], [0], [0], [1], [0, 0, 1, 1], [], []>} : vector<64x3xbf16>, vector<3x1024xbf16>, vector<64x1024xf32> -> vector<64x1024xf32>
    %63 = arith.truncf %62 : vector<64x1024xf32> to vector<64x1024xbf16>
    %c0_5 = arith.constant 0 : index
    %c0_6 = arith.constant 0 : index
    %64 = vector.load %arg5[%c0_5, %c0_6] : memref<64x1xbf16, #tpu.memory_space<vmem>>, vector<64x1xbf16>
    %65 = vector.broadcast %64 : vector<64x1xbf16> to vector<64x1024xbf16>
    %66 = arith.addf %63, %65 : vector<64x1024xbf16>
    %cst_7 = arith.constant 0.000000e+00 : bf16
    %67 = vector.broadcast %cst_7 : bf16 to vector<64x1024xbf16>
    %68 = arith.maximumf %66, %67 : vector<64x1024xbf16>
    %c0_8 = arith.constant 0 : index
    %c0_9 = arith.constant 0 : index
    %69 = vector.load %arg6[%c0_8, %c0_9] : memref<128x64xbf16, #tpu.memory_space<vmem>>, vector<128x64xbf16>
    %cst_10 = arith.constant dense<0.000000e+00> : vector<128x1024xf32>
    %70 = tpu.matmul %69, %68, %cst_10 {dimension_numbers = #tpu.dot_dimension_numbers<[1], [0], [0], [1], [0, 0, 1, 1], [], []>} : vector<128x64xbf16>, vector<64x1024xbf16>, vector<128x1024xf32> -> vector<128x1024xf32>
    %71 = arith.truncf %70 : vector<128x1024xf32> to vector<128x1024xbf16>
    %c0_11 = arith.constant 0 : index
    %c0_12 = arith.constant 0 : index
    %72 = vector.load %arg7[%c0_11, %c0_12] : memref<128x1xbf16, #tpu.memory_space<vmem>>, vector<128x1xbf16>
    %73 = vector.broadcast %72 : vector<128x1xbf16> to vector<128x1024xbf16>
    %74 = arith.addf %71, %73 : vector<128x1024xbf16>
    %cst_13 = arith.constant 0.000000e+00 : bf16
    %75 = vector.broadcast %cst_13 : bf16 to vector<128x1024xbf16>
    %76 = arith.maximumf %74, %75 : vector<128x1024xbf16>
    %c0_14 = arith.constant 0 : index
    %c0_15 = arith.constant 0 : index
    %77 = vector.load %arg8[%c0_14, %c0_15] : memref<128x128xbf16, #tpu.memory_space<vmem>>, vector<128x128xbf16>
    %cst_16 = arith.constant dense<0.000000e+00> : vector<128x1024xf32>
    %78 = tpu.matmul %77, %76, %cst_16 {dimension_numbers = #tpu.dot_dimension_numbers<[1], [0], [0], [1], [0, 0, 1, 1], [], []>} : vector<128x128xbf16>, vector<128x1024xbf16>, vector<128x1024xf32> -> vector<128x1024xf32>
    %79 = arith.truncf %78 : vector<128x1024xf32> to vector<128x1024xbf16>
    %c0_17 = arith.constant 0 : index
    %c0_18 = arith.constant 0 : index
    %80 = vector.load %arg9[%c0_17, %c0_18] : memref<128x1xbf16, #tpu.memory_space<vmem>>, vector<128x1xbf16>
    %81 = vector.broadcast %80 : vector<128x1xbf16> to vector<128x1024xbf16>
    %82 = arith.addf %79, %81 : vector<128x1024xbf16>
    %cst_19 = arith.constant 0.000000e+00 : bf16
    %83 = vector.broadcast %cst_19 : bf16 to vector<128x1024xbf16>
    %84 = arith.maximumf %82, %83 : vector<128x1024xbf16>
    %c0_20 = arith.constant 0 : index
    %c0_21 = arith.constant 0 : index
    %85 = vector.load %arg10[%c0_20, %c0_21] : memref<131x128xbf16, #tpu.memory_space<vmem>>, vector<131x128xbf16>
    %cst_22 = arith.constant dense<0.000000e+00> : vector<131x1024xf32>
    %86 = tpu.matmul %85, %84, %cst_22 {dimension_numbers = #tpu.dot_dimension_numbers<[1], [0], [0], [1], [0, 0, 1, 1], [], []>} : vector<131x128xbf16>, vector<128x1024xbf16>, vector<131x1024xf32> -> vector<131x1024xf32>
    %87 = vector.extract_strided_slice %86 {offsets = [0, 0], sizes = [128, 1024], strides = [1, 1]} : vector<131x1024xf32> to vector<128x1024xf32>
    %88 = arith.truncf %87 : vector<128x1024xf32> to vector<128x1024xbf16>
    %c0_23 = arith.constant 0 : index
    %c0_24 = arith.constant 0 : index
    %89 = vector.load %arg11[%c0_23, %c0_24] : memref<128x1xbf16, #tpu.memory_space<vmem>>, vector<128x1xbf16>
    %90 = vector.broadcast %89 : vector<128x1xbf16> to vector<128x1024xbf16>
    %91 = arith.addf %88, %90 : vector<128x1024xbf16>
    %cst_25 = arith.constant 0.000000e+00 : bf16
    %92 = vector.broadcast %cst_25 : bf16 to vector<128x1024xbf16>
    %93 = arith.maximumf %91, %92 : vector<128x1024xbf16>
    %94 = vector.extract_strided_slice %86 {offsets = [128, 0], sizes = [3, 1024], strides = [1, 1]} : vector<131x1024xf32> to vector<3x1024xf32>
    %c0_26 = arith.constant 0 : index
    %c0_27 = arith.constant 0 : index
    %95 = vector.load %arg12[%c0_26, %c0_27] : memref<3x1xf32, #tpu.memory_space<vmem>>, vector<3x1xf32>
    %96 = vector.broadcast %95 : vector<3x1xf32> to vector<3x1024xf32>
    %97 = arith.addf %94, %96 : vector<3x1024xf32>
    %98 = vector.extract_strided_slice %97 {offsets = [0, 0], sizes = [1, 1024], strides = [1, 1]} : vector<3x1024xf32> to vector<1x1024xf32>
    %99 = vector.extract_strided_slice %97 {offsets = [1, 0], sizes = [1, 1024], strides = [1, 1]} : vector<3x1024xf32> to vector<1x1024xf32>
    %100 = arith.maximumf %98, %99 : vector<1x1024xf32>
    %101 = vector.extract_strided_slice %97 {offsets = [2, 0], sizes = [1, 1024], strides = [1, 1]} : vector<3x1024xf32> to vector<1x1024xf32>
    %102 = arith.maximumf %100, %101 : vector<1x1024xf32>
    %103 = vector.broadcast %102 : vector<1x1024xf32> to vector<3x1024xf32>
    %104 = arith.subf %97, %103 : vector<3x1024xf32>
    %105 = math.exp %104 : vector<3x1024xf32>
    %106 = vector.extract_strided_slice %105 {offsets = [0, 0], sizes = [1, 1024], strides = [1, 1]} : vector<3x1024xf32> to vector<1x1024xf32>
    %107 = vector.extract_strided_slice %105 {offsets = [1, 0], sizes = [1, 1024], strides = [1, 1]} : vector<3x1024xf32> to vector<1x1024xf32>
    %108 = arith.addf %106, %107 : vector<1x1024xf32>
    %109 = vector.extract_strided_slice %105 {offsets = [2, 0], sizes = [1, 1024], strides = [1, 1]} : vector<3x1024xf32> to vector<1x1024xf32>
    %110 = arith.addf %108, %109 : vector<1x1024xf32>
    %111 = vector.broadcast %110 : vector<1x1024xf32> to vector<3x1024xf32>
    %112 = arith.divf %105, %111 : vector<3x1024xf32>
    %c0_28 = arith.constant 0 : index
    %c0_29 = arith.constant 0 : index
    %113 = vector.load %arg13[%c0_28, %c0_29] : memref<6x128xbf16, #tpu.memory_space<vmem>>, vector<6x128xbf16>
    %cst_30 = arith.constant dense<0.000000e+00> : vector<6x1024xf32>
    %114 = tpu.matmul %113, %93, %cst_30 {dimension_numbers = #tpu.dot_dimension_numbers<[1], [0], [0], [1], [0, 0, 1, 1], [], []>} : vector<6x128xbf16>, vector<128x1024xbf16>, vector<6x1024xf32> -> vector<6x1024xf32>
    %c0_31 = arith.constant 0 : index
    %c0_32 = arith.constant 0 : index
    %115 = vector.load %arg14[%c0_31, %c0_32] : memref<6x1xf32, #tpu.memory_space<vmem>>, vector<6x1xf32>
    %116 = vector.broadcast %115 : vector<6x1xf32> to vector<6x1024xf32>
    %117 = arith.addf %114, %116 : vector<6x1024xf32>
    %118 = arith.negf %117 : vector<6x1024xf32>
    %119 = math.exp %118 : vector<6x1024xf32>
    %cst_33 = arith.constant 1.000000e+00 : f32
    %120 = vector.broadcast %cst_33 : f32 to vector<6x1024xf32>
    %121 = arith.addf %120, %119 : vector<6x1024xf32>
    %122 = arith.divf %120, %121 : vector<6x1024xf32>
    %cst_34 = arith.constant 5.000000e-01 : f32
    %123 = vector.broadcast %cst_34 : f32 to vector<6x1024xf32>
    %124 = arith.subf %122, %123 : vector<6x1024xf32>
    %c0_35 = arith.constant 0 : index
    %c0_36 = arith.constant 0 : index
    %c0_37 = arith.constant 0 : index
    %125 = vector.load %arg15[%c0_35, %c0_36, %c0_37] : memref<1x12x1024xf32, #tpu.memory_space<vmem>>, vector<1x3x1024xf32>
    %126 = vector.shape_cast %125 : vector<1x3x1024xf32> to vector<3x1024xf32>
    %127 = vector.shape_cast %59 : vector<3x1024xf32> to vector<1x3x1024xf32>
    tpu.vector_store %arg15[%c0_35, %c0_36, %c0_37], %127 {strides = array<i32>} : memref<1x12x1024xf32, #tpu.memory_space<vmem>>, vector<1x3x1024xf32>,
    %c0_38 = arith.constant 0 : index
    %c3_39 = arith.constant 3 : index
    %c0_40 = arith.constant 0 : index
    %128 = vector.load %arg15[%c0_38, %c3_39, %c0_40] : memref<1x12x1024xf32, #tpu.memory_space<vmem>>, vector<1x3x1024xf32>
    %129 = vector.shape_cast %128 : vector<1x3x1024xf32> to vector<3x1024xf32>
    %130 = vector.shape_cast %112 : vector<3x1024xf32> to vector<1x3x1024xf32>
    tpu.vector_store %arg15[%c0_38, %c3_39, %c0_40], %130 {strides = array<i32>} : memref<1x12x1024xf32, #tpu.memory_space<vmem>>, vector<1x3x1024xf32>,
    %c0_41 = arith.constant 0 : index
    %c6_42 = arith.constant 6 : index
    %c0_43 = arith.constant 0 : index
    %131 = vector.load %arg15[%c0_41, %c6_42, %c0_43] : memref<1x12x1024xf32, #tpu.memory_space<vmem>>, vector<1x6x1024xf32>
    %132 = vector.shape_cast %131 : vector<1x6x1024xf32> to vector<6x1024xf32>
    %133 = vector.shape_cast %124 : vector<6x1024xf32> to vector<1x6x1024xf32>
    tpu.vector_store %arg15[%c0_41, %c6_42, %c0_43], %133 {strides = array<i32>} : memref<1x12x1024xf32, #tpu.memory_space<vmem>>, vector<1x6x1024xf32>,
    return
  }
  func.func @transform_0(%arg0: i32, %arg1: i32, %arg2: memref<2x12xf32, #tpu.memory_space<smem>>) -> (i32, i32, i32) {
    %c0_i32 = arith.constant 0 : i32
    %c0_i32_0 = arith.constant 0 : i32
    return %arg0, %c0_i32, %arg1 : i32, i32, i32
  }
  func.func @transform_1(%arg0: i32, %arg1: i32, %arg2: memref<2x12xf32, #tpu.memory_space<smem>>) -> (i32, i32) {
    %c0_i32 = arith.constant 0 : i32
    %c0_i32_0 = arith.constant 0 : i32
    %c0_i32_1 = arith.constant 0 : i32
    return %c0_i32, %c0_i32_0 : i32, i32
  }
  func.func @transform_2(%arg0: i32, %arg1: i32, %arg2: memref<2x12xf32, #tpu.memory_space<smem>>) -> (i32, i32) {
    %c0_i32 = arith.constant 0 : i32
    %c0_i32_0 = arith.constant 0 : i32
    %c0_i32_1 = arith.constant 0 : i32
    return %c0_i32, %c0_i32_0 : i32, i32
  }
  func.func @transform_3(%arg0: i32, %arg1: i32, %arg2: memref<2x12xf32, #tpu.memory_space<smem>>) -> (i32, i32) {
    %c0_i32 = arith.constant 0 : i32
    %c0_i32_0 = arith.constant 0 : i32
    %c0_i32_1 = arith.constant 0 : i32
    return %c0_i32, %c0_i32_0 : i32, i32
  }
  func.func @transform_4(%arg0: i32, %arg1: i32, %arg2: memref<2x12xf32, #tpu.memory_space<smem>>) -> (i32, i32) {
    %c0_i32 = arith.constant 0 : i32
    %c0_i32_0 = arith.constant 0 : i32
    %c0_i32_1 = arith.constant 0 : i32
    return %c0_i32, %c0_i32_0 : i32, i32
  }
  func.func @transform_5(%arg0: i32, %arg1: i32, %arg2: memref<2x12xf32, #tpu.memory_space<smem>>) -> (i32, i32) {
    %c0_i32 = arith.constant 0 : i32
    %c0_i32_0 = arith.constant 0 : i32
    %c0_i32_1 = arith.constant 0 : i32
    return %c0_i32, %c0_i32_0 : i32, i32
  }
  func.func @transform_6(%arg0: i32, %arg1: i32, %arg2: memref<2x12xf32, #tpu.memory_space<smem>>) -> (i32, i32) {
    %c0_i32 = arith.constant 0 : i32
    %c0_i32_0 = arith.constant 0 : i32
    %c0_i32_1 = arith.constant 0 : i32
    return %c0_i32, %c0_i32_0 : i32, i32
  }
  func.func @transform_7(%arg0: i32, %arg1: i32, %arg2: memref<2x12xf32, #tpu.memory_space<smem>>) -> (i32, i32) {
    %c0_i32 = arith.constant 0 : i32
    %c0_i32_0 = arith.constant 0 : i32
    %c0_i32_1 = arith.constant 0 : i32
    return %c0_i32, %c0_i32_0 : i32, i32
  }
  func.func @transform_8(%arg0: i32, %arg1: i32, %arg2: memref<2x12xf32, #tpu.memory_space<smem>>) -> (i32, i32) {
    %c0_i32 = arith.constant 0 : i32
    %c0_i32_0 = arith.constant 0 : i32
    %c0_i32_1 = arith.constant 0 : i32
    return %c0_i32, %c0_i32_0 : i32, i32
  }
  func.func @transform_9(%arg0: i32, %arg1: i32, %arg2: memref<2x12xf32, #tpu.memory_space<smem>>) -> (i32, i32) {
    %c0_i32 = arith.constant 0 : i32
    %c0_i32_0 = arith.constant 0 : i32
    %c0_i32_1 = arith.constant 0 : i32
    return %c0_i32, %c0_i32_0 : i32, i32
  }
  func.func @transform_10(%arg0: i32, %arg1: i32, %arg2: memref<2x12xf32, #tpu.memory_space<smem>>) -> (i32, i32) {
    %c0_i32 = arith.constant 0 : i32
    %c0_i32_0 = arith.constant 0 : i32
    %c0_i32_1 = arith.constant 0 : i32
    return %c0_i32, %c0_i32_0 : i32, i32
  }
  func.func @transform_11(%arg0: i32, %arg1: i32, %arg2: memref<2x12xf32, #tpu.memory_space<smem>>) -> (i32, i32) {
    %c0_i32 = arith.constant 0 : i32
    %c0_i32_0 = arith.constant 0 : i32
    %c0_i32_1 = arith.constant 0 : i32
    return %c0_i32, %c0_i32_0 : i32, i32
  }
  func.func @transform_12(%arg0: i32, %arg1: i32, %arg2: memref<2x12xf32, #tpu.memory_space<smem>>) -> (i32, i32, i32) {
    %c0_i32 = arith.constant 0 : i32
    %c0_i32_0 = arith.constant 0 : i32
    return %arg0, %c0_i32, %arg1 : i32, i32, i32
  }
}

</mosaic_0001>

<bundles_post_ra>
// kernel: sub.1
= control target key start
LH: loop header
LB: loop body
LE: loop exit
PB: predicated region body
PF: predicated region fallthrough
CT: control target
= control target key end

     0   :  { %s56_s0 = inlined_call_operand.vmem [shape: f32[2,3,1], index: 0, kind: input, shape index: {}]   ;;  %s57_s1 = inlined_call_operand.vmem [shape: f32[2,3,1], index: 1, kind: input, shape index: {}]   ;;  %s58_s2 = inlined_call_operand.vmem [shape: f32[2,3,1], index: 2, kind: output, shape index: {}]  }
   0x1   :  { %v3_v0 = vld [vmem:[%s56_s0] sm:$0x1]  ;;  %v20_v2 = vld [vmem:[%s56_s0 + $0x1] sm:$0x1] }
   0x2   :  { %v4_v1 = vld [vmem:[%s57_s1] sm:$0x1]  ;;  %v21_v4 = vld [vmem:[%s57_s1 + $0x1] sm:$0x1] }
   0x3   :  { %v7_v3 = vsub.f32 %v3_v0, %v4_v1  ;;  %v16_v5 = vsub.f32 %v20_v2, %v21_v4 }
   0x5   :  { %9 = vst [vmem:[%s58_s2] sm:$0x1] %v7_v3 }
   0x6   :  { %22 = vst [vmem:[%s58_s2 + $0x1] sm:$0x1] %v16_v5 }

// kernel: coordnet_forward.1
= control target key start
LH: loop header
LB: loop body
LE: loop exit
PB: predicated region body
PF: predicated region fallthrough
CT: control target
= control target key end

     0   :  { %s6714_s28 = smov [#allocation3]   ;;  %s9606_s0 = inlined_call_operand.vmem [shape: f32[2,12], index: 0, kind: input, shape index: {}]   ;;  %s9607_s1 = inlined_call_operand.vmem [shape: f32[2,3,1024], index: 1, kind: input, shape index: {}]   ;;  %s9608_s2 = inlined_call_operand.vmem [shape: bf16[64,3], index: 2, kind: input, shape index: {}]   ;;  %s9609_s3 = inlined_call_operand.vmem [shape: bf16[64,1], index: 3, kind: input, shape index: {}]   ;;  %s9610_s4 = inlined_call_operand.vmem [shape: bf16[128,64], index: 4, kind: input, shape index: {}]   ;;  %s9611_s5 = inlined_call_operand.vmem [shape: bf16[128,1], index: 5, kind: input, shape index: {}]   ;;  %s9612_s6 = inlined_call_operand.vmem [shape: bf16[128,128], index: 6, kind: input, shape index: {}]   ;;  %s9613_s7 = inlined_call_operand.vmem [shape: bf16[128,1], index: 7, kind: input, shape index: {}]   ;;  %s9614_s8 = inlined_call_operand.vmem [shape: bf16[131,128], index: 8, kind: input, shape index: {}]   ;;  %s9615_s9 = inlined_call_operand.vmem [shape: bf16[128,1], index: 9, kind: input, shape index: {}]   ;;  %s9616_s10 = inlined_call_operand.vmem [shape: f32[3,1], index: 10, kind: input, shape index: {}]   ;;  %s9617_s11 = inlined_call_operand.vmem [shape: bf16[6,128], index: 11, kind: input, shape index: {}]   ;;  %s9618_s12 = inlined_call_operand.vmem [shape: f32[6,1], index: 12, kind: input, shape index: {}]   ;;  %s9619_s13 = inlined_call_operand.vmem [shape: f32[2,12,1024], index: 13, kind: output, shape index: {}]  }
   0x1   :  { %9713 = sst [smem:[#allocation36_spill]] %s9607_s1  ;;  %s19_s27 = sshll.u32 %s9606_s0, 4  ;;  %s20_s27 = int_to_ptr.vmem [resolvable:$true] %s19_s27 }
   0x2   :  { %22 = dma.vmem_to_smem %s20_s27, 32, %s6714_s28, [#allocation2] }
   0x3   :  { %6700 = dma.done.wait [#allocation2], 32 }
   0x4   :  { %6701 = vsyncadd [#allocation2], 4294967264 }
   0x5   :  { %25 = sfence }
   0x6   :  { %s6791_s29 = smov 0   ;;  %s6793_s30 = smov 0  }
   0x7   :  { %s6795_s14 = smov 0  }
   0x8 LB: > { %9714 = sst [smem:[#allocation5_spill]] %s6708_s30  ;;  %s43_s0 = sadd.s32 1, %s6708_s30  ;;  %s6712_s14 = sphi %s6795_s14, %s31_s14   ;;  %s6708_s30 = sphi %s6793_s30, %s9933_s30   ;;  %s6704_s29 = sphi %s6791_s29, %s9932_s29  }
   0x9   : > { %p6286_p0 = scmp.ge.s32.totalorder %s6712_s14, 1  ;;  %p45_p1 = scmp.ge.s32.totalorder %s43_s0, 2 }
   0xa   : > { %p392_p2 = scmp.lt.s32.totalorder %s6712_s14, 3 }
   0xb   : > { %s9935_s0 = smov (%p45_p1, %s43_s0), 0 }
   0xc   : > { %9715 = sst [smem:[#allocation6_spill]] %s9935_s0  ;;  %p393_p3 = pnand %p6286_p0, %p392_p2 }
   0xe   : > { %396 = sbr.rel (%p393_p3) target bundleno = 1470 (0x5be), region = 68 }
  0x13   : > { %v1094_v0 = vld [vmem:[%s9609_s3 + $0x18] sm:$0xf]  ;;  %v1092_v1 = vld [vmem:[%s9609_s3 + $0x10] sm:$0xf]  ;;  %p443_p4 = scmp.lt.s32.totalorder %s6704_s29, 1  ;;  %v6715_v2 = vmov 0  }
  0x14   : > { %6602 = vset.pattern.permute.xlu2 %v6715_v2  ;;  %6601 = vset.pattern.permute.xlu1 %v6715_v2  ;;  %v1090_v3 = vld [vmem:[%s9609_s3 + $0x8] sm:$0xf]  ;;  %s6820_s22 = sshll.u32 %s6704_s29, 7  ;;  %v1093_v4 = vld [vmem:[%s9609_s3 + $0x14] sm:$0xf]  ;;  %s9716_s1 = sld [smem:[#allocation36_spill]] }
  0x15   : > { %6600 = vset.pattern.permute.xlu0 %v6715_v2  ;;  %1134 = vperm.xlu1 %6601, %v1092_v1   ;;  %s6818_s21 = scalar_select %p443_p4, %s6704_s29, 1  ;;  %v1095_v5 = vld [vmem:[%s9609_s3 + $0x1c] sm:$0xf]  ;;  %v1091_v6 = vld [vmem:[%s9609_s3 + $0xc] sm:$0xf]  ;;  %vm731_vm0 = vcmask 1040384  }
  0x16   : > { %1152 = vperm.xlu0 %6600, %v1094_v0   ;;  %1116 = vperm.xlu2 %6602, %v1090_v3   ;;  %s468_s18 = sld [smem:[#allocation3 + %s6820_s22]]  ;;  %s474_s19 = sadd.s32 1, %s6820_s22  ;;  %v1089_v10 = vld [vmem:[%s9609_s3 + $0x4] sm:$0xf]  ;;  %v2047_v13 = vld [vmem:[%s9611_s5 + $0x38] sm:$0xf] }
  0x17   : > { %s6542_s23 = sshll.u32 %s6818_s21, 5  ;;  %s475_s20 = sld [smem:[#allocation3 + %s474_s19]]  ;;  %v1088_v14 = vld [vmem:[%s9609_s3] sm:$0xf]  ;;  %v2045_v39 = vld [vmem:[%s9611_s5 + $0x30] sm:$0xf] }
  0x18   : > { %s501_s24 = sadd.s32 2, %s6820_s22  ;;  %s535_s27 = sadd.s32 4, %s6820_s22  ;;  %v2046_v44 = vld [vmem:[%s9611_s5 + $0x34] sm:$0xf]  ;;  %v2048_v45 = vld [vmem:[%s9611_s5 + $0x3c] sm:$0xf] }
  0x19   : > { %s502_s25 = sld [smem:[#allocation3 + %s501_s24]]  ;;  %s542_s16 = sadd.s32 5, %s6820_s22  ;;  %vm740_vm1 = vcmask 1041408   ;;  %vm785_vm2 = vcmask 23552   ;;  %vm1552_vm3 = vcmask 523264  }
  0x1a   : > { %s6829_s28 = scalar_lea.vmem %s9716_s1, %s6542_s23  ;;  %s528_s23 = sadd.s32 3, %s6820_s22 }
  0x1b   : > { %s6841_s26 = sld [smem:[#allocation3 + %s528_s23]]  ;;  %v463_v7 = vld [vmem:[%s6829_s28] sm:$0x77]  ;;  %s569_s17 = sadd.s32 6, %s6820_s22  ;;  %v6850_v8 = vld [vmem:[%s6829_s28 + $0x8] sm:$0x77] }
  0x1c   : > { %s536_s15 = sld [smem:[#allocation3 + %s535_s27]]  ;;  %v6852_v9 = vstv %s468_s18  ;;  %s596_s24 = sadd.s32 7, %s6820_s22 }
  0x1d   : > { %1143 = vperm.xlu1 %6601, %v1093_v4   ;;  %s6846_s29 = sld [smem:[#allocation3 + %s542_s16]]  ;;  %v470_v11 = vmul.f32 %v6852_v9, %v463_v7  ;;  %v6861_v12 = vstv %s475_s20  ;;  %s603_s27 = sadd.s32 8, %s6820_s22  ;;  %v471_v17 = vmul.f32 %v6852_v9, %v6850_v8 }
  0x1e   : > { %1161 = vperm.xlu0 %6600, %v1095_v5   ;;  %1125 = vperm.xlu2 %6602, %v1091_v6   ;;  %s6854_s19 = sld [smem:[#allocation3 + %s569_s17]]  ;;  %v477_v15 = vmul.f32 %v6861_v12, %v463_v7  ;;  %s610_s0 = sadd.s32 9, %s6820_s22  ;;  %v478_v18 = vmul.f32 %v6861_v12, %v6850_v8 }
  0x1f   : > { %s6863_s23 = sld [smem:[#allocation3 + %s596_s24]]  ;;  %v6873_v16 = vstv %s502_s25  ;;  %s637_s20 = sadd.s32 10, %s6820_s22 }
  0x20   : > { %s604_s1 = sld [smem:[#allocation3 + %s603_s27]]  ;;  %v504_v19 = vmul.f32 %v6873_v16, %v463_v7  ;;  %v505_v20 = vmul.f32 %v6873_v16, %v6850_v8  ;;  %v6292_v21 = vrot.slane %v477_v15, 9  ;;  %s664_s24 = sadd.s32 11, %s6820_s22  ;;  %v6293_v23 = vrot.slane %v478_v18, 9 }
  0x21   : > { %s611_s30 = sld [smem:[#allocation3 + %s610_s0]]  ;;  %v6900_v32 = vstv %s6841_s26 }
  0x22   : > { %v6884_v22 = vstv %s536_s15  ;;  %s6886_s25 = sld [smem:[#allocation3 + %s637_s20]]  ;;  %v6296_v24 = vrot.slane %v504_v19, 10  ;;  %v6297_v27 = vrot.slane %v505_v20, 10  ;;  %v497_v28 = vadd.f32 %v6292_v21, %v470_v11  ;;  %v2041_v19 = vld [vmem:[%s9611_s5 + $0x20] sm:$0xf]  ;;  %s6543_s20 = sshll.u32 %s6818_s21, 7 }
  0x23   : > { %v538_v25 = vmul.f32 %v6884_v22, %v463_v7  ;;  %v6891_v26 = vstv %s6846_s29  ;;  %s6893_s27 = sld [smem:[#allocation3 + %s664_s24]]  ;;  %v498_v31 = vadd.f32 %v6293_v23, %v471_v17  ;;  %v539_v38 = vmul.f32 %v6884_v22, %v6850_v8  ;;  %v2043_v20 = vld [vmem:[%s9611_s5 + $0x28] sm:$0xf]  ;;  %s6962_s21 = scalar_lea.vmem %s9619_s13, %s6543_s20 }
  0x24   : > { %v545_v29 = vmul.f32 %v6891_v26, %v463_v7  ;;  %v6897_v30 = vstv %s6854_s19  ;;  %v546_v34 = vmul.f32 %v6891_v26, %v6850_v8  ;;  %v524_v35 = vadd.f32 %v6296_v24, %v497_v28 }
  0x25   : > { %1107 = vperm.xlu1 %6601, %v1089_v10   ;;  %v572_v33 = vmul.f32 %v6897_v30, %v463_v7  ;;  %v525_v42 = vadd.f32 %v6297_v27, %v498_v31  ;;  %v6927_v51 = vstv %s6863_s23  ;;  %v573_v58 = vmul.f32 %v6897_v30, %v6850_v8 }
  0x26   : > { %2177 = vperm.xlu2 %6602, %v2047_v13   ;;  %1098 = vperm.xlu0 %6600, %v1088_v14   ;;  %v6300_v36 = vrot.slane %v545_v29, 9  ;;  %v6905_v37 = vstv %s604_s1  ;;  %v6301_v43 = vrot.slane %v546_v34, 9  ;;  %v531_v50 = vadd.f32 %v6900_v32, %v524_v35  ;;  %v2044_v14 = vld [vmem:[%s9611_s5 + $0x2c] sm:$0xf] }
  0x27   : > { %v6304_v40 = vrot.slane %v572_v33, 10  ;;  %v6912_v41 = vstv %s611_s30  ;;  %v606_v47 = vmul.f32 %v6905_v37, %v463_v7  ;;  %v607_v59 = vmul.f32 %v6905_v37, %v6850_v8 }
  0x28   : > { %v565_v46 = vadd.f32 %v6300_v36, %v538_v25  ;;  %v613_v48 = vmul.f32 %v6912_v41, %v463_v7  ;;  %v6923_v49 = vstv %s6886_s25  ;;  %v566_v56 = vadd.f32 %v6301_v43, %v539_v38 }
  0x29   : > { %v640_v52 = vmul.f32 %v6923_v49, %v463_v7  ;;  %v6931_v55 = vstv %s6893_s27  ;;  %v614_v60 = vmul.f32 %v6912_v41, %v6850_v8  ;;  %v532_v63 = vadd.f32 %v6900_v32, %v525_v42 }
  0x2a   : > { %v592_v53 = vadd.f32 %v6304_v40, %v565_v46  ;;  %v6308_v54 = vrot.slane %v613_v48, 9  ;;  %v641_v0 = vmul.f32 %v6923_v49, %v6850_v8  ;;  %v675_v1 = vperm.slane %v531_v50, 0 }
  0x2b   : > { %v6312_v57 = vrot.slane %v640_v52, 10  ;;  %v676_v2 = vperm.slane %v531_v50, 4  ;;  %v6305_v3 = vrot.slane %v573_v58, 10  ;;  %v6309_v4 = vrot.slane %v614_v60, 9  ;;  %v6979_v50 = vld [vmem:[%s9608_s2] sm:$0xff] }
  0x2c   : > { %v599_v61 = vadd.f32 %v6927_v51, %v592_v53  ;;  %v633_v62 = vadd.f32 %v6308_v54, %v606_v47  ;;  %v6313_v10 = vrot.slane %v641_v0, 10  ;;  %v6716_v17 = vmov 65535   ;;  %v2039_v52 = vld [vmem:[%s9611_s5 + $0x18] sm:$0xf]  ;;  %v2033_v0 = vld [vmem:[%s9611_s5] sm:$0xf] }
  0x2d   : > { %2159 = vperm.xlu1 %6601, %v2045_v39   ;;  %v593_v11 = vadd.f32 %v6305_v3, %v566_v56  ;;  %v634_v13 = vadd.f32 %v6309_v4, %v607_v59  ;;  %v798_v8 = vsel %vm731_vm0, 4294967295, %v6716_v17  ;;  %v677_v18 = vperm.slane %v532_v63, 0  ;;  %v2040_v56 = vld [vmem:[%s9611_s5 + $0x1c] sm:$0xf]  ;;  %v2036_v3 = vld [vmem:[%s9611_s5 + $0xc] sm:$0xf] }
  0x2e   : > { %2168 = vperm.xlu2 %6602, %v2046_v44   ;;  %2186 = vperm.xlu0 %6600, %v2048_v45   ;;  %v660_v5 = vadd.f32 %v6312_v57, %v633_v62  ;;  %v695_v6 = vperm.slane %v599_v61, 0  ;;  %v696_v7 = vperm.slane %v599_v61, 4  ;;  %v678_v29 = vperm.slane %v532_v63, 4  ;;  %v2042_v57 = vld [vmem:[%s9611_s5 + $0x24] sm:$0xf] }
  0x2f   : > { %v600_v24 = vadd.f32 %v6927_v51, %v593_v11  ;;  %v661_v25 = vadd.f32 %v6313_v10, %v634_v13  ;;  %v6966_v36 = vsel %vm740_vm1, %v798_v8, 0  ;;  %v2038_v61 = vld [vmem:[%s9611_s5 + $0x14] sm:$0xf]  ;;  %v2035_v62 = vld [vmem:[%s9611_s5 + $0x8] sm:$0xf] }
  0x30   : > { %v667_v15 = vadd.f32 %v6931_v55, %v660_v5  ;;  %v732_v21 = vsel %vm731_vm0, %v675_v1, %v695_v6  ;;  %v733_v23 = vsel %vm731_vm0, %v676_v2, %v696_v7  ;;  %v2037_v63 = vld [vmem:[%s9611_s5 + $0x10] sm:$0xf]  ;;  %v7018_v1 = vld [vmem:[%s9608_s2 + $0x8] sm:$0xff]  ;;  %v2034_v2 = vld [vmem:[%s9611_s5 + $0x4] sm:$0xf] }
  0x31   : > { %v668_v31 = vadd.f32 %v6931_v55, %v661_v25  ;;  %v697_v33 = vperm.slane %v600_v24, 0  ;;  %v698_v34 = vperm.slane %v600_v24, 4  ;;  %v465_v4 = vld [vmem:[%s6829_s28 + $0x10] sm:$0x77]  ;;  %v466_v5 = vld [vmem:[%s6829_s28 + $0x18] sm:$0x77] }
  0x32   : > { %v715_v27 = vperm.slane %v667_v15, 0  ;;  %v716_v28 = vperm.slane %v667_v15, 4  ;;  %v479_v6 = vmul.f32 %v6861_v12, %v465_v4  ;;  %v547_v7 = vmul.f32 %v6891_v26, %v465_v4 }
  0x33   : > { %v717_v42 = vperm.slane %v668_v31, 0  ;;  %v734_v43 = vsel %vm731_vm0, %v677_v18, %v697_v33  ;;  %v718_v44 = vperm.slane %v668_v31, 4  ;;  %v735_v45 = vsel %vm731_vm0, %v678_v29, %v698_v34 }
  0x34   : > { %v741_v35 = vsel %vm740_vm1, %v732_v21, %v715_v27  ;;  %v742_v38 = vsel %vm740_vm1, %v733_v23, %v716_v28  ;;  %v615_v10 = vmul.f32 %v6912_v41, %v465_v4  ;;  %v480_v11 = vmul.f32 %v6861_v12, %v466_v5  ;;  %v3381_v27 = vld [vmem:[%s9613_s7 + $0x30] sm:$0xf]  ;;  %v3383_v28 = vld [vmem:[%s9613_s7 + $0x38] sm:$0xf] }
  0x35   : > { %2150 = vperm.xlu1 %6601, %v2044_v14   ;;  %v749_v39 = vpack.c.bf16 %v741_v35, %v741_v35  ;;  %6115 = vst [vmem:[%s6962_s21] sm:$0x7] %v741_v35  ;;  %v750_v40 = vpack.c.bf16 %v742_v38, %v742_v38  ;;  %v743_v48 = vsel %vm740_vm1, %v734_v43, %v717_v42  ;;  %v6294_v17 = vrot.slane %v479_v6, 9 }
  0x36   : > { %2123 = vperm.xlu2 %6602, %v2041_v19   ;;  %2141 = vperm.xlu0 %6600, %v2043_v20   ;;  %6116 = vst [vmem:[%s6962_s21 + $0x8] sm:$0x7] %v742_v38  ;;  %v751_v53 = vpack.c.bf16 %v743_v48, %v743_v48  ;;  %v744_v54 = vsel %vm740_vm1, %v735_v45, %v718_v44  ;;  %v6302_v19 = vrot.slane %v547_v7, 9  ;;  %v6310_v12 = vrot.slane %v615_v10, 9 }
  0x37   : > { %v801_v46 = vand.u32 %v6966_v36, %v749_v39  ;;  %v804_v47 = vand.u32 %v6966_v36, %v750_v40  ;;  %6117 = vst [vmem:[%s6962_s21 + $0x10] sm:$0x7] %v743_v48  ;;  %v752_v58 = vpack.c.bf16 %v744_v54, %v744_v54  ;;  %v548_v13 = vmul.f32 %v6891_v26, %v466_v5  ;;  %v3384_v26 = vld [vmem:[%s9613_s7 + $0x3c] sm:$0xf] }
  0x38   : > { %6118 = vst [vmem:[%s6962_s21 + $0x18] sm:$0x7] %v744_v54  ;;  %v807_v59 = vand.u32 %v6966_v36, %v751_v53  ;;  %v616_v14 = vmul.f32 %v6912_v41, %v466_v5  ;;  %v472_v15 = vmul.f32 %v6852_v9, %v465_v4  ;;  %v506_v8 = vmul.f32 %v6873_v16, %v465_v4 }
  0x39   : > { %831 = vmatpush.bf16.msra.mxu0 %v801_v46  ;;  %860 = vmatpush.bf16.msra.mxu1 %v804_v47  ;;  %v810_v60 = vand.u32 %v6966_v36, %v752_v58  ;;  %v540_v18 = vmul.f32 %v6884_v22, %v465_v4  ;;  %v574_v20 = vmul.f32 %v6897_v30, %v465_v4  ;;  %v6295_v43 = vrot.slane %v480_v11, 9 }
  0x3a   : > { %889 = vmatpush.bf16.msra.mxu2 %v807_v59  ;;  %v608_v21 = vmul.f32 %v6905_v37, %v465_v4  ;;  %v499_v41 = vadd.f32 %v6294_v17, %v472_v15  ;;  %v6298_v23 = vrot.slane %v506_v8, 10  ;;  %v642_v24 = vmul.f32 %v6923_v49, %v465_v4  ;;  %v7069_v59 = vld [vmem:[%s9608_s2 + $0x10] sm:$0xff] }
  0x3b   : > { %918 = vmatpush.bf16.msra.mxu3 %v810_v60  ;;  %v473_v25 = vmul.f32 %v6852_v9, %v466_v5  ;;  %v567_v29 = vadd.f32 %v6302_v19, %v540_v18  ;;  %v507_v33 = vmul.f32 %v6873_v16, %v466_v5  ;;  %v541_v34 = vmul.f32 %v6884_v22, %v466_v5  ;;  %v3380_v60 = vld [vmem:[%s9613_s7 + $0x2c] sm:$0xf] }
  0x3c   : > { %6332 = vmatmul.msk.bf16.vlgmr.msra.gmra.mxu0 %vm785_vm2, %v6979_v50  ;;  %6336 = vmatmul.msk.bf16.vlgmr.msra.gmra.mxu1 %vm785_vm2, %v6979_v50  ;;  %v635_v31 = vadd.f32 %v6310_v12, %v608_v21  ;;  %v526_v35 = vadd.f32 %v6298_v23, %v499_v41  ;;  %v575_v9 = vmul.f32 %v6897_v30, %v466_v5  ;;  %v6306_v40 = vrot.slane %v574_v20, 10  ;;  %v3378_v23 = vld [vmem:[%s9613_s7 + $0x24] sm:$0xf] }
  0x3d   : > { %2105 = vperm.xlu1 %6601, %v2039_v52   ;;  %6340 = vmatmul.msk.bf16.vlgmr.msra.gmra.mxu2 %vm785_vm2, %v6979_v50  ;;  %v609_v38 = vmul.f32 %v6905_v37, %v466_v5  ;;  %v643_v39 = vmul.f32 %v6923_v49, %v466_v5  ;;  %v6314_v42 = vrot.slane %v642_v24, 10  ;;  %v6299_v44 = vrot.slane %v507_v33, 10 }
  0x3e   : > { %2114 = vperm.xlu2 %6602, %v2040_v56   ;;  %2132 = vperm.xlu0 %6600, %v2042_v57   ;;  %v533_v45 = vadd.f32 %v6900_v32, %v526_v35  ;;  %v6303_v46 = vrot.slane %v548_v13, 9  ;;  %v6307_v16 = vrot.slane %v575_v9, 10  ;;  %v6311_v47 = vrot.slane %v616_v14, 9  ;;  %v3373_v35 = vld [vmem:[%s9613_s7 + $0x10] sm:$0xf]  ;;  %v7122_v9 = vld [vmem:[%s9608_s2 + $0x18] sm:$0xff] }
  0x3f   : > { %6344 = vmatmul.msk.bf16.vlgmr.msra.gmra.mxu3 %vm785_vm2, %v6979_v50  ;;  %v594_v22 = vadd.f32 %v6306_v40, %v567_v29  ;;  %v662_v48 = vadd.f32 %v6314_v42, %v635_v31  ;;  %v500_v52 = vadd.f32 %v6295_v43, %v473_v25  ;;  %v6315_v30 = vrot.slane %v643_v39, 10  ;;  %v3376_v39 = vld [vmem:[%s9613_s7 + $0x1c] sm:$0xf]  ;;  %v3369_v40 = vld [vmem:[%s9613_s7] sm:$0xf] }
  0x40   : > { %v679_v53 = vperm.slane %v533_v45, 0  ;;  %v568_v37 = vadd.f32 %v6303_v46, %v541_v34  ;;  %v636_v54 = vadd.f32 %v6311_v47, %v609_v38  ;;  %v680_v57 = vperm.slane %v533_v45, 4  ;;  %v3374_v38 = vld [vmem:[%s9613_s7 + $0x14] sm:$0xf]  ;;  %v3371_v42 = vld [vmem:[%s9613_s7 + $0x8] sm:$0xf] }
  0x41   : > { %v601_v49 = vadd.f32 %v6927_v51, %v594_v22  ;;  %v669_v56 = vadd.f32 %v6931_v55, %v662_v48  ;;  %v527_v58 = vadd.f32 %v6299_v44, %v500_v52  ;;  %v4756_v43 = vld [vmem:[%s9615_s9 + $0x38] sm:$0xf]  ;;  %v4757_v44 = vld [vmem:[%s9615_s9 + $0x3c] sm:$0xf]  ;;  %v3370_v45 = vld [vmem:[%s9613_s7 + $0x4] sm:$0xf] }
  0x42   : > { %v4755_v46 = vld [vmem:[%s9615_s9 + $0x34] sm:$0xf]  ;;  %v4754_v47 = vld [vmem:[%s9615_s9 + $0x30] sm:$0xf]  ;;  %v4750_v22 = vld [vmem:[%s9615_s9 + $0x20] sm:$0xf] }
  0x43   : > { %v700_v4 = vperm.slane %v601_v49, 4  ;;  %v720_v5 = vperm.slane %v669_v56, 4  ;;  %v534_v6 = vadd.f32 %v6900_v32, %v527_v58  ;;  %v4751_v48 = vld [vmem:[%s9615_s9 + $0x24] sm:$0xf]  ;;  %v4749_v52 = vld [vmem:[%s9615_s9 + $0x1c] sm:$0xf] }
  0x44   : > { %v5845_v58 = vld [vmem:[%s9618_s12] sm:$0x3f] }
  0x45   : > { %2096 = vperm.xlu1 %6601, %v2038_v61   ;;  %v3379_v61 = vld [vmem:[%s9613_s7 + $0x28] sm:$0xf]  ;;  %v737_v13 = vsel %vm731_vm0, %v680_v57, %v700_v4  ;;  %v681_v17 = vperm.slane %v534_v6, 0  ;;  %v682_v18 = vperm.slane %v534_v6, 4  ;;  %v4742_v57 = vld [vmem:[%s9615_s9] sm:$0xf] }
  0x46   : > { %2069 = vperm.xlu2 %6602, %v2035_v62   ;;  %2087 = vperm.xlu0 %6600, %v2037_v63   ;;  %v595_v62 = vadd.f32 %v6307_v16, %v568_v37  ;;  %v663_v63 = vadd.f32 %v6315_v30, %v636_v54  ;;  %v746_v15 = vsel %vm740_vm1, %v737_v13, %v720_v5  ;;  %v4752_v16 = vld [vmem:[%s9615_s9 + $0x28] sm:$0xf]  ;;  %v4746_v30 = vld [vmem:[%s9615_s9 + $0x10] sm:$0xf]  ;;  %v4745_v54 = vld [vmem:[%s9615_s9 + $0xc] sm:$0xf] }
  0x47   : > { %6120 = vst [vmem:[%s6962_s21 + $0x28] sm:$0x7] %v746_v15  ;;  %v4744_v37 = vld [vmem:[%s9615_s9 + $0x8] sm:$0xf] }
  0x48   : > { %v602_v7 = vadd.f32 %v6927_v51, %v595_v62  ;;  %v670_v10 = vadd.f32 %v6931_v55, %v663_v63  ;;  %v754_v51 = vpack.c.bf16 %v746_v15, %v746_v15 }
  0x4a   : > { %v701_v8 = vperm.slane %v602_v7, 0  ;;  %v721_v55 = vperm.slane %v670_v10, 0  ;;  %v702_v20 = vperm.slane %v602_v7, 4  ;;  %v722_v21 = vperm.slane %v670_v10, 4 }
  0x4c   : > { %6333 = vmatmul.msk.bf16.gmra.mxu0 %vm785_vm2, %v7018_v1  ;;  %6337 = vmatmul.msk.bf16.gmra.mxu1 %vm785_vm2, %v7018_v1  ;;  %v738_v19 = vsel %vm731_vm0, %v681_v17, %v701_v8  ;;  %v739_v25 = vsel %vm731_vm0, %v682_v18, %v702_v20  ;;  %v6717_v20 = vmov 839922192  }
  0x4d   : > { %2051 = vperm.xlu1 %6601, %v2033_v0   ;;  %6341 = vmatmul.msk.bf16.gmra.mxu2 %vm785_vm2, %v7018_v1  ;;  %v3382_v0 = vld [vmem:[%s9613_s7 + $0x34] sm:$0xf]  ;;  %v747_v41 = vsel %vm740_vm1, %v738_v19, %v721_v55  ;;  %v748_v29 = vsel %vm740_vm1, %v739_v25, %v722_v21  ;;  %v1102_v21 = vunpack.c.l.s4 %v6717_v20 }
  0x4e   : > { %2060 = vperm.xlu2 %6602, %v2034_v2   ;;  %2078 = vperm.xlu0 %6600, %v2036_v3   ;;  %v699_v2 = vperm.slane %v601_v49, 0  ;;  %v719_v3 = vperm.slane %v669_v56, 0  ;;  %v755_v24 = vpack.c.bf16 %v747_v41, %v747_v41  ;;  %6121 = vst [vmem:[%s6962_s21 + $0x30] sm:$0x7] %v747_v41  ;;  %v756_v33 = vpack.c.bf16 %v748_v29, %v748_v29  ;;  %v4743_v49 = vld [vmem:[%s9615_s9 + $0x4] sm:$0xf] }
  0x4f   : > { %6345 = vmatmul.msk.bf16.gmra.mxu3 %vm785_vm2, %v7018_v1  ;;  %6122 = vst [vmem:[%s6962_s21 + $0x38] sm:$0x7] %v748_v29  ;;  %v5558_v56 = vld [vmem:[%s9616_s10] sm:$0x7] }
  0x50   : > { %v736_v11 = vsel %vm731_vm0, %v679_v53, %v699_v2  ;;  %v819_v31 = vand.u32 %v6966_v36, %v755_v24  ;;  %v822_v34 = vand.u32 %v6966_v36, %v756_v33  ;;  %v4748_v53 = vld [vmem:[%s9615_s9 + $0x18] sm:$0xf] }
  0x51   : > { %v745_v14 = vsel %vm740_vm1, %v736_v11, %v719_v3 }
  0x52   : > { %v753_v32 = vpack.c.bf16 %v745_v14, %v745_v14  ;;  %6119 = vst [vmem:[%s6962_s21 + $0x20] sm:$0x7] %v745_v14  ;;  %1005 = vmatpush.bf16.msrb.mxu2 %v819_v31  ;;  %1034 = vmatpush.bf16.msrb.mxu3 %v822_v34 }
  0x54   : > { %v813_v12 = vand.u32 %v6966_v36, %v753_v32 }
  0x55   : > { %3522 = vperm.xlu1 %6601, %v3384_v26   ;;  %v816_v26 = vand.u32 %v6966_v36, %v754_v51  ;;  %v3372_v36 = vld [vmem:[%s9613_s7 + $0xc] sm:$0xf] }
  0x56   : > { %3495 = vperm.xlu2 %6602, %v3381_v27   ;;  %3513 = vperm.xlu0 %6600, %v3383_v28   ;;  %v3375_v27 = vld [vmem:[%s9613_s7 + $0x18] sm:$0xf]  ;;  %v3377_v28 = vld [vmem:[%s9613_s7 + $0x20] sm:$0xf] }
  0x57   : > { %947 = vmatpush.bf16.msrb.mxu0 %v813_v12  ;;  %976 = vmatpush.bf16.msrb.mxu1 %v816_v26  ;;  %v7248_v26 = vunpack.c.0.s8 %v1102_v21 }
  0x59   : > { %9717 = vst [vmem:[#allocation7_spill] sm:$0xff] %v7248_v26 }
  0x5c   : > { %6334 = vmatmul.msk.bf16.gmra.mxu0 %vm785_vm2, %v7069_v59  ;;  %6338 = vmatmul.msk.bf16.gmra.mxu1 %vm785_vm2, %v7069_v59 }
  0x5d   : > { %3477 = vperm.xlu1 %6601, %v3379_v61   ;;  %6342 = vmatmul.msk.bf16.gmra.mxu2 %vm785_vm2, %v7069_v59 }
  0x5e   : > { %3486 = vperm.xlu2 %6602, %v3380_v60   ;;  %3504 = vperm.xlu0 %6600, %v3382_v0  }
  0x5f   : > { %6346 = vmatmul.msk.bf16.gmra.mxu3 %vm785_vm2, %v7069_v59 }
  0x65   : > { %3468 = vperm.xlu1 %6601, %v3378_v23  }
  0x66   : > { %3441 = vperm.xlu2 %6602, %v3375_v27   ;;  %3459 = vperm.xlu0 %6600, %v3377_v28  }
  0x6c   : > { %6335 = vmatmul.msk.bf16.gmra.mxu0 %vm785_vm2, %v7122_v9  ;;  %6339 = vmatmul.msk.bf16.gmra.mxu1 %vm785_vm2, %v7122_v9 }
  0x6d   : > { %3423 = vperm.xlu1 %6601, %v3373_v35   ;;  %6343 = vmatmul.msk.bf16.gmra.mxu2 %vm785_vm2, %v7122_v9 }
  0x6e   : > { %3432 = vperm.xlu2 %6602, %v3374_v38   ;;  %3450 = vperm.xlu0 %6600, %v3376_v39  }
  0x6f   : > { %6347 = vmatmul.msk.bf16.gmra.mxu3 %vm785_vm2, %v7122_v9 }
  0x70   : > { %v1117_v12 = vpop.permute.xlu2 %1116 }
  0x71   : > { %v1122_v31 = vperm.slane %v1117_v12, %v7248_v26 }
  0x75   : > { %3414 = vperm.xlu1 %6601, %v3372_v36  }
  0x76   : > { %3387 = vperm.xlu2 %6602, %v3369_v40   ;;  %3405 = vperm.xlu0 %6600, %v3371_v42  }
  0x78   : > { %v1126_v34 = vpop.permute.xlu2 %1125 }
  0x79   : > { %v1131_v38 = vperm.slane %v1126_v34, %v7248_v26 }
  0x7c   : > { %6348 = vmatmul.msk.bf16.vlgmr.msrb.gmra.mxu0 %vm785_vm2, %v6979_v50  ;;  %6352 = vmatmul.msk.bf16.vlgmr.msrb.gmra.mxu1 %vm785_vm2, %v6979_v50 }
  0x7d   : > { %4886 = vperm.xlu1 %6601, %v4756_v43   ;;  %6356 = vmatmul.msk.bf16.vlgmr.msrb.gmra.mxu2 %vm785_vm2, %v6979_v50 }
  0x7e   : > { %4895 = vperm.xlu2 %6602, %v4757_v44   ;;  %3396 = vperm.xlu0 %6600, %v3370_v45   ;;  %v7261_v45 = vunpack.c.l.bf16 %v1122_v31 }
  0x7f   : > { %6360 = vmatmul.msk.bf16.vlgmr.msrb.gmra.mxu3 %vm785_vm2, %v6979_v50  ;;  %v4753_v50 = vld [vmem:[%s9615_s9 + $0x2c] sm:$0xf] }
  0x85   : > { %4877 = vperm.xlu1 %6601, %v4755_v46  }
  0x86   : > { %4850 = vperm.xlu2 %6602, %v4752_v16   ;;  %4868 = vperm.xlu0 %6600, %v4754_v47  }
  0x87   : > { %v1135_v11 = vpop.permute.xlu1 %1134 }
  0x88   : > { %v1153_v10 = vpop.permute.xlu0 %1152  ;;  %v1140_v36 = vperm.slane %v1135_v11, %v7248_v26 }
  0x89   : > { %v1158_v46 = vperm.slane %v1153_v10, %v7248_v26 }
  0x8c   : > { %6349 = vmatmul.msk.bf16.gmra.mxu0 %vm785_vm2, %v7018_v1  ;;  %6353 = vmatmul.msk.bf16.gmra.mxu1 %vm785_vm2, %v7018_v1 }
  0x8d   : > { %4832 = vperm.xlu1 %6601, %v4750_v22   ;;  %6357 = vmatmul.msk.bf16.gmra.mxu2 %vm785_vm2, %v7018_v1 }
  0x8e   : > { %4841 = vperm.xlu2 %6602, %v4751_v48   ;;  %4859 = vperm.xlu0 %6600, %v4753_v50  }
  0x8f   : > { %6361 = vmatmul.msk.bf16.gmra.mxu3 %vm785_vm2, %v7018_v1  ;;  %v4747_v1 = vld [vmem:[%s9615_s9 + $0x14] sm:$0xf]  ;;  %v1144_v19 = vpop.permute.xlu1 %1143 }
  0x90   : > { %v1162_v8 = vpop.permute.xlu0 %1161  ;;  %v1149_v50 = vperm.slane %v1144_v19, %v7248_v26 }
  0x91   : > { %v1167_v48 = vperm.slane %v1162_v8, %v7248_v26 }
  0x95   : > { %4823 = vperm.xlu1 %6601, %v4749_v52  }
  0x96   : > { %4796 = vperm.xlu2 %6602, %v4746_v30   ;;  %4814 = vperm.xlu0 %6600, %v4748_v53  }
  0x97   : > { %v1108_v33 = vpop.permute.xlu1 %1107 }
  0x98   : > { %v1099_v27 = vpop.permute.xlu0 %1098  ;;  %v1113_v35 = vperm.slane %v1108_v33, %v7248_v26 }
  0x99   : > { %v1104_v28 = vperm.slane %v1099_v27, %v7248_v26 }
  0x9a   : > { %v7266_v52 = vunpack.c.l.bf16 %v1113_v35 }
  0x9b   : > { %v7259_v40 = vunpack.c.l.bf16 %v1104_v28 }
  0x9c   : > { %6350 = vmatmul.msk.bf16.gmra.mxu0 %vm785_vm2, %v7069_v59  ;;  %6354 = vmatmul.msk.bf16.gmra.mxu1 %vm785_vm2, %v7069_v59 }
  0x9d   : > { %4778 = vperm.xlu1 %6601, %v4744_v37   ;;  %6358 = vmatmul.msk.bf16.gmra.mxu2 %vm785_vm2, %v7069_v59  ;;  %v7271_v37 = vunpack.c.l.bf16 %v1131_v38 }
  0x9e   : > { %4787 = vperm.xlu2 %6602, %v4745_v54   ;;  %4805 = vperm.xlu0 %6600, %v4747_v1  }
  0x9f   : > { %6362 = vmatmul.msk.bf16.gmra.mxu3 %vm785_vm2, %v7069_v59 }
  0xa5   : > { %4769 = vperm.xlu1 %6601, %v4743_v49  }
  0xa6   : > { %5561 = vperm.xlu2 %6602, %v5558_v56   ;;  %4760 = vperm.xlu0 %6600, %v4742_v57   ;;  %v7273_v56 = vunpack.c.l.bf16 %v1140_v36 }
  0xac   : > { %6351 = vmatmul.msk.bf16.gmra.mxu0 %vm785_vm2, %v7122_v9  ;;  %6355 = vmatmul.msk.bf16.gmra.mxu1 %vm785_vm2, %v7122_v9 }
  0xad   : > { %6359 = vmatmul.msk.bf16.gmra.mxu2 %vm785_vm2, %v7122_v9 }
  0xae   : > { %5848 = vperm.xlu0 %6600, %v5845_v58  }
  0xaf   : > { %6363 = vmatmul.msk.bf16.gmra.mxu3 %vm785_vm2, %v7122_v9 }
  0xb9   : > { %v833_v59 = vpop.f32.mrf.mxu0  ;;  %v862_v60 = vpop.f32.mrf.mxu1 }
  0xba   : > { %v1056_v61 = vpack.c.bf16 %v862_v60, %v833_v59  ;;  %v7281_v60 = vunpack.c.l.bf16 %v1158_v46 }
  0xbc   : > { %v1168_v9 = vunpack.c.l.bf16 %v1056_v61  ;;  %v1169_v42 = vunpack.c.h.bf16 %v1056_v61 }
  0xbe   : > { %v7269_v30 = vadd.f32 %v7259_v40, %v1168_v9  ;;  %v7276_v57 = vadd.f32 %v7259_v40, %v1169_v42 }
  0xc0   : > { %v891_v63 = vpop.f32.mrf.mxu2 }
  0xc1   : > { %v835_v62 = vpop.f32.mrf.mxu0  ;;  %v864_v0 = vpop.f32.mrf.mxu1 }
  0xc2   : > { %v920_v2 = vpop.f32.mrf.mxu3  ;;  %v1060_v29 = vpack.c.bf16 %v864_v0, %v835_v62  ;;  %v7286_v0 = vunpack.c.l.bf16 %v1167_v48 }
  0xc3   : > { %v7236_v3 = vpack.c.bf16 %v920_v2, %v891_v63  ;;  %v7288_v2 = vunpack.c.l.bf16 %v1149_v50 }
  0xc4   : > { %v1176_v43 = vunpack.c.l.bf16 %v1060_v29  ;;  %v1177_v16 = vunpack.c.h.bf16 %v1060_v29 }
  0xc6   : > { %v7279_v58 = vadd.f32 %v7266_v52, %v1176_v43  ;;  %v7284_v61 = vadd.f32 %v7266_v52, %v1177_v16 }
  0xc8   : > { %v7238_v5 = vpop.f32.mrf.mxu2  ;;  %v1408_v20 = vmax.f32 %v7279_v58, 0.0 }
  0xc9   : > { %v838_v4 = vpop.f32.mrf.mxu0  ;;  %v867_v6 = vpop.f32.mrf.mxu1 }
  0xca   : > { %v922_v7 = vpop.f32.mrf.mxu3  ;;  %v1064_v39 = vpack.c.bf16 %v867_v6, %v838_v4  ;;  %v1400_v4 = vmax.f32 %v7269_v30, 0.0 }
  0xcb   : > { %v7292_v6 = vpack.c.bf16 %v922_v7, %v7238_v5 }
  0xcc   : > { %v1184_v54 = vunpack.c.l.bf16 %v1064_v39  ;;  %v1185_v1 = vunpack.c.h.bf16 %v1064_v39 }
  0xcd   : > { %v1178_v27 = vunpack.c.l.bf16 %v7292_v6  ;;  %v1179_v28 = vunpack.c.h.bf16 %v7292_v6  ;;  %v7369_v6 = vld [vmem:[%s9610_s4] sm:$0xff] }
  0xce   : > { %v7295_v10 = vadd.f32 %v7261_v45, %v1184_v54  ;;  %v7298_v11 = vadd.f32 %v7261_v45, %v1185_v1 }
  0xd0   : > { %v7240_v14 = vpop.f32.mrf.mxu2  ;;  %v1416_v34 = vmax.f32 %v7295_v10, 0.0  ;;  %v1417_v35 = vmax.f32 %v7298_v11, 0.0  ;;  %v1250_v11 = vadd.f32 %v7266_v52, %v1178_v27 }
  0xd1   : > { %v840_v13 = vpop.f32.mrf.mxu0  ;;  %v869_v15 = vpop.f32.mrf.mxu1 }
  0xd2   : > { %v7242_v17 = vpop.f32.mrf.mxu3  ;;  %v1068_v62 = vpack.c.bf16 %v869_v15, %v840_v13  ;;  %v1401_v13 = vmax.f32 %v7276_v57, 0.0 }
  0xd4   : > { %v1192_v21 = vunpack.c.l.bf16 %v1068_v62  ;;  %v1193_v29 = vunpack.c.h.bf16 %v1068_v62 }
  0xd6   : > { %v7315_v48 = vadd.f32 %v7271_v37, %v1193_v29 }
  0xd8   : > { %v7244_v51 = vpop.f32.mrf.mxu2 }
  0xd9   : > { %v843_v32 = vpop.f32.mrf.mxu0  ;;  %v872_v55 = vpop.f32.mrf.mxu1 }
  0xda   : > { %v7246_v18 = vpop.f32.mrf.mxu3  ;;  %v1072_v49 = vpack.c.bf16 %v872_v55, %v843_v32 }
  0xdc   : > { %v1200_v8 = vunpack.c.l.bf16 %v1072_v49  ;;  %v1201_v32 = vunpack.c.h.bf16 %v1072_v49  ;;  %v1069_v49 = vpack.c.bf16 %v7246_v18, %v7244_v51 }
  0xde   : > { %v1272_v9 = vadd.f32 %v7273_v56, %v1200_v8  ;;  %v1273_v38 = vadd.f32 %v7273_v56, %v1201_v32 }
  0xe0   : > { %v7250_v23 = vpop.f32.mrf.mxu2  ;;  %v1433_v62 = vmax.f32 %v1273_v38, 0.0  ;;  %v1194_v38 = vunpack.c.l.bf16 %v1069_v49 }
  0xe1   : > { %v845_v41 = vpop.f32.mrf.mxu0  ;;  %v874_v24 = vpop.f32.mrf.mxu1 }
  0xe2   : > { %v7252_v25 = vpop.f32.mrf.mxu3  ;;  %v1076_v63 = vpack.c.bf16 %v874_v24, %v845_v41  ;;  %v1409_v24 = vmax.f32 %v7284_v61, 0.0 }
  0xe4   : > { %v1208_v12 = vunpack.c.l.bf16 %v1076_v63  ;;  %v1209_v41 = vunpack.c.h.bf16 %v1076_v63  ;;  %v1073_v63 = vpack.c.bf16 %v7252_v25, %v7250_v23  ;;  %v1065_v23 = vpack.c.bf16 %v7242_v17, %v7240_v14 }
  0xe6   : > { %v1280_v46 = vadd.f32 %v7288_v2, %v1208_v12  ;;  %v1281_v16 = vadd.f32 %v7288_v2, %v1209_v41 }
  0xe8   : > { %v903_v47 = vpop.f32.mrf.mxu2  ;;  %v1440_v41 = vmax.f32 %v1280_v46, 0.0 }
  0xe9   : > { %v848_v44 = vpop.f32.mrf.mxu0  ;;  %v877_v22 = vpop.f32.mrf.mxu1 }
  0xea   : > { %v932_v53 = vpop.f32.mrf.mxu3  ;;  %v1080_v59 = vpack.c.bf16 %v877_v22, %v848_v44  ;;  %v1264_v44 = vadd.f32 %v7271_v37, %v1192_v21 }
  0xeb   : > { %v1077_v50 = vpack.c.bf16 %v932_v53, %v903_v47 }
  0xec   : > { %v1216_v15 = vunpack.c.l.bf16 %v1080_v59  ;;  %v1217_v55 = vunpack.c.h.bf16 %v1080_v59  ;;  %v1432_v59 = vmax.f32 %v1272_v9, 0.0  ;;  %v1424_v9 = vmax.f32 %v1264_v44, 0.0 }
  0xed   : > { %v1211_v25 = vunpack.c.h.bf16 %v1077_v50 }
  0xee   : > { %v1288_v39 = vadd.f32 %v7281_v60, %v1216_v15  ;;  %v1289_v36 = vadd.f32 %v7281_v60, %v1217_v55  ;;  %v1480_v14 = vpack.c.bf16 %v1440_v41, %v1432_v59 }
  0xef   : > { %v1283_v44 = vadd.f32 %v7288_v2, %v1211_v25  ;;  %v1171_v25 = vunpack.c.h.bf16 %v7236_v3 }
  0xf0   : > { %v906_v5 = vpop.f32.mrf.mxu2  ;;  %v1448_v8 = vmax.f32 %v1288_v39, 0.0  ;;  %v1449_v32 = vmax.f32 %v1289_v36, 0.0  ;;  %v1202_v39 = vunpack.c.l.bf16 %v1073_v63  ;;  %v1203_v36 = vunpack.c.h.bf16 %v1073_v63 }
  0xf1   : > { %v850_v19 = vpop.f32.mrf.mxu0  ;;  %v879_v7 = vpop.f32.mrf.mxu1  ;;  %v1243_v57 = vadd.f32 %v7259_v40, %v1171_v25 }
  0xf2   : > { %v935_v31 = vpop.f32.mrf.mxu3  ;;  %v1084_v33 = vpack.c.bf16 %v879_v7, %v850_v19  ;;  %v1210_v7 = vunpack.c.l.bf16 %v1077_v50  ;;  %v1186_v50 = vunpack.c.l.bf16 %v1065_v23 }
  0xf3   : > { %v1081_v22 = vpack.c.bf16 %v935_v31, %v906_v5  ;;  %v1441_v5 = vmax.f32 %v1281_v16, 0.0 }
  0xf4   : > { %v1224_v42 = vunpack.c.l.bf16 %v1084_v33  ;;  %v1225_v43 = vunpack.c.h.bf16 %v1084_v33 }
  0xf5   : > { %v1218_v21 = vunpack.c.l.bf16 %v1081_v22  ;;  %v1219_v12 = vunpack.c.h.bf16 %v1081_v22  ;;  %v1481_v17 = vpack.c.bf16 %v1441_v5, %v1433_v62 }
  0xf6   : > { %v1296_v54 = vadd.f32 %v7286_v0, %v1224_v42  ;;  %v1297_v1 = vadd.f32 %v7286_v0, %v1225_v43  ;;  %v1425_v42 = vmax.f32 %v7315_v48, 0.0  ;;  %v1274_v48 = vadd.f32 %v7273_v56, %v1202_v39 }
  0xf7   : > { %v1290_v43 = vadd.f32 %v7281_v60, %v1218_v21  ;;  %v1291_v46 = vadd.f32 %v7281_v60, %v1219_v12 }
  0xf8   : > { %v1456_v15 = vmax.f32 %v1296_v54, 0.0  ;;  %v1457_v55 = vmax.f32 %v1297_v1, 0.0  ;;  %v908_v47 = vpop.f32.mrf.mxu2  ;;  %v1195_v54 = vunpack.c.h.bf16 %v1069_v49  ;;  %v1282_v1 = vadd.f32 %v7288_v2, %v1210_v7 }
  0xf9   : > { %v949_v19 = vpop.f32.mrf.mxu0  ;;  %v978_v53 = vpop.f32.mrf.mxu1  ;;  %v1472_v49 = vpack.c.bf16 %v1424_v9, %v1416_v34  ;;  %v1450_v59 = vmax.f32 %v1290_v43, 0.0  ;;  %v1451_v62 = vmax.f32 %v1291_v46, 0.0  ;;  %v1473_v7 = vpack.c.bf16 %v1425_v42, %v1417_v35 }
  0xfa   : > { %v937_v29 = vpop.f32.mrf.mxu3  ;;  %v7323_v31 = vpack.c.bf16 %v978_v53, %v949_v19  ;;  %v1488_v51 = vpack.c.bf16 %v1456_v15, %v1448_v8  ;;  %v1489_v18 = vpack.c.bf16 %v1457_v55, %v1449_v32  ;;  %v1187_v32 = vunpack.c.h.bf16 %v1065_v23 }
  0xfb   : > { %v1085_v33 = vpack.c.bf16 %v937_v29, %v908_v47  ;;  %v1275_v15 = vadd.f32 %v7273_v56, %v1203_v36  ;;  %v1266_v53 = vadd.f32 %v7271_v37, %v1194_v38  ;;  %v1267_v41 = vadd.f32 %v7271_v37, %v1195_v54 }
  0xfc   : > { %1581 = vmatpush.bf16.msra.mxu0 %v1488_v51  ;;  %1630 = vmatpush.bf16.msra.mxu1 %v1489_v18  ;;  %v1442_v29 = vmax.f32 %v1282_v1, 0.0  ;;  %v1443_v18 = vmax.f32 %v1283_v44, 0.0  ;;  %v1170_v23 = vunpack.c.l.bf16 %v7236_v3  ;;  %v1259_v9 = vadd.f32 %v7261_v45, %v1187_v32 }
  0xfd   : > { %v1226_v16 = vunpack.c.l.bf16 %v1085_v33  ;;  %v1227_v22 = vunpack.c.h.bf16 %v1085_v33  ;;  %v1258_v33 = vadd.f32 %v7261_v45, %v1186_v50  ;;  %v1434_v38 = vmax.f32 %v1274_v48, 0.0  ;;  %v7384_v48 = vld [vmem:[%s9610_s4 + $0x8] sm:$0xff] }
  0xfe   : > { %v1435_v39 = vmax.f32 %v1275_v15, 0.0  ;;  %v1251_v35 = vadd.f32 %v7266_v52, %v1179_v28  ;;  %v1464_v3 = vpack.c.bf16 %v1408_v20, %v1400_v4  ;;  %v1465_v36 = vpack.c.bf16 %v1409_v24, %v1401_v13 }
  0xff   : > { %v1298_v63 = vadd.f32 %v7286_v0, %v1226_v16  ;;  %v1299_v8 = vadd.f32 %v7286_v0, %v1227_v22  ;;  %v1482_v42 = vpack.c.bf16 %v1442_v29, %v1434_v38  ;;  %v1426_v46 = vmax.f32 %v1266_v53, 0.0 }
 0x100   : > { %1582 = vmatpush.bf16.msra.mxu0 %v1480_v14  ;;  %1631 = vmatpush.bf16.msra.mxu1 %v1481_v17  ;;  %v1007_v12 = vpop.f32.mrf.mxu2  ;;  %v1483_v43 = vpack.c.bf16 %v1443_v18, %v1435_v39  ;;  %v1427_v16 = vmax.f32 %v1267_v41, 0.0  ;;  %v1242_v58 = vadd.f32 %v7259_v40, %v1170_v23  ;;  %v1418_v4 = vmax.f32 %v1258_v33, 0.0  ;;  %v7403_v41 = vld [vmem:[%s9610_s4 + $0x10] sm:$0xff] }
 0x101   : > { %v7336_v55 = vpop.f32.mrf.mxu0  ;;  %v1458_v19 = vmax.f32 %v1298_v63, 0.0  ;;  %v1459_v21 = vmax.f32 %v1299_v8, 0.0  ;;  %v7340_v47 = vpop.f32.mrf.mxu1  ;;  %v1419_v61 = vmax.f32 %v1259_v9, 0.0  ;;  %v1410_v22 = vmax.f32 %v1250_v11, 0.0 }
 0x102   : > { %v1036_v5 = vpop.f32.mrf.mxu3  ;;  %v1474_v27 = vpack.c.bf16 %v1426_v46, %v1418_v4  ;;  %v1411_v54 = vmax.f32 %v1251_v35, 0.0  ;;  %v1402_v1 = vmax.f32 %v1242_v58, 0.0  ;;  %v1403_v14 = vmax.f32 %v1243_v57, 0.0 }
 0x103   : > { %v7346_v51 = vpack.c.bf16 %v1036_v5, %v1007_v12  ;;  %v1490_v10 = vpack.c.bf16 %v1458_v19, %v1450_v59  ;;  %v1491_v34 = vpack.c.bf16 %v1459_v21, %v1451_v62  ;;  %v1475_v28 = vpack.c.bf16 %v1427_v16, %v1419_v61 }
 0x104   : > { %1583 = vmatpush.bf16.msra.mxu0 %v1472_v49  ;;  %1632 = vmatpush.bf16.msra.mxu1 %v1473_v7  ;;  %v1466_v17 = vpack.c.bf16 %v1410_v22, %v1402_v1  ;;  %v1467_v50 = vpack.c.bf16 %v1411_v54, %v1403_v14  ;;  %v1062_v5 = vpack.c.bf16 %v7340_v47, %v7336_v55  ;;  %v1173_v18 = vunpack.c.h.bf16 %v7323_v31 }
 0x105   : > { %1679 = vmatpush.bf16.msra.mxu2 %v1490_v10  ;;  %1728 = vmatpush.bf16.msra.mxu3 %v1491_v34  ;;  %v1172_v34 = vunpack.c.l.bf16 %v7323_v31  ;;  %v1174_v35 = vunpack.c.l.bf16 %v7346_v51 }
 0x106   : > { %v1180_v33 = vunpack.c.l.bf16 %v1062_v5  ;;  %v1181_v38 = vunpack.c.h.bf16 %v1062_v5  ;;  %v7419_v47 = vadd.f32 %v7259_v40, %v1173_v18 }
 0x107   : > { %v7416_v55 = vadd.f32 %v7259_v40, %v1172_v34 }
 0x108   : > { %1584 = vmatpush.bf16.msra.mxu0 %v1464_v3  ;;  %1633 = vmatpush.bf16.msra.mxu1 %v1465_v36  ;;  %v1009_v13 = vpop.f32.mrf.mxu2  ;;  %v7424_v46 = vadd.f32 %v7266_v52, %v1180_v33  ;;  %v7427_v57 = vadd.f32 %v7266_v52, %v1181_v38 }
 0x109   : > { %v954_v30 = vpop.f32.mrf.mxu0  ;;  %1680 = vmatpush.bf16.msra.mxu2 %v1482_v42  ;;  %1729 = vmatpush.bf16.msra.mxu3 %v1483_v43  ;;  %v983_v20 = vpop.f32.mrf.mxu1  ;;  %v1175_v43 = vunpack.c.h.bf16 %v7346_v51 }
 0x10a   : > { %v1038_v24 = vpop.f32.mrf.mxu3  ;;  %v1066_v23 = vpack.c.bf16 %v983_v20, %v954_v30 }
 0x10b   : > { %6396 = vmatmul.msk.bf16.vlgmr.msra.gmra.mxu0 %vm1552_vm3, %v7369_v6  ;;  %6404 = vmatmul.msk.bf16.vlgmr.msra.gmra.mxu1 %vm1552_vm3, %v7369_v6  ;;  %v7413_v39 = vpack.c.bf16 %v1038_v24, %v1009_v13 }
 0x10c   : > { %v1188_v31 = vunpack.c.l.bf16 %v1066_v23  ;;  %v1189_v3 = vunpack.c.h.bf16 %v1066_v23 }
 0x10d   : > { %1681 = vmatpush.bf16.msra.mxu2 %v1474_v27  ;;  %1730 = vmatpush.bf16.msra.mxu3 %v1475_v28  ;;  %v1182_v4 = vunpack.c.l.bf16 %v7413_v39  ;;  %v1183_v61 = vunpack.c.h.bf16 %v7413_v39 }
 0x10e   : > { %v7434_v27 = vadd.f32 %v7261_v45, %v1188_v31  ;;  %v7437_v14 = vadd.f32 %v7261_v45, %v1189_v3  ;;  %v7457_v31 = vld [vmem:[%s9610_s4 + $0x18] sm:$0xff] }
 0x110   : > { %v1012_v63 = vpop.f32.mrf.mxu2 }
 0x111   : > { %v956_v44 = vpop.f32.mrf.mxu0  ;;  %1682 = vmatpush.bf16.msra.mxu2 %v1466_v17  ;;  %1731 = vmatpush.bf16.msra.mxu3 %v1467_v50  ;;  %v985_v8 = vpop.f32.mrf.mxu1 }
 0x112   : > { %v1041_v32 = vpop.f32.mrf.mxu3  ;;  %v1070_v36 = vpack.c.bf16 %v985_v8, %v956_v44 }
 0x113   : > { %v7431_v13 = vpack.c.bf16 %v1041_v32, %v1012_v63 }
 0x114   : > { %6412 = vmatmul.msk.bf16.vlgmr.msra.gmra.mxu2 %vm1552_vm3, %v7369_v6  ;;  %6420 = vmatmul.msk.bf16.vlgmr.msra.gmra.mxu3 %vm1552_vm3, %v7369_v6  ;;  %v1196_v17 = vunpack.c.l.bf16 %v1070_v36 }
 0x118   : > { %v7386_v49 = vpop.f32.mrf.mxu2 }
 0x119   : > { %v959_v15 = vpop.f32.mrf.mxu0  ;;  %v988_v59 = vpop.f32.mrf.mxu1 }
 0x11a   : > { %v7388_v62 = vpop.f32.mrf.mxu3  ;;  %v1074_v42 = vpack.c.bf16 %v988_v59, %v959_v15  ;;  %v1190_v59 = vunpack.c.l.bf16 %v7431_v13 }
 0x11b   : > { %6397 = vmatmul.msk.bf16.gmra.mxu0 %vm1552_vm3, %v7384_v48  ;;  %6405 = vmatmul.msk.bf16.gmra.mxu1 %vm1552_vm3, %v7384_v48 }
 0x11c   : > { %v1204_v50 = vunpack.c.l.bf16 %v1074_v42  ;;  %v1205_v44 = vunpack.c.h.bf16 %v1074_v42 }
 0x11e   : > { %v1276_v23 = vadd.f32 %v7273_v56, %v1204_v50  ;;  %v1277_v33 = vadd.f32 %v7273_v56, %v1205_v44 }
 0x120   : > { %v7394_v21 = vpop.f32.mrf.mxu2 }
 0x121   : > { %v961_v19 = vpop.f32.mrf.mxu0  ;;  %v990_v12 = vpop.f32.mrf.mxu1 }
 0x122   : > { %v1046_v53 = vpop.f32.mrf.mxu3  ;;  %v1078_v11 = vpack.c.bf16 %v990_v12, %v961_v19  ;;  %v1191_v19 = vunpack.c.h.bf16 %v7431_v13  ;;  %v1197_v12 = vunpack.c.h.bf16 %v1070_v36 }
 0x124   : > { %6413 = vmatmul.msk.bf16.gmra.mxu2 %vm1552_vm3, %v7384_v48  ;;  %6421 = vmatmul.msk.bf16.gmra.mxu3 %vm1552_vm3, %v7384_v48  ;;  %v1212_v28 = vunpack.c.l.bf16 %v1078_v11  ;;  %v1213_v22 = vunpack.c.h.bf16 %v1078_v11 }
 0x128   : > { %v1019_v29 = vpop.f32.mrf.mxu2 }
 0x129   : > { %v964_v7 = vpop.f32.mrf.mxu0  ;;  %v993_v10 = vpop.f32.mrf.mxu1 }
 0x12a   : > { %v1048_v25 = vpop.f32.mrf.mxu3  ;;  %v1082_v9 = vpack.c.bf16 %v993_v10, %v964_v7  ;;  %v1284_v7 = vadd.f32 %v7288_v2, %v1212_v28  ;;  %v1285_v10 = vadd.f32 %v7288_v2, %v1213_v22  ;;  %v1269_v22 = vadd.f32 %v7271_v37, %v1197_v12 }
 0x12b   : > { %6398 = vmatmul.msk.bf16.gmra.mxu0 %vm1552_vm3, %v7403_v41  ;;  %6406 = vmatmul.msk.bf16.gmra.mxu1 %vm1552_vm3, %v7403_v41  ;;  %v1079_v38 = vpack.c.bf16 %v1048_v25, %v1019_v29 }
 0x12c   : > { %v1220_v16 = vunpack.c.l.bf16 %v1082_v9  ;;  %v1221_v30 = vunpack.c.h.bf16 %v1082_v9  ;;  %v1075_v9 = vpack.c.bf16 %v1046_v53, %v7394_v21  ;;  %v1444_v29 = vmax.f32 %v1284_v7, 0.0 }
 0x12d   : > { %v1445_v25 = vmax.f32 %v1285_v10, 0.0 }
 0x12e   : > { %v1292_v8 = vadd.f32 %v7281_v60, %v1220_v16  ;;  %v1293_v63 = vadd.f32 %v7281_v60, %v1221_v30  ;;  %v1268_v16 = vadd.f32 %v7271_v37, %v1196_v17  ;;  %v1071_v30 = vpack.c.bf16 %v7388_v62, %v7386_v49 }
 0x12f   : > { %v1436_v49 = vmax.f32 %v1276_v23, 0.0  ;;  %v1437_v62 = vmax.f32 %v1277_v33, 0.0  ;;  %v1206_v17 = vunpack.c.l.bf16 %v1075_v9  ;;  %v1207_v44 = vunpack.c.h.bf16 %v1075_v9 }
 0x130   : > { %v1022_v20 = vpop.f32.mrf.mxu2  ;;  %v1452_v11 = vmax.f32 %v1292_v8, 0.0  ;;  %v1453_v3 = vmax.f32 %v1293_v63, 0.0  ;;  %v1198_v12 = vunpack.c.l.bf16 %v1071_v30 }
 0x131   : > { %v966_v58 = vpop.f32.mrf.mxu0  ;;  %v995_v24 = vpop.f32.mrf.mxu1  ;;  %v1484_v7 = vpack.c.bf16 %v1444_v29, %v1436_v49  ;;  %v1485_v10 = vpack.c.bf16 %v1445_v25, %v1437_v62  ;;  %v1278_v9 = vadd.f32 %v7273_v56, %v1206_v17  ;;  %v1263_v29 = vadd.f32 %v7261_v45, %v1191_v19 }
 0x132   : > { %v1051_v54 = vpop.f32.mrf.mxu3  ;;  %v1086_v1 = vpack.c.bf16 %v995_v24, %v966_v58 }
 0x133   : > { %v1083_v5 = vpack.c.bf16 %v1051_v54, %v1022_v20  ;;  %v1214_v54 = vunpack.c.l.bf16 %v1079_v38  ;;  %v1438_v25 = vmax.f32 %v1278_v9, 0.0 }
 0x134   : > { %v1228_v32 = vunpack.c.l.bf16 %v1086_v1  ;;  %v1229_v15 = vunpack.c.h.bf16 %v1086_v1  ;;  %6414 = vmatmul.msk.bf16.gmra.mxu2 %vm1552_vm3, %v7403_v41  ;;  %6422 = vmatmul.msk.bf16.gmra.mxu3 %vm1552_vm3, %v7403_v41  ;;  %v1215_v1 = vunpack.c.h.bf16 %v1079_v38  ;;  %v1279_v38 = vadd.f32 %v7273_v56, %v1207_v44 }
 0x135   : > { %v1222_v58 = vunpack.c.l.bf16 %v1083_v5  ;;  %v1223_v20 = vunpack.c.h.bf16 %v1083_v5  ;;  %v1199_v5 = vunpack.c.h.bf16 %v1071_v30 }
 0x136   : > { %v1300_v34 = vadd.f32 %v7286_v0, %v1228_v32  ;;  %v1301_v18 = vadd.f32 %v7286_v0, %v1229_v15 }
 0x137   : > { %v1294_v8 = vadd.f32 %v7281_v60, %v1222_v58  ;;  %v1295_v63 = vadd.f32 %v7281_v60, %v1223_v20  ;;  %v1428_v60 = vmax.f32 %v1268_v16, 0.0  ;;  %v1420_v58 = vmax.f32 %v7434_v27, 0.0 }
 0x138   : > { %v1460_v36 = vmax.f32 %v1300_v34, 0.0  ;;  %v1461_v42 = vmax.f32 %v1301_v18, 0.0  ;;  %v1024_v24 = vpop.f32.mrf.mxu2  ;;  %v1286_v34 = vadd.f32 %v7288_v2, %v1214_v54  ;;  %v1287_v18 = vadd.f32 %v7288_v2, %v1215_v1 }
 0x139   : > { %v1421_v2 = vmax.f32 %v7437_v14, 0.0  ;;  %v1270_v20 = vadd.f32 %v7271_v37, %v1198_v12  ;;  %v1476_v16 = vpack.c.bf16 %v1428_v60, %v1420_v58  ;;  %v1412_v27 = vmax.f32 %v7424_v46, 0.0  ;;  %v7540_v12 = vld [vmem:[%s9610_s4 + $0x30] sm:$0xff] }
 0x13a   : > { %v1053_v28 = vpop.f32.mrf.mxu3  ;;  %v1492_v21 = vpack.c.bf16 %v1460_v36, %v1452_v11  ;;  %v1493_v53 = vpack.c.bf16 %v1461_v42, %v1453_v3  ;;  %v1429_v11 = vmax.f32 %v1269_v22, 0.0  ;;  %v1454_v3 = vmax.f32 %v1294_v8, 0.0  ;;  %v7521_v8 = vld [vmem:[%s9610_s4 + $0x28] sm:$0xff] }
 0x13b   : > { %v1087_v50 = vpack.c.bf16 %v1053_v28, %v1024_v24  ;;  %6399 = vmatmul.msk.bf16.gmra.mxu0 %vm1552_vm3, %v7457_v31  ;;  %6407 = vmatmul.msk.bf16.gmra.mxu1 %vm1552_vm3, %v7457_v31  ;;  %v1455_v36 = vmax.f32 %v1295_v63, 0.0  ;;  %v1447_v56 = vmax.f32 %v1287_v18, 0.0  ;;  %v1413_v14 = vmax.f32 %v7427_v57, 0.0  ;;  %v7523_v63 = vpop.permute.xlu2 %2177 }
 0x13c   : > { %1777 = vmatpush.bf16.msrb.mxu0 %v1492_v21  ;;  %1826 = vmatpush.bf16.msrb.mxu1 %v1493_v53  ;;  %v1446_v21 = vmax.f32 %v1286_v34, 0.0  ;;  %v1477_v53 = vpack.c.bf16 %v1429_v11, %v1421_v2  ;;  %v1439_v22 = vmax.f32 %v1279_v38, 0.0  ;;  %v1404_v54 = vmax.f32 %v7416_v55, 0.0  ;;  %v7502_v55 = vld [vmem:[%s9610_s4 + $0x20] sm:$0xff]  ;;  %v7559_v34 = vld [vmem:[%s9610_s4 + $0x38] sm:$0xff] }
 0x13d   : > { %v1230_v32 = vunpack.c.l.bf16 %v1087_v50  ;;  %v1231_v15 = vunpack.c.h.bf16 %v1087_v50  ;;  %v1405_v1 = vmax.f32 %v7419_v47, 0.0  ;;  %v1254_v46 = vadd.f32 %v7266_v52, %v1182_v4 }
 0x13e   : > { %v1255_v57 = vadd.f32 %v7266_v52, %v1183_v61  ;;  %v1486_v13 = vpack.c.bf16 %v1446_v21, %v1438_v25  ;;  %v1468_v47 = vpack.c.bf16 %v1412_v27, %v1404_v54  ;;  %v1246_v4 = vadd.f32 %v7259_v40, %v1174_v35 }
 0x13f   : > { %v1302_v23 = vadd.f32 %v7286_v0, %v1230_v32  ;;  %v1303_v33 = vadd.f32 %v7286_v0, %v1231_v15  ;;  %v1271_v0 = vadd.f32 %v7271_v37, %v1199_v5  ;;  %v1262_v37 = vadd.f32 %v7261_v45, %v1190_v59  ;;  %v7529_v32 = vpop.permute.xlu1 %2159 }
 0x140   : > { %1778 = vmatpush.bf16.msrb.mxu0 %v1484_v7  ;;  %1827 = vmatpush.bf16.msrb.mxu1 %v1485_v10  ;;  %v1487_v45 = vpack.c.bf16 %v1447_v56, %v1439_v22  ;;  %v1430_v59 = vmax.f32 %v1270_v20, 0.0  ;;  %v1469_v50 = vpack.c.bf16 %v1413_v14, %v1405_v1  ;;  %v1247_v52 = vadd.f32 %v7259_v40, %v1175_v43  ;;  %v7550_v10 = vpop.permute.xlu0 %2186 }
 0x141   : > { %v1462_v42 = vmax.f32 %v1302_v23, 0.0  ;;  %v1463_v30 = vmax.f32 %v1303_v33, 0.0  ;;  %v1431_v19 = vmax.f32 %v1271_v0, 0.0  ;;  %v1422_v39 = vmax.f32 %v1262_v37, 0.0 }
 0x142   : > { %v1423_v61 = vmax.f32 %v1263_v29, 0.0  ;;  %v1414_v17 = vmax.f32 %v1254_v46, 0.0  ;;  %v1415_v35 = vmax.f32 %v1255_v57, 0.0  ;;  %v1406_v44 = vmax.f32 %v1246_v4, 0.0 }
 0x143   : > { %v1494_v24 = vpack.c.bf16 %v1462_v42, %v1454_v3  ;;  %v1495_v28 = vpack.c.bf16 %v1463_v30, %v1455_v36  ;;  %v1478_v49 = vpack.c.bf16 %v1430_v59, %v1422_v39  ;;  %v1407_v51 = vmax.f32 %v1247_v52, 0.0  ;;  %v7535_v15 = vpop.permute.xlu2 %2168 }
 0x144   : > { %6415 = vmatmul.msk.bf16.gmra.mxu2 %vm1552_vm3, %v7457_v31  ;;  %6423 = vmatmul.msk.bf16.gmra.mxu3 %vm1552_vm3, %v7457_v31  ;;  %v1479_v62 = vpack.c.bf16 %v1431_v19, %v1423_v61  ;;  %v1470_v40 = vpack.c.bf16 %v1414_v17, %v1406_v44 }
 0x145   : > { %1875 = vmatpush.bf16.msrb.mxu2 %v1494_v24  ;;  %1924 = vmatpush.bf16.msrb.mxu3 %v1495_v28  ;;  %v1471_v43 = vpack.c.bf16 %v1415_v35, %v1407_v51 }
 0x146   : > { %1779 = vmatpush.bf16.msrb.mxu0 %v1476_v16  ;;  %1828 = vmatpush.bf16.msrb.mxu1 %v1477_v53 }
 0x147   : > { %v7546_v5 = vpop.permute.xlu1 %2150 }
 0x148   : > { %v7569_v33 = vpop.permute.xlu0 %2141 }
 0x149   : > { %1876 = vmatpush.bf16.msrb.mxu2 %v1486_v13  ;;  %1925 = vmatpush.bf16.msrb.mxu3 %v1487_v45 }
 0x14a   : > { %1780 = vmatpush.bf16.msrb.mxu0 %v1468_v47  ;;  %1829 = vmatpush.bf16.msrb.mxu1 %v1469_v50 }
 0x14b   : > { %6400 = vmatmul.msk.bf16.gmra.mxu0 %vm1552_vm3, %v7502_v55  ;;  %6408 = vmatmul.msk.bf16.gmra.mxu1 %vm1552_vm3, %v7502_v55  ;;  %v7548_v7 = vpop.permute.xlu2 %2123 }
 0x14d   : > { %1877 = vmatpush.bf16.msrb.mxu2 %v1478_v49  ;;  %1926 = vmatpush.bf16.msrb.mxu3 %v1479_v62 }
 0x14f   : > { %v7561_v18 = vpop.permute.xlu1 %2105 }
 0x150   : > { %v7577_v60 = vpop.permute.xlu0 %2132 }
 0x151   : > { %1878 = vmatpush.bf16.msrb.mxu2 %v1470_v40  ;;  %1927 = vmatpush.bf16.msrb.mxu3 %v1471_v43 }
 0x153   : > { %v7563_v23 = vpop.permute.xlu2 %2114 }
 0x154   : > { %6416 = vmatmul.msk.bf16.gmra.mxu2 %vm1552_vm3, %v7502_v55  ;;  %6424 = vmatmul.msk.bf16.gmra.mxu3 %vm1552_vm3, %v7502_v55 }
 0x157   : > { %v7571_v9 = vpop.permute.xlu1 %2096 }
 0x158   : > { %v7589_v53 = vpop.permute.xlu0 %2087 }
 0x15b   : > { %6401 = vmatmul.msk.bf16.gmra.mxu0 %vm1552_vm3, %v7521_v8  ;;  %6409 = vmatmul.msk.bf16.gmra.mxu1 %vm1552_vm3, %v7521_v8  ;;  %v2070_v38 = vpop.permute.xlu2 %2069 }
 0x15c   : > { %v2075_v39 = vperm.slane %v2070_v38, %v7248_v26 }
 0x15f   : > { %v2052_v42 = vpop.permute.xlu1 %2051 }
 0x160   : > { %v2057_v58 = vperm.slane %v2052_v42, %v7248_v26 }
 0x162   : > { %v7585_v21 = vunpack.c.l.bf16 %v2057_v58 }
 0x163   : > { %v2061_v30 = vpop.permute.xlu2 %2060 }
 0x164   : > { %6417 = vmatmul.msk.bf16.gmra.mxu2 %vm1552_vm3, %v7521_v8  ;;  %6425 = vmatmul.msk.bf16.gmra.mxu3 %vm1552_vm3, %v7521_v8  ;;  %v2066_v2 = vperm.slane %v2061_v30, %v7248_v26  ;;  %9718 = vst [vmem:[#allocation8_spill] sm:$0xff] %v7585_v21 }
 0x166   : > { %v7587_v16 = vunpack.c.l.bf16 %v2066_v2 }
 0x168   : > { %9719 = vst [vmem:[#allocation9_spill] sm:$0xff] %v7587_v16 }
 0x16b   : > { %6402 = vmatmul.msk.bf16.gmra.mxu0 %vm1552_vm3, %v7540_v12  ;;  %6410 = vmatmul.msk.bf16.gmra.mxu1 %vm1552_vm3, %v7540_v12 }
 0x174   : > { %6418 = vmatmul.msk.bf16.gmra.mxu2 %vm1552_vm3, %v7540_v12  ;;  %6426 = vmatmul.msk.bf16.gmra.mxu3 %vm1552_vm3, %v7540_v12 }
 0x17b   : > { %6403 = vmatmul.msk.bf16.gmra.mxu0 %vm1552_vm3, %v7559_v34  ;;  %6411 = vmatmul.msk.bf16.gmra.mxu1 %vm1552_vm3, %v7559_v34 }
 0x184   : > { %6419 = vmatmul.msk.bf16.gmra.mxu2 %vm1552_vm3, %v7559_v34  ;;  %6427 = vmatmul.msk.bf16.gmra.mxu3 %vm1552_vm3, %v7559_v34 }
 0x188   : > { %v1586_v11 = vpop.f32.mrf.mxu0  ;;  %v1635_v3 = vpop.f32.mrf.mxu1 }
 0x189   : > { %v1969_v36 = vpack.c.bf16 %v1635_v3, %v1586_v11  ;;  %v7609_v3 = vunpack.c.l.bf16 %v2075_v39 }
 0x18b   : > { %6428 = vmatmul.msk.bf16.vlgmr.msrb.gmra.mxu0 %vm1552_vm3, %v7369_v6  ;;  %6436 = vmatmul.msk.bf16.vlgmr.msrb.gmra.mxu1 %vm1552_vm3, %v7369_v6  ;;  %v2193_v20 = vunpack.c.l.bf16 %v1969_v36  ;;  %v2194_v0 = vunpack.c.h.bf16 %v1969_v36  ;;  %9720 = vst [vmem:[#allocation10_spill] sm:$0xff] %v7609_v3 }
 0x18d   : > { %v2337_v27 = vadd.f32 %v7585_v21, %v2193_v20  ;;  %v2338_v14 = vadd.f32 %v7585_v21, %v2194_v0 }
 0x18f   : > { %v2657_v54 = vmax.f32 %v2337_v27, 0.0  ;;  %v2658_v1 = vmax.f32 %v2338_v14, 0.0 }
 0x190   : > { %v1588_v24 = vpop.f32.mrf.mxu0  ;;  %v1637_v28 = vpop.f32.mrf.mxu1 }
 0x191   : > { %v1973_v56 = vpack.c.bf16 %v1637_v28, %v1588_v24 }
 0x193   : > { %v2201_v37 = vunpack.c.l.bf16 %v1973_v56  ;;  %v2202_v29 = vunpack.c.h.bf16 %v1973_v56 }
 0x194   : > { %6444 = vmatmul.msk.bf16.vlgmr.msrb.gmra.mxu2 %vm1552_vm3, %v7369_v6  ;;  %6452 = vmatmul.msk.bf16.vlgmr.msrb.gmra.mxu3 %vm1552_vm3, %v7369_v6  ;;  %v2079_v6 = vpop.permute.xlu0 %2078 }
 0x195   : > { %v2345_v25 = vadd.f32 %v7587_v16, %v2201_v37  ;;  %v2346_v22 = vadd.f32 %v7587_v16, %v2202_v29  ;;  %v2084_v61 = vperm.slane %v2079_v6, %v7248_v26 }
 0x197   : > { %v1684_v46 = vpop.f32.mrf.mxu2  ;;  %v1733_v57 = vpop.f32.mrf.mxu3  ;;  %v2665_v13 = vmax.f32 %v2345_v25, 0.0  ;;  %v2666_v45 = vmax.f32 %v2346_v22, 0.0  ;;  %v7611_v36 = vunpack.c.l.bf16 %v2084_v61 }
 0x198   : > { %v1970_v59 = vpack.c.bf16 %v1733_v57, %v1684_v46  ;;  %v1591_v19 = vpop.f32.mrf.mxu0  ;;  %v1640_v47 = vpop.f32.mrf.mxu1 }
 0x199   : > { %v1977_v50 = vpack.c.bf16 %v1640_v47, %v1591_v19  ;;  %v7599_v4 = vpack.c.bf16 %v2665_v13, %v2657_v54  ;;  %v7601_v52 = vpack.c.bf16 %v2666_v45, %v2658_v1  ;;  %9721 = vst [vmem:[#allocation11_spill] sm:$0xff] %v7611_v36 }
 0x19a   : > { %v2195_v49 = vunpack.c.l.bf16 %v1970_v59  ;;  %v2196_v62 = vunpack.c.h.bf16 %v1970_v59 }
 0x19b   : > { %6429 = vmatmul.msk.bf16.gmra.mxu0 %vm1552_vm3, %v7384_v48  ;;  %6437 = vmatmul.msk.bf16.gmra.mxu1 %vm1552_vm3, %v7384_v48  ;;  %v2209_v17 = vunpack.c.l.bf16 %v1977_v50  ;;  %v2210_v35 = vunpack.c.h.bf16 %v1977_v50 }
 0x19c   : > { %v2339_v30 = vadd.f32 %v7585_v21, %v2195_v49  ;;  %v2340_v38 = vadd.f32 %v7585_v21, %v2196_v62  ;;  %v2102_v62 = vperm.slane %v7571_v9, %v7248_v26 }
 0x19d   : > { %v2353_v20 = vadd.f32 %v7609_v3, %v2209_v17  ;;  %v2354_v0 = vadd.f32 %v7609_v3, %v2210_v35  ;;  %v2093_v17 = vperm.slane %v7589_v53, %v7248_v26 }
 0x19e   : > { %v2659_v29 = vmax.f32 %v2339_v30, 0.0  ;;  %v2660_v25 = vmax.f32 %v2340_v38, 0.0 }
 0x19f   : > { %v1686_v44 = vpop.f32.mrf.mxu2  ;;  %v1735_v51 = vpop.f32.mrf.mxu3  ;;  %v2673_v1 = vmax.f32 %v2353_v20, 0.0  ;;  %v2674_v46 = vmax.f32 %v2354_v0, 0.0 }
 0x1a0   : > { %v1974_v40 = vpack.c.bf16 %v1735_v51, %v1686_v44  ;;  %v1593_v43 = vpop.f32.mrf.mxu0  ;;  %v1642_v11 = vpop.f32.mrf.mxu1 }
 0x1a1   : > { %v1981_v42 = vpack.c.bf16 %v1642_v11, %v1593_v43 }
 0x1a2   : > { %v2203_v58 = vunpack.c.l.bf16 %v1974_v40  ;;  %v2204_v2 = vunpack.c.h.bf16 %v1974_v40 }
 0x1a3   : > { %v2217_v24 = vunpack.c.l.bf16 %v1981_v42  ;;  %v2218_v28 = vunpack.c.h.bf16 %v1981_v42 }
 0x1a4   : > { %v2347_v56 = vadd.f32 %v7587_v16, %v2203_v58  ;;  %v2348_v27 = vadd.f32 %v7587_v16, %v2204_v2  ;;  %6445 = vmatmul.msk.bf16.gmra.mxu2 %vm1552_vm3, %v7384_v48  ;;  %6453 = vmatmul.msk.bf16.gmra.mxu3 %vm1552_vm3, %v7384_v48  ;;  %v7641_v58 = vunpack.c.l.bf16 %v2102_v62  ;;  %v7643_v2 = vunpack.c.l.bf16 %v2093_v17 }
 0x1a5   : > { %v2361_v14 = vadd.f32 %v7611_v36, %v2217_v24  ;;  %v2362_v37 = vadd.f32 %v7611_v36, %v2218_v28 }
 0x1a6   : > { %v2667_v22 = vmax.f32 %v2347_v56, 0.0  ;;  %v2668_v54 = vmax.f32 %v2348_v27, 0.0  ;;  %9724 = vst [vmem:[#allocation14_spill] sm:$0xff] %v7641_v58 }
 0x1a7   : > { %v1689_v57 = vpop.f32.mrf.mxu2  ;;  %v1738_v13 = vpop.f32.mrf.mxu3  ;;  %v2681_v45 = vmax.f32 %v2361_v14, 0.0  ;;  %v2682_v59 = vmax.f32 %v2362_v37, 0.0  ;;  %9725 = vst [vmem:[#allocation15_spill] sm:$0xff] %v7643_v2 }
 0x1a8   : > { %v1978_v19 = vpack.c.bf16 %v1738_v13, %v1689_v57  ;;  %v1596_v47 = vpop.f32.mrf.mxu0  ;;  %v1645_v50 = vpop.f32.mrf.mxu1  ;;  %v7625_v6 = vpack.c.bf16 %v2667_v22, %v2659_v29  ;;  %v7627_v48 = vpack.c.bf16 %v2668_v54, %v2660_v25 }
 0x1a9   : > { %v1985_v39 = vpack.c.bf16 %v1645_v50, %v1596_v47  ;;  %v7629_v61 = vpack.c.bf16 %v2681_v45, %v2673_v1  ;;  %v7631_v49 = vpack.c.bf16 %v2682_v59, %v2674_v46 }
 0x1aa   : > { %9722 = vst [vmem:[#allocation12_spill] sm:$0xff] %v7625_v6  ;;  %v2211_v35 = vunpack.c.l.bf16 %v1978_v19  ;;  %v2212_v44 = vunpack.c.h.bf16 %v1978_v19 }
 0x1ab   : > { %9723 = vst [vmem:[#allocation13_spill] sm:$0xff] %v7627_v48  ;;  %6430 = vmatmul.msk.bf16.gmra.mxu0 %vm1552_vm3, %v7403_v41  ;;  %6438 = vmatmul.msk.bf16.gmra.mxu1 %vm1552_vm3, %v7403_v41  ;;  %v2225_v51 = vunpack.c.l.bf16 %v1985_v39  ;;  %v2226_v40 = vunpack.c.h.bf16 %v1985_v39 }
 0x1ac   : > { %v2355_v0 = vadd.f32 %v7609_v3, %v2211_v35  ;;  %v2356_v9 = vadd.f32 %v7609_v3, %v2212_v44 }
 0x1ad   : > { %v2369_v28 = vadd.f32 %v7643_v2, %v2225_v51  ;;  %v2370_v56 = vadd.f32 %v7643_v2, %v2226_v40 }
 0x1ae   : > { %v2675_v54 = vmax.f32 %v2355_v0, 0.0  ;;  %v2676_v1 = vmax.f32 %v2356_v9, 0.0 }
 0x1af   : > { %v1691_v43 = vpop.f32.mrf.mxu2  ;;  %v1740_v11 = vpop.f32.mrf.mxu3  ;;  %v2689_v13 = vmax.f32 %v2369_v28, 0.0  ;;  %v2690_v45 = vmax.f32 %v2370_v56, 0.0 }
 0x1b0   : > { %v1982_v42 = vpack.c.bf16 %v1740_v11, %v1691_v43  ;;  %v1598_v30 = vpop.f32.mrf.mxu0  ;;  %v1647_v38 = vpop.f32.mrf.mxu1  ;;  %v2120_v43 = vperm.slane %v7563_v23, %v7248_v26  ;;  %v2111_v11 = vperm.slane %v7561_v18, %v7248_v26 }
 0x1b1   : > { %v1989_v20 = vpack.c.bf16 %v1647_v38, %v1598_v30 }
 0x1b2   : > { %v2219_v24 = vunpack.c.l.bf16 %v1982_v42  ;;  %v2220_v53 = vunpack.c.h.bf16 %v1982_v42  ;;  %v7673_v56 = vunpack.c.l.bf16 %v2120_v43 }
 0x1b3   : > { %v2233_v27 = vunpack.c.l.bf16 %v1989_v20  ;;  %v2234_v14 = vunpack.c.h.bf16 %v1989_v20 }
 0x1b4   : > { %v2363_v37 = vadd.f32 %v7611_v36, %v2219_v24  ;;  %v2364_v29 = vadd.f32 %v7611_v36, %v2220_v53  ;;  %6446 = vmatmul.msk.bf16.gmra.mxu2 %vm1552_vm3, %v7403_v41  ;;  %6454 = vmatmul.msk.bf16.gmra.mxu3 %vm1552_vm3, %v7403_v41  ;;  %9728 = vst [vmem:[#allocation18_spill] sm:$0xff] %v7673_v56 }
 0x1b5   : > { %v2377_v25 = vadd.f32 %v7641_v58, %v2233_v27  ;;  %v2378_v22 = vadd.f32 %v7641_v58, %v2234_v14  ;;  %v7675_v27 = vunpack.c.l.bf16 %v2111_v11 }
 0x1b6   : > { %v2683_v46 = vmax.f32 %v2363_v37, 0.0  ;;  %v2684_v57 = vmax.f32 %v2364_v29, 0.0 }
 0x1b7   : > { %v1694_v59 = vpop.f32.mrf.mxu2  ;;  %v1743_v19 = vpop.f32.mrf.mxu3  ;;  %v2697_v47 = vmax.f32 %v2377_v25, 0.0  ;;  %v2698_v50 = vmax.f32 %v2378_v22, 0.0  ;;  %9729 = vst [vmem:[#allocation19_spill] sm:$0xff] %v7675_v27 }
 0x1b8   : > { %v1986_v39 = vpack.c.bf16 %v1743_v19, %v1694_v59  ;;  %v1601_v62 = vpop.f32.mrf.mxu0  ;;  %v1650_v17 = vpop.f32.mrf.mxu1  ;;  %v7657_v35 = vpack.c.bf16 %v2683_v46, %v2675_v54  ;;  %v7659_v41 = vpack.c.bf16 %v2684_v57, %v2676_v1 }
 0x1b9   : > { %v1993_v44 = vpack.c.bf16 %v1650_v17, %v1601_v62  ;;  %v7661_v51 = vpack.c.bf16 %v2697_v47, %v2689_v13  ;;  %v7663_v40 = vpack.c.bf16 %v2698_v50, %v2690_v45 }
 0x1ba   : > { %9726 = vst [vmem:[#allocation16_spill] sm:$0xff] %v7657_v35  ;;  %v2227_v42 = vunpack.c.l.bf16 %v1986_v39  ;;  %v2228_v30 = vunpack.c.h.bf16 %v1986_v39 }
 0x1bb   : > { %9727 = vst [vmem:[#allocation17_spill] sm:$0xff] %v7659_v41  ;;  %6431 = vmatmul.msk.bf16.gmra.mxu0 %vm1552_vm3, %v7457_v31  ;;  %6439 = vmatmul.msk.bf16.gmra.mxu1 %vm1552_vm3, %v7457_v31  ;;  %v2241_v38 = vunpack.c.l.bf16 %v1993_v44  ;;  %v2242_v20 = vunpack.c.h.bf16 %v1993_v44 }
 0x1bc   : > { %v2371_v37 = vadd.f32 %v7643_v2, %v2227_v42  ;;  %v2372_v23 = vadd.f32 %v7643_v2, %v2228_v30 }
 0x1bd   : > { %v2385_v25 = vadd.f32 %v7675_v27, %v2241_v38  ;;  %v2386_v22 = vadd.f32 %v7675_v27, %v2242_v20 }
 0x1be   : > { %v2691_v59 = vmax.f32 %v2371_v37, 0.0  ;;  %v2692_v19 = vmax.f32 %v2372_v23, 0.0 }
 0x1bf   : > { %v1696_v0 = vpop.f32.mrf.mxu2  ;;  %v1745_v9 = vpop.f32.mrf.mxu3  ;;  %v2705_v39 = vmax.f32 %v2385_v25, 0.0  ;;  %v2706_v62 = vmax.f32 %v2386_v22, 0.0 }
 0x1c0   : > { %v1990_v24 = vpack.c.bf16 %v1745_v9, %v1696_v0  ;;  %v1603_v53 = vpop.f32.mrf.mxu0  ;;  %v1652_v28 = vpop.f32.mrf.mxu1 }
 0x1c1   : > { %v1997_v14 = vpack.c.bf16 %v1652_v28, %v1603_v53 }
 0x1c2   : > { %v2235_v29 = vunpack.c.l.bf16 %v1990_v24  ;;  %v2236_v18 = vunpack.c.h.bf16 %v1990_v24 }
 0x1c3   : > { %v2249_v54 = vunpack.c.l.bf16 %v1997_v14  ;;  %v2250_v1 = vunpack.c.h.bf16 %v1997_v14 }
 0x1c4   : > { %v2379_v46 = vadd.f32 %v7641_v58, %v2235_v29  ;;  %v2380_v57 = vadd.f32 %v7641_v58, %v2236_v18  ;;  %6447 = vmatmul.msk.bf16.gmra.mxu2 %vm1552_vm3, %v7457_v31  ;;  %6455 = vmatmul.msk.bf16.gmra.mxu3 %vm1552_vm3, %v7457_v31 }
 0x1c5   : > { %v2393_v13 = vadd.f32 %v7673_v56, %v2249_v54  ;;  %v2394_v45 = vadd.f32 %v7673_v56, %v2250_v1 }
 0x1c6   : > { %v2699_v47 = vmax.f32 %v2379_v46, 0.0  ;;  %v2700_v50 = vmax.f32 %v2380_v57, 0.0 }
 0x1c7   : > { %v1699_v17 = vpop.f32.mrf.mxu2  ;;  %v1748_v44 = vpop.f32.mrf.mxu3  ;;  %v2713_v43 = vmax.f32 %v2393_v13, 0.0  ;;  %v2714_v11 = vmax.f32 %v2394_v45, 0.0 }
 0x1c8   : > { %v1994_v42 = vpack.c.bf16 %v1748_v44, %v1699_v17  ;;  %v1606_v30 = vpop.f32.mrf.mxu0  ;;  %v1655_v38 = vpop.f32.mrf.mxu1  ;;  %v7689_v20 = vpack.c.bf16 %v2699_v47, %v2691_v59  ;;  %v7691_v31 = vpack.c.bf16 %v2700_v50, %v2692_v19 }
 0x1c9   : > { %v7693_v0 = vpack.c.bf16 %v1655_v38, %v1606_v30  ;;  %v7695_v9 = vpack.c.bf16 %v2713_v43, %v2705_v39  ;;  %v7697_v24 = vpack.c.bf16 %v2714_v11, %v2706_v62 }
 0x1ca   : > { %9730 = vst [vmem:[#allocation20_spill] sm:$0xff] %v7691_v31  ;;  %v2243_v53 = vunpack.c.l.bf16 %v1994_v42  ;;  %v2244_v28 = vunpack.c.h.bf16 %v1994_v42 }
 0x1cb   : > { %6432 = vmatmul.msk.bf16.gmra.mxu0 %vm1552_vm3, %v7502_v55  ;;  %6440 = vmatmul.msk.bf16.gmra.mxu1 %vm1552_vm3, %v7502_v55 }
 0x1cc   : > { %v2387_v25 = vadd.f32 %v7675_v27, %v2243_v53  ;;  %v2388_v22 = vadd.f32 %v7675_v27, %v2244_v28 }
 0x1ce   : > { %v2707_v13 = vmax.f32 %v2387_v25, 0.0  ;;  %v2708_v45 = vmax.f32 %v2388_v22, 0.0 }
 0x1cf   : > { %v1701_v14 = vpop.f32.mrf.mxu2  ;;  %v1750_v37 = vpop.f32.mrf.mxu3 }
 0x1d0   : > { %v1998_v23 = vpack.c.bf16 %v1750_v37, %v1701_v14  ;;  %v1608_v29 = vpop.f32.mrf.mxu0  ;;  %v1657_v18 = vpop.f32.mrf.mxu1 }
 0x1d2   : > { %v2251_v54 = vunpack.c.l.bf16 %v1998_v23  ;;  %v2252_v1 = vunpack.c.h.bf16 %v1998_v23 }
 0x1d4   : > { %v2395_v46 = vadd.f32 %v7673_v56, %v2251_v54  ;;  %v2396_v57 = vadd.f32 %v7673_v56, %v2252_v1  ;;  %6448 = vmatmul.msk.bf16.gmra.mxu2 %vm1552_vm3, %v7502_v55  ;;  %6456 = vmatmul.msk.bf16.gmra.mxu3 %vm1552_vm3, %v7502_v55 }
 0x1d6   : > { %v2715_v59 = vmax.f32 %v2395_v46, 0.0  ;;  %v2716_v19 = vmax.f32 %v2396_v57, 0.0  ;;  %v2183_v57 = vperm.slane %v7523_v63, %v7248_v26  ;;  %v2147_v63 = vperm.slane %v7569_v33, %v7248_v26 }
 0x1d7   : > { %v1704_v47 = vpop.f32.mrf.mxu2  ;;  %v1753_v50 = vpop.f32.mrf.mxu3 }
 0x1d8   : > { %v7711_v39 = vpack.c.bf16 %v1753_v50, %v1704_v47  ;;  %v7713_v62 = vpop.f32.mrf.mxu0  ;;  %v7715_v17 = vpop.f32.mrf.mxu1  ;;  %v7717_v44 = vpack.c.bf16 %v2715_v59, %v2707_v13  ;;  %v7719_v43 = vpack.c.bf16 %v2716_v19, %v2708_v45  ;;  %v2174_v13 = vperm.slane %v7535_v15, %v7248_v26 }
 0x1d9   : > { %v2129_v45 = vperm.slane %v7548_v7, %v7248_v26  ;;  %v2165_v59 = vperm.slane %v7529_v32, %v7248_v26  ;;  %v2156_v19 = vperm.slane %v7546_v5, %v7248_v26  ;;  %v2138_v15 = vperm.slane %v7577_v60, %v7248_v26 }
 0x1da   : > { %v7773_v7 = vunpack.c.l.bf16 %v2183_v57  ;;  %v2005_v50 = vpack.c.bf16 %v1657_v18, %v1608_v29 }
 0x1db   : > { %6433 = vmatmul.msk.bf16.gmra.mxu0 %vm1552_vm3, %v7521_v8  ;;  %6441 = vmatmul.msk.bf16.gmra.mxu1 %vm1552_vm3, %v7521_v8  ;;  %v7777_v5 = vunpack.c.l.bf16 %v2129_v45  ;;  %v7784_v58 = vunpack.c.l.bf16 %v2156_v19  ;;  %v7788_v57 = vunpack.c.l.bf16 %v2138_v15  ;;  %v2009_v19 = vpack.c.bf16 %v7715_v17, %v7713_v62 }
 0x1dc   : > { %v2266_v3 = vunpack.c.h.bf16 %v2005_v50 }
 0x1df   : > { %v7725_v55 = vpop.f32.mrf.mxu2  ;;  %v7727_v11 = vpop.f32.mrf.mxu3 }
 0x1e0   : > { %v1613_v42 = vpop.f32.mrf.mxu0  ;;  %v1662_v30 = vpop.f32.mrf.mxu1 }
 0x1e1   : > { %v2013_v29 = vpack.c.bf16 %v1662_v30, %v1613_v42 }
 0x1e3   : > { %v2281_v16 = vunpack.c.l.bf16 %v2013_v29  ;;  %v2282_v21 = vunpack.c.h.bf16 %v2013_v29 }
 0x1e4   : > { %6449 = vmatmul.msk.bf16.gmra.mxu2 %vm1552_vm3, %v7521_v8  ;;  %6457 = vmatmul.msk.bf16.gmra.mxu3 %vm1552_vm3, %v7521_v8 }
 0x1e7   : > { %v7733_v38 = vpop.f32.mrf.mxu2  ;;  %v7735_v53 = vpop.f32.mrf.mxu3 }
 0x1e8   : > { %v1616_v28 = vpop.f32.mrf.mxu0  ;;  %v1665_v14 = vpop.f32.mrf.mxu1 }
 0x1e9   : > { %v2017_v56 = vpack.c.bf16 %v1665_v14, %v1616_v28 }
 0x1eb   : > { %6434 = vmatmul.msk.bf16.gmra.mxu0 %vm1552_vm3, %v7540_v12  ;;  %6442 = vmatmul.msk.bf16.gmra.mxu1 %vm1552_vm3, %v7540_v12  ;;  %v2290_v36 = vunpack.c.h.bf16 %v2017_v56 }
 0x1ef   : > { %v7741_v37 = vpop.f32.mrf.mxu2  ;;  %v7743_v23 = vpop.f32.mrf.mxu3 }
 0x1f0   : > { %v1618_v25 = vpop.f32.mrf.mxu0  ;;  %v1667_v22 = vpop.f32.mrf.mxu1 }
 0x1f1   : > { %v2021_v32 = vpack.c.bf16 %v1667_v22, %v1618_v25  ;;  %v7786_v22 = vunpack.c.l.bf16 %v2147_v63 }
 0x1f3   : > { %v2297_v18 = vunpack.c.l.bf16 %v2021_v32  ;;  %v2298_v28 = vunpack.c.h.bf16 %v2021_v32  ;;  %v2273_v32 = vunpack.c.l.bf16 %v2009_v19 }
 0x1f4   : > { %6450 = vmatmul.msk.bf16.gmra.mxu2 %vm1552_vm3, %v7540_v12  ;;  %6458 = vmatmul.msk.bf16.gmra.mxu3 %vm1552_vm3, %v7540_v12  ;;  %v2192_v12 = vperm.slane %v7550_v10, %v7248_v26  ;;  %v7775_v10 = vunpack.c.l.bf16 %v2174_v13  ;;  %v2265_v26 = vunpack.c.l.bf16 %v2005_v50  ;;  %v2274_v50 = vunpack.c.h.bf16 %v2009_v19 }
 0x1f6   : > { %v7782_v27 = vunpack.c.l.bf16 %v2192_v12  ;;  %v2409_v62 = vadd.f32 %v7788_v57, %v2265_v26 }
 0x1f7   : > { %v7749_v8 = vpop.f32.mrf.mxu2  ;;  %v7751_v54 = vpop.f32.mrf.mxu3 }
 0x1f8   : > { %v1621_v1 = vpop.f32.mrf.mxu0  ;;  %v1670_v46 = vpop.f32.mrf.mxu1 }
 0x1f9   : > { %v2025_v47 = vpack.c.bf16 %v1670_v46, %v1621_v1  ;;  %v7779_v1 = vunpack.c.l.bf16 %v2165_v59  ;;  %v2257_v46 = vunpack.c.l.bf16 %v7693_v0  ;;  %v2258_v59 = vunpack.c.h.bf16 %v7693_v0 }
 0x1fa   : > { %v2441_v0 = vadd.f32 %v7775_v10, %v2297_v18 }
 0x1fb   : > { %6435 = vmatmul.msk.bf16.gmra.mxu0 %vm1552_vm3, %v7559_v34  ;;  %6443 = vmatmul.msk.bf16.gmra.mxu1 %vm1552_vm3, %v7559_v34  ;;  %v2305_v33 = vunpack.c.l.bf16 %v2025_v47  ;;  %v2306_v2 = vunpack.c.h.bf16 %v2025_v47  ;;  %v2401_v12 = vadd.f32 %v7777_v5, %v2257_v46  ;;  %v2289_v47 = vunpack.c.l.bf16 %v2017_v56 }
 0x1fc   : > { %v2442_v56 = vadd.f32 %v7775_v10, %v2298_v28  ;;  %v2402_v26 = vadd.f32 %v7777_v5, %v2258_v59  ;;  %v2425_v28 = vadd.f32 %v7784_v58, %v2281_v16  ;;  %v2761_v6 = vmax.f32 %v2441_v0, 0.0 }
 0x1fd   : > { %v2449_v63 = vadd.f32 %v7773_v7, %v2305_v33  ;;  %v2450_v15 = vadd.f32 %v7773_v7, %v2306_v2  ;;  %v2433_v46 = vadd.f32 %v7779_v1, %v2289_v47  ;;  %v2434_v33 = vadd.f32 %v7779_v1, %v2290_v36 }
 0x1fe   : > { %v2762_v36 = vmax.f32 %v2442_v56, 0.0  ;;  %v2418_v59 = vadd.f32 %v7786_v22, %v2274_v50  ;;  %v2722_v0 = vmax.f32 %v2402_v26, 0.0 }
 0x1ff   : > { %v1716_v60 = vpop.f32.mrf.mxu2  ;;  %v1765_v25 = vpop.f32.mrf.mxu3  ;;  %v2769_v29 = vmax.f32 %v2449_v63, 0.0  ;;  %v2770_v18 = vmax.f32 %v2450_v15, 0.0  ;;  %v2410_v63 = vadd.f32 %v7788_v57, %v2266_v3  ;;  %v2417_v15 = vadd.f32 %v7786_v22, %v2273_v32 }
 0x200   : > { %v1623_v13 = vpop.f32.mrf.mxu0  ;;  %v1672_v45 = vpop.f32.mrf.mxu1  ;;  %v2753_v35 = vmax.f32 %v2433_v46, 0.0  ;;  %v2754_v16 = vmax.f32 %v2434_v33, 0.0  ;;  %v2022_v31 = vpack.c.bf16 %v1765_v25, %v1716_v60  ;;  %v2738_v50 = vmax.f32 %v2418_v59, 0.0 }
 0x201   : > { %v2029_v14 = vpack.c.bf16 %v1672_v45, %v1623_v13  ;;  %v2014_v60 = vpack.c.bf16 %v7743_v23, %v7741_v37 }
 0x202   : > { %v2833_v56 = vpack.c.bf16 %v2761_v6, %v2753_v35  ;;  %v2299_v25 = vunpack.c.l.bf16 %v2022_v31  ;;  %v2010_v6 = vpack.c.bf16 %v7735_v53, %v7733_v38  ;;  %v2300_v35 = vunpack.c.h.bf16 %v2022_v31 }
 0x203   : > { %v2313_v42 = vunpack.c.l.bf16 %v2029_v14  ;;  %v2314_v30 = vunpack.c.h.bf16 %v2029_v14 }
 0x204   : > { %6451 = vmatmul.msk.bf16.gmra.mxu2 %vm1552_vm3, %v7559_v34  ;;  %6459 = vmatmul.msk.bf16.gmra.mxu3 %vm1552_vm3, %v7559_v34  ;;  %v2443_v38 = vadd.f32 %v7775_v10, %v2299_v25 }
 0x205   : > { %v2457_v17 = vadd.f32 %v7782_v27, %v2313_v42  ;;  %v2458_v2 = vadd.f32 %v7782_v27, %v2314_v30  ;;  %v2426_v42 = vadd.f32 %v7784_v58, %v2282_v21  ;;  %v2721_v21 = vmax.f32 %v2401_v12, 0.0 }
 0x207   : > { %v2777_v13 = vmax.f32 %v2457_v17, 0.0  ;;  %v2778_v45 = vmax.f32 %v2458_v2, 0.0  ;;  %v1719_v14 = vpop.f32.mrf.mxu2  ;;  %v1768_v34 = vpop.f32.mrf.mxu3  ;;  %v2729_v2 = vmax.f32 %v2409_v62, 0.0  ;;  %v2746_v3 = vmax.f32 %v2426_v42, 0.0 }
 0x208   : > { %v1782_v48 = vpop.f32.mrf.mxu0  ;;  %v1831_v30 = vpop.f32.mrf.mxu1  ;;  %v2026_v17 = vpack.c.bf16 %v1768_v34, %v1719_v14  ;;  %v2730_v62 = vmax.f32 %v2410_v63, 0.0  ;;  %v2737_v14 = vmax.f32 %v2417_v15, 0.0 }
 0x209   : > { %v7810_v19 = vpack.c.bf16 %v1831_v30, %v1782_v48  ;;  %v2841_v47 = vpack.c.bf16 %v2777_v13, %v2769_v29  ;;  %v2842_v41 = vpack.c.bf16 %v2778_v45, %v2770_v18  ;;  %v2745_v48 = vmax.f32 %v2425_v28, 0.0 }
 0x20a   : > { %v2018_v29 = vpack.c.bf16 %v7751_v54, %v7749_v8  ;;  %v2834_v18 = vpack.c.bf16 %v2762_v36, %v2754_v16  ;;  %v2307_v13 = vunpack.c.l.bf16 %v2026_v17  ;;  %v2308_v32 = vunpack.c.h.bf16 %v2026_v17 }
 0x20b   : > { %2913 = vmatpush.bf16.msra.mxu0 %v2841_v47  ;;  %2962 = vmatpush.bf16.msra.mxu1 %v2842_v41  ;;  %v2817_v45 = vpack.c.bf16 %v2729_v2, %v2721_v21  ;;  %v2006_v8 = vpack.c.bf16 %v7727_v11, %v7725_v55  ;;  %v2825_v37 = vpack.c.bf16 %v2745_v48, %v2737_v14  ;;  %v2283_v55 = vunpack.c.l.bf16 %v2014_v60 }
 0x20c   : > { %v2291_v34 = vunpack.c.l.bf16 %v2018_v29  ;;  %v2292_v26 = vunpack.c.h.bf16 %v2018_v29  ;;  %v2826_v23 = vpack.c.bf16 %v2746_v3, %v2738_v50  ;;  %v2451_v28 = vadd.f32 %v7773_v7, %v2307_v13 }
 0x20d   : > { %v2452_v42 = vadd.f32 %v7773_v7, %v2308_v32  ;;  %v2284_v11 = vunpack.c.h.bf16 %v2014_v60  ;;  %v2818_v31 = vpack.c.bf16 %v2730_v62, %v2722_v0  ;;  %v2267_v53 = vunpack.c.l.bf16 %v2006_v8 }
 0x20e   : > { %v2444_v36 = vadd.f32 %v7775_v10, %v2300_v35  ;;  %v2275_v17 = vunpack.c.l.bf16 %v2010_v6  ;;  %v2276_v2 = vunpack.c.h.bf16 %v2010_v6  ;;  %v2435_v59 = vadd.f32 %v7779_v1, %v2291_v34 }
 0x20f   : > { %v1721_v41 = vpop.f32.mrf.mxu2  ;;  %v1770_v12 = vpop.f32.mrf.mxu3  ;;  %2914 = vmatpush.bf16.msra.mxu0 %v2833_v56  ;;  %2963 = vmatpush.bf16.msra.mxu1 %v2834_v18  ;;  %v2436_v16 = vadd.f32 %v7779_v1, %v2292_v26  ;;  %v2771_v21 = vmax.f32 %v2451_v28, 0.0  ;;  %v2772_v48 = vmax.f32 %v2452_v42, 0.0  ;;  %v2268_v18 = vunpack.c.h.bf16 %v2006_v8 }
 0x210   : > { %v2030_v54 = vpack.c.bf16 %v1770_v12, %v1721_v41  ;;  %v7823_v46 = vpop.f32.mrf.mxu0  ;;  %v7825_v33 = vpop.f32.mrf.mxu1  ;;  %v2427_v0 = vadd.f32 %v7784_v58, %v2283_v55  ;;  %v2428_v3 = vadd.f32 %v7784_v58, %v2284_v11  ;;  %v2763_v62 = vmax.f32 %v2443_v38, 0.0 }
 0x211   : > { %v2764_v12 = vmax.f32 %v2444_v36, 0.0  ;;  %v2259_v6 = vunpack.c.l.bf16 %v7711_v39  ;;  %v2260_v8 = vunpack.c.h.bf16 %v7711_v39  ;;  %v2420_v34 = vadd.f32 %v7786_v22, %v2276_v2 }
 0x212   : > { %v2315_v30 = vunpack.c.l.bf16 %v2030_v54  ;;  %v2316_v47 = vunpack.c.h.bf16 %v2030_v54  ;;  %v2419_v54 = vadd.f32 %v7786_v22, %v2275_v17  ;;  %v2756_v26 = vmax.f32 %v2436_v16, 0.0 }
 0x213   : > { %2915 = vmatpush.bf16.msra.mxu0 %v2825_v37  ;;  %2964 = vmatpush.bf16.msra.mxu1 %v2826_v23  ;;  %v2411_v37 = vadd.f32 %v7788_v57, %v2267_v53  ;;  %v2412_v23 = vadd.f32 %v7788_v57, %v2268_v18  ;;  %v2747_v42 = vmax.f32 %v2427_v0, 0.0  ;;  %v2404_v55 = vadd.f32 %v7777_v5, %v2260_v8 }
 0x214   : > { %v2459_v63 = vadd.f32 %v7782_v27, %v2315_v30  ;;  %v2460_v15 = vadd.f32 %v7782_v27, %v2316_v47  ;;  %v2836_v39 = vpack.c.bf16 %v2764_v12, %v2756_v26  ;;  %v2748_v30 = vmax.f32 %v2428_v3, 0.0 }
 0x215   : > { %v2403_v47 = vadd.f32 %v7777_v5, %v2259_v6  ;;  %v2739_v11 = vmax.f32 %v2419_v54, 0.0  ;;  %v2740_v38 = vmax.f32 %v2420_v34, 0.0  ;;  %v2732_v17 = vmax.f32 %v2412_v23, 0.0 }
 0x216   : > { %v2779_v29 = vmax.f32 %v2459_v63, 0.0  ;;  %v2780_v56 = vmax.f32 %v2460_v15, 0.0  ;;  %v2731_v15 = vmax.f32 %v2411_v37, 0.0  ;;  %v7912_v37 = vld [vmem:[%s9612_s6 + $0x10] sm:$0xff] }
 0x217   : > { %v1880_v13 = vpop.f32.mrf.mxu2  ;;  %v1929_v32 = vpop.f32.mrf.mxu3  ;;  %2916 = vmatpush.bf16.msra.mxu0 %v2817_v45  ;;  %2965 = vmatpush.bf16.msra.mxu1 %v2818_v31  ;;  %v2755_v45 = vmax.f32 %v2435_v59, 0.0  ;;  %v2723_v2 = vmax.f32 %v2403_v47, 0.0  ;;  %v2724_v59 = vmax.f32 %v2404_v55, 0.0 }
 0x218   : > { %v7837_v14 = vpack.c.bf16 %v1929_v32, %v1880_v13  ;;  %v2843_v50 = vpack.c.bf16 %v2779_v29, %v2771_v21  ;;  %v2844_v60 = vpack.c.bf16 %v2780_v56, %v2772_v48  ;;  %v1787_v25 = vpop.f32.mrf.mxu0  ;;  %v1836_v41 = vpop.f32.mrf.mxu1  ;;  %v7868_v48 = vld [vmem:[%s9612_s6] sm:$0xff]  ;;  %v9735_v13 = vld [vmem:[#allocation16_spill] sm:$0xff]  ;;  %v9738_v32 = vld [vmem:[#allocation13_spill] sm:$0xff] }
 0x219   : > { %v7841_v35 = vpack.c.bf16 %v1836_v41, %v1787_v25  ;;  %v2835_v28 = vpack.c.bf16 %v2763_v62, %v2755_v45  ;;  %v2819_v16 = vpack.c.bf16 %v2731_v15, %v2723_v2  ;;  %9732 = vst [vmem:[#allocation22_spill] sm:$0xff] %v7868_v48 }
 0x21a   : > { %9731 = vst [vmem:[#allocation21_spill] sm:$0xff] %v7837_v14  ;;  %3011 = vmatpush.bf16.msra.mxu2 %v2843_v50  ;;  %3060 = vmatpush.bf16.msra.mxu3 %v2844_v60  ;;  %v7895_v50 = vld [vmem:[%s9612_s6 + $0x8] sm:$0xff] }
 0x21b   : > { %2917 = vmatpush.bf16.msra.mxu0 %v7695_v9  ;;  %2966 = vmatpush.bf16.msra.mxu1 %v7697_v24  ;;  %v2827_v9 = vpack.c.bf16 %v2747_v42, %v2739_v11  ;;  %v2828_v24 = vpack.c.bf16 %v2748_v30, %v2740_v38 }
 0x21e   : > { %3012 = vmatpush.bf16.msra.mxu2 %v2835_v28  ;;  %3061 = vmatpush.bf16.msra.mxu3 %v2836_v39 }
 0x21f   : > { %v7851_v31 = vpop.f32.mrf.mxu2  ;;  %v7853_v53 = vpop.f32.mrf.mxu3  ;;  %2918 = vmatpush.bf16.msra.mxu0 %v7661_v51  ;;  %2967 = vmatpush.bf16.msra.mxu1 %v7663_v40  ;;  %v2820_v51 = vpack.c.bf16 %v2732_v17, %v2724_v59 }
 0x220   : > { %v7857_v36 = vpop.f32.mrf.mxu0  ;;  %v7859_v63 = vpop.f32.mrf.mxu1 }
 0x222   : > { %3013 = vmatpush.bf16.msra.mxu2 %v2827_v9  ;;  %3062 = vmatpush.bf16.msra.mxu3 %v2828_v24  ;;  %v7933_v24 = vld [vmem:[%s9612_s6 + $0x18] sm:$0xff] }
 0x223   : > { %2919 = vmatpush.bf16.msra.mxu0 %v7629_v61  ;;  %2968 = vmatpush.bf16.msra.mxu1 %v7631_v49 }
 0x226   : > { %3014 = vmatpush.bf16.msra.mxu2 %v2819_v16  ;;  %3063 = vmatpush.bf16.msra.mxu3 %v2820_v51 }
 0x227   : > { %v1885_v40 = vpop.f32.mrf.mxu2  ;;  %v1934_v21 = vpop.f32.mrf.mxu3  ;;  %2920 = vmatpush.bf16.msra.mxu0 %v7599_v4  ;;  %2969 = vmatpush.bf16.msra.mxu1 %v7601_v52  ;;  %v9734_v4 = vld [vmem:[#allocation20_spill] sm:$0xff] }
 0x228   : > { %v7870_v29 = vpack.c.bf16 %v1934_v21, %v1885_v40  ;;  %v1792_v61 = vpop.f32.mrf.mxu0  ;;  %v1841_v56 = vpop.f32.mrf.mxu1  ;;  %9739 = vst [vmem:[#allocation20_spill] sm:$0xff] %v7895_v50 }
 0x229   : > { %v7872_v49 = vpack.c.bf16 %v1841_v56, %v1792_v61  ;;  %v7960_v56 = vld [vmem:[%s9612_s6 + $0x20] sm:$0xff] }
 0x22a   : > { %9733 = vst [vmem:[#allocation23_spill] sm:$0xff] %v7870_v29  ;;  %3015 = vmatpush.bf16.msra.mxu2 %v7717_v44  ;;  %3064 = vmatpush.bf16.msra.mxu3 %v7719_v43  ;;  %v9736_v44 = vld [vmem:[#allocation17_spill] sm:$0xff]  ;;  %v9737_v43 = vld [vmem:[#allocation12_spill] sm:$0xff] }
 0x22b   : > { %2921 = vmatmul.bf16.vlgmr.msra.gmra.mxu0 %v7868_v48  ;;  %2970 = vmatmul.bf16.vlgmr.msra.gmra.mxu1 %v7868_v48  ;;  %9741 = vst [vmem:[#allocation17_spill] sm:$0xff] %v7912_v37 }
 0x22c   : > { %9742 = vst [vmem:[#allocation12_spill] sm:$0xff] %v7933_v24 }
 0x22d   : > { %9743 = vst [vmem:[#allocation13_spill] sm:$0xff] %v7960_v56 }
 0x22e   : > { %3016 = vmatpush.bf16.msra.mxu2 %v7689_v20  ;;  %3065 = vmatpush.bf16.msra.mxu3 %v9734_v4 }
 0x22f   : > { %v7880_v52 = vpop.f32.mrf.mxu2  ;;  %v7882_v18 = vpop.f32.mrf.mxu3 }
 0x230   : > { %v7884_v0 = vpop.f32.mrf.mxu0  ;;  %v7886_v3 = vpop.f32.mrf.mxu1 }
 0x232   : > { %3017 = vmatpush.bf16.msra.mxu2 %v9735_v13  ;;  %3066 = vmatpush.bf16.msra.mxu3 %v9736_v44  ;;  %v1975_v44 = vpack.c.bf16 %v7825_v33, %v7823_v46  ;;  %v1991_v46 = vpack.c.bf16 %v7886_v3, %v7884_v0  ;;  %v9744_v33 = vld [vmem:[#allocation8_spill] sm:$0xff] }
 0x236   : > { %3018 = vmatpush.bf16.msra.mxu2 %v9737_v43  ;;  %3067 = vmatpush.bf16.msra.mxu3 %v9738_v32  ;;  %v2197_v43 = vunpack.c.l.bf16 %v7810_v19  ;;  %v1983_v32 = vpack.c.bf16 %v7859_v63, %v7857_v36 }
 0x237   : > { %v1890_v62 = vpop.f32.mrf.mxu2  ;;  %v1939_v20 = vpop.f32.mrf.mxu3 }
 0x238   : > { %v7897_v60 = vpack.c.bf16 %v1939_v20, %v1890_v62  ;;  %v1797_v25 = vpop.f32.mrf.mxu0  ;;  %v1846_v41 = vpop.f32.mrf.mxu1  ;;  %v2221_v36 = vunpack.c.l.bf16 %v1983_v32 }
 0x239   : > { %3019 = vmatmul.bf16.vlgmr.msra.gmra.mxu2 %v7868_v48  ;;  %3068 = vmatmul.bf16.vlgmr.msra.gmra.mxu3 %v7868_v48  ;;  %v7901_v12 = vpack.c.bf16 %v1846_v41, %v1797_v25  ;;  %v2198_v25 = vunpack.c.h.bf16 %v7810_v19  ;;  %v2229_v19 = vunpack.c.l.bf16 %v7872_v49  ;;  %v9750_v48 = vld [vmem:[#allocation10_spill] sm:$0xff] }
 0x23a   : > { %9740 = vst [vmem:[#allocation16_spill] sm:$0xff] %v7897_v60 }
 0x23b   : > { %2926 = vmatmul.bf16.gmra.mxu0 %v7895_v50  ;;  %2975 = vmatmul.bf16.gmra.mxu1 %v7895_v50  ;;  %v7988_v63 = vadd.f32 %v9744_v33, %v2198_v25 }
 0x23d   : > { %9746 = vst [vmem:[#allocation25_spill] sm:$0xff] %v7988_v63  ;;  %v9760_v63 = vld [vmem:[#allocation19_spill] sm:$0xff] }
 0x23f   : > { %v7905_v6 = vpop.f32.mrf.mxu2  ;;  %v7907_v8 = vpop.f32.mrf.mxu3 }
 0x240   : > { %v1799_v54 = vpop.f32.mrf.mxu0  ;;  %v1848_v34 = vpop.f32.mrf.mxu1 }
 0x241   : > { %v1999_v3 = vpack.c.bf16 %v1848_v34, %v1799_v54  ;;  %v8019_v54 = vld [vmem:[%s9612_s6 + $0x28] sm:$0xff] }
 0x247   : > { %v1895_v45 = vpop.f32.mrf.mxu2  ;;  %v1944_v26 = vpop.f32.mrf.mxu3 }
 0x248   : > { %v7914_v23 = vpack.c.bf16 %v1944_v26, %v1895_v45  ;;  %v1802_v28 = vpop.f32.mrf.mxu0  ;;  %v1851_v39 = vpop.f32.mrf.mxu1  ;;  %v2205_v26 = vunpack.c.l.bf16 %v1975_v44 }
 0x249   : > { %3024 = vmatmul.bf16.gmra.mxu2 %v7895_v50  ;;  %3073 = vmatmul.bf16.gmra.mxu3 %v7895_v50  ;;  %v7918_v42 = vpack.c.bf16 %v1851_v39, %v1802_v28  ;;  %v2206_v28 = vunpack.c.h.bf16 %v1975_v44  ;;  %v2213_v39 = vunpack.c.l.bf16 %v7841_v35  ;;  %v9747_v44 = vld [vmem:[#allocation9_spill] sm:$0xff] }
 0x24a   : > { %v7993_v50 = vadd.f32 %v9747_v44, %v2205_v26  ;;  %v2245_v26 = vunpack.c.l.bf16 %v7901_v12 }
 0x24b   : > { %2931 = vmatmul.bf16.gmra.mxu0 %v7912_v37  ;;  %2980 = vmatmul.bf16.gmra.mxu1 %v7912_v37  ;;  %v7999_v0 = vadd.f32 %v9750_v48, %v2213_v39 }
 0x24c   : > { %9748 = vst [vmem:[#allocation26_spill] sm:$0xff] %v7993_v50  ;;  %v8076_v50 = vpack.c.bf16 %v7907_v8, %v7905_v6 }
 0x24d   : > { %9751 = vst [vmem:[#allocation28_spill] sm:$0xff] %v7999_v0  ;;  %v8048_v0 = vadd.f32 %v9760_v63, %v2245_v26  ;;  %v8061_v26 = vpack.c.bf16 %v7882_v18, %v7880_v52 }
 0x24f   : > { %v7922_v30 = vpop.f32.mrf.mxu2  ;;  %v7924_v47 = vpop.f32.mrf.mxu3  ;;  %9761 = vst [vmem:[#allocation34_spill] sm:$0xff] %v8061_v26 }
 0x250   : > { %v7926_v55 = vpop.f32.mrf.mxu0  ;;  %v7928_v11 = vpop.f32.mrf.mxu1 }
 0x257   : > { %v1900_v38 = vpop.f32.mrf.mxu2  ;;  %v1949_v9 = vpop.f32.mrf.mxu3 }
 0x258   : > { %v7935_v15 = vpack.c.bf16 %v1949_v9, %v1900_v38  ;;  %v7937_v17 = vpop.f32.mrf.mxu0  ;;  %v7939_v2 = vpop.f32.mrf.mxu1  ;;  %v2214_v38 = vunpack.c.h.bf16 %v7841_v35  ;;  %v7985_v9 = vadd.f32 %v9744_v33, %v2197_v43  ;;  %v7996_v35 = vadd.f32 %v9747_v44, %v2206_v28 }
 0x259   : > { %3029 = vmatmul.bf16.gmra.mxu2 %v7912_v37  ;;  %3078 = vmatmul.bf16.gmra.mxu3 %v7912_v37  ;;  %v2230_v37 = vunpack.c.h.bf16 %v7872_v49  ;;  %v8001_v43 = vpop.permute.xlu0 %3513  ;;  %v2238_v33 = vunpack.c.h.bf16 %v1991_v46  ;;  %v9754_v49 = vld [vmem:[#allocation11_spill] sm:$0xff]  ;;  %v2246_v28 = vunpack.c.h.bf16 %v7901_v12 }
 0x25a   : > { %9745 = vst [vmem:[#allocation24_spill] sm:$0xff] %v7985_v9  ;;  %v8004_v25 = vadd.f32 %v9750_v48, %v2214_v38  ;;  %v8008_v29 = vadd.f32 %v9754_v49, %v2221_v36  ;;  %v2253_v9 = vunpack.c.l.bf16 %v1999_v3 }
 0x25b   : > { %2936 = vmatmul.bf16.gmra.mxu0 %v7933_v24  ;;  %2985 = vmatmul.bf16.gmra.mxu1 %v7933_v24  ;;  %9749 = vst [vmem:[#allocation27_spill] sm:$0xff] %v7996_v35 }
 0x25c   : > { %9752 = vst [vmem:[#allocation29_spill] sm:$0xff] %v8001_v43 }
 0x25d   : > { %9753 = vst [vmem:[#allocation30_spill] sm:$0xff] %v8004_v25 }
 0x25e   : > { %9755 = vst [vmem:[#allocation31_spill] sm:$0xff] %v8008_v29 }
 0x25f   : > { %v7945_v59 = vpop.f32.mrf.mxu2  ;;  %v7947_v16 = vpop.f32.mrf.mxu3 }
 0x260   : > { %v7949_v51 = vpop.f32.mrf.mxu0  ;;  %v7951_v40 = vpop.f32.mrf.mxu1 }
 0x261   : > { %v8089_v6 = vpop.permute.xlu0 %3504 }
 0x267   : > { %v7953_v21 = vpop.f32.mrf.mxu2  ;;  %v7955_v61 = vpop.f32.mrf.mxu3 }
 0x268   : > { %v7962_v4 = vpop.f32.mrf.mxu0  ;;  %v7964_v13 = vpop.f32.mrf.mxu1 }
 0x269   : > { %3034 = vmatmul.bf16.gmra.mxu2 %v7933_v24  ;;  %3083 = vmatmul.bf16.gmra.mxu3 %v7933_v24  ;;  %v2222_v24 = vunpack.c.h.bf16 %v1983_v32  ;;  %v2237_v32 = vunpack.c.l.bf16 %v1991_v46  ;;  %v9757_v46 = vld [vmem:[#allocation15_spill] sm:$0xff] }
 0x26a   : > { %v8026_v36 = vadd.f32 %v9757_v46, %v2229_v19  ;;  %v8029_v14 = vadd.f32 %v9757_v46, %v2230_v37  ;;  %v8039_v19 = vpack.c.bf16 %v7853_v53, %v7851_v31  ;;  %v9759_v37 = vld [vmem:[#allocation14_spill] sm:$0xff]  ;;  %v2262_v31 = vunpack.c.h.bf16 %v7918_v42 }
 0x26b   : > { %2941 = vmatmul.bf16.gmra.mxu0 %v7960_v56  ;;  %2990 = vmatmul.bf16.gmra.mxu1 %v7960_v56  ;;  %v8023_v38 = vadd.f32 %v9754_v49, %v2222_v24  ;;  %v8042_v46 = vadd.f32 %v9759_v37, %v2237_v32  ;;  %v8045_v48 = vadd.f32 %v9759_v37, %v2238_v33  ;;  %v2254_v24 = vunpack.c.h.bf16 %v1999_v3  ;;  %v8098_v37 = vpop.permute.xlu2 %3495 }
 0x26c   : > { %9758 = vst [vmem:[#allocation33_spill] sm:$0xff] %v8039_v19  ;;  %v8092_v8 = vadd.f32 %v7777_v5, %v2262_v31 }
 0x26d   : > { %9756 = vst [vmem:[#allocation32_spill] sm:$0xff] %v8023_v38 }
 0x26e   : > { %9764 = vst [vmem:[#allocation35_spill] sm:$0xff] %v8098_v37 }
 0x26f   : > { %v7975_v62 = vpop.f32.mrf.mxu2  ;;  %v7977_v20 = vpop.f32.mrf.mxu3 }
 0x270   : > { %v1814_v41 = vpop.f32.mrf.mxu0  ;;  %v1863_v45 = vpop.f32.mrf.mxu1 }
 0x271   : > { %v2023_v53 = vpack.c.bf16 %v1863_v45, %v1814_v41 }
 0x277   : > { %v8012_v44 = vpop.f32.mrf.mxu2  ;;  %v8014_v39 = vpop.f32.mrf.mxu3 }
 0x278   : > { %v1817_v12 = vpop.f32.mrf.mxu0  ;;  %v1866_v43 = vpop.f32.mrf.mxu1 }
 0x279   : > { %3039 = vmatmul.bf16.gmra.mxu2 %v7960_v56  ;;  %3088 = vmatmul.bf16.gmra.mxu3 %v7960_v56  ;;  %v8051_v56 = vadd.f32 %v9760_v63, %v2246_v28  ;;  %v2027_v34 = vpack.c.bf16 %v1866_v43, %v1817_v12  ;;  %v9762_v28 = vld [vmem:[#allocation18_spill] sm:$0xff]  ;;  %v2261_v43 = vunpack.c.l.bf16 %v7918_v42  ;;  %v2007_v12 = vpack.c.bf16 %v7928_v11, %v7926_v55 }
 0x27a   : > { %v8064_v49 = vadd.f32 %v9762_v28, %v2253_v9  ;;  %v8079_v55 = vadd.f32 %v9762_v28, %v2254_v24  ;;  %v2015_v42 = vpack.c.bf16 %v7951_v40, %v7949_v51  ;;  %v2019_v11 = vpack.c.bf16 %v7964_v13, %v7962_v4  ;;  %9763 = vst [vmem:[#allocation18_spill] sm:$0xff] %v8089_v6 }
 0x27b   : > { %2946 = vmatmul.bf16.gmra.mxu0 %v8019_v54  ;;  %2995 = vmatmul.bf16.gmra.mxu1 %v8019_v54  ;;  %v2309_v18 = vunpack.c.l.bf16 %v2027_v34  ;;  %v2310_v19 = vunpack.c.h.bf16 %v2027_v34  ;;  %v8086_v3 = vadd.f32 %v7777_v5, %v2261_v43  ;;  %v2269_v34 = vunpack.c.l.bf16 %v2007_v12 }
 0x27c   : > { %v2011_v51 = vpack.c.bf16 %v7939_v2, %v7937_v17  ;;  %v2301_v40 = vunpack.c.l.bf16 %v2023_v53  ;;  %v2302_v24 = vunpack.c.h.bf16 %v2023_v53  ;;  %v2293_v52 = vunpack.c.l.bf16 %v2019_v11 }
 0x27d   : > { %v2453_v4 = vadd.f32 %v7773_v7, %v2309_v18  ;;  %v2454_v13 = vadd.f32 %v7773_v7, %v2310_v19  ;;  %v2294_v6 = vunpack.c.h.bf16 %v2019_v11  ;;  %v2413_v31 = vadd.f32 %v7788_v57, %v2269_v34 }
 0x27e   : > { %v2286_v26 = vunpack.c.h.bf16 %v2015_v42  ;;  %v2277_v2 = vunpack.c.l.bf16 %v2011_v51  ;;  %v2278_v53 = vunpack.c.h.bf16 %v2011_v51  ;;  %v2445_v18 = vadd.f32 %v7775_v10, %v2301_v40 }
 0x27f   : > { %v1912_v9 = vpop.f32.mrf.mxu2  ;;  %v1961_v35 = vpop.f32.mrf.mxu3  ;;  %v2446_v19 = vadd.f32 %v7775_v10, %v2302_v24  ;;  %v2774_v38 = vmax.f32 %v2454_v13, 0.0  ;;  %v2437_v34 = vadd.f32 %v7779_v1, %v2293_v52  ;;  %v2438_v51 = vadd.f32 %v7779_v1, %v2294_v6 }
 0x280   : > { %v1819_v41 = vpop.f32.mrf.mxu0  ;;  %v1868_v45 = vpop.f32.mrf.mxu1  ;;  %v2430_v40 = vadd.f32 %v7784_v58, %v2286_v26  ;;  %v2725_v13 = vmax.f32 %v8086_v3, 0.0  ;;  %v2421_v52 = vadd.f32 %v7786_v22, %v2277_v2  ;;  %v2422_v6 = vadd.f32 %v7786_v22, %v2278_v53 }
 0x281   : > { %v2031_v32 = vpack.c.bf16 %v1868_v45, %v1819_v41  ;;  %v2270_v41 = vunpack.c.h.bf16 %v2007_v12  ;;  %v2285_v45 = vunpack.c.l.bf16 %v2015_v42  ;;  %v8108_v42 = vld [vmem:[%s9612_s6 + $0x30] sm:$0xff]  ;;  %v2024_v60 = vpack.c.bf16 %v1961_v35, %v1912_v9  ;;  %v8123_v26 = vpop.permute.xlu0 %3459 }
 0x282   : > { %v2020_v3 = vpack.c.bf16 %v8014_v39, %v8012_v44  ;;  %v2750_v35 = vmax.f32 %v2430_v40, 0.0  ;;  %v2012_v44 = vpack.c.bf16 %v7955_v61, %v7953_v21  ;;  %v2008_v21 = vpack.c.bf16 %v7947_v16, %v7945_v59 }
 0x283   : > { %v2317_v43 = vunpack.c.l.bf16 %v2031_v32  ;;  %v2318_v33 = vunpack.c.h.bf16 %v2031_v32  ;;  %v2773_v32 = vmax.f32 %v2453_v4, 0.0  ;;  %v2414_v11 = vadd.f32 %v7788_v57, %v2270_v41 }
 0x284   : > { %v2733_v4 = vmax.f32 %v2413_v31, 0.0  ;;  %v2766_v41 = vmax.f32 %v2446_v19, 0.0  ;;  %v8131_v31 = vpop.permute.xlu2 %3486  ;;  %v2304_v39 = vunpack.c.h.bf16 %v2024_v60  ;;  %v2295_v40 = vunpack.c.l.bf16 %v2020_v3 }
 0x285   : > { %v2461_v63 = vadd.f32 %v7782_v27, %v2317_v43  ;;  %v2462_v17 = vadd.f32 %v7782_v27, %v2318_v33  ;;  %v2429_v33 = vadd.f32 %v7784_v58, %v2285_v45  ;;  %v2726_v45 = vmax.f32 %v8092_v8, 0.0 }
 0x286   : > { %v2821_v9 = vpack.c.bf16 %v2733_v4, %v2725_v13 }
 0x287   : > { %v2781_v37 = vmax.f32 %v2461_v63, 0.0  ;;  %v2782_v12 = vmax.f32 %v2462_v17, 0.0  ;;  %v1915_v25 = vpop.f32.mrf.mxu2  ;;  %v1964_v29 = vpop.f32.mrf.mxu3  ;;  %v2765_v17 = vmax.f32 %v2445_v18, 0.0  ;;  %v2749_v8 = vmax.f32 %v2429_v33, 0.0 }
 0x288   : > { %v2028_v43 = vpack.c.bf16 %v1964_v29, %v1915_v25  ;;  %v2757_v29 = vmax.f32 %v2437_v34, 0.0  ;;  %v2758_v25 = vmax.f32 %v2438_v51, 0.0 }
 0x289   : > { %3044 = vmatmul.bf16.gmra.mxu2 %v8019_v54  ;;  %3093 = vmatmul.bf16.gmra.mxu3 %v8019_v54  ;;  %v2845_v63 = vpack.c.bf16 %v2781_v37, %v2773_v32  ;;  %v2846_v24 = vpack.c.bf16 %v2782_v12, %v2774_v38  ;;  %v8127_v38 = vpack.c.bf16 %v7924_v47, %v7922_v30  ;;  %v2734_v37 = vmax.f32 %v2414_v11, 0.0  ;;  %v8150_v16 = vpop.permute.xlu0 %3450 }
 0x28a   : > { %v2311_v2 = vunpack.c.l.bf16 %v2028_v43  ;;  %v2312_v53 = vunpack.c.h.bf16 %v2028_v43  ;;  %v2837_v18 = vpack.c.bf16 %v2765_v17, %v2757_v29  ;;  %v2838_v19 = vpack.c.bf16 %v2766_v41, %v2758_v25  ;;  %v8139_v17 = vpop.permute.xlu1 %3522 }
 0x28b   : > { %2951 = vmatmul.bf16.gmra.mxu0 %v8108_v42  ;;  %3000 = vmatmul.bf16.gmra.mxu1 %v8108_v42  ;;  %v2741_v32 = vmax.f32 %v2421_v52, 0.0  ;;  %v2742_v30 = vmax.f32 %v2422_v6, 0.0  ;;  %v2016_v47 = vpack.c.bf16 %v7977_v20, %v7975_v62  ;;  %v2303_v12 = vunpack.c.l.bf16 %v2024_v60 }
 0x28c   : > { %3109 = vmatpush.bf16.msrb.mxu0 %v2845_v63  ;;  %3158 = vmatpush.bf16.msrb.mxu1 %v2846_v24  ;;  %v2822_v51 = vpack.c.bf16 %v2734_v37, %v2726_v45  ;;  %v2296_v63 = vunpack.c.h.bf16 %v2020_v3  ;;  %v2455_v13 = vadd.f32 %v7773_v7, %v2311_v2  ;;  %v2456_v43 = vadd.f32 %v7773_v7, %v2312_v53 }
 0x28d   : > { %v2829_v24 = vpack.c.bf16 %v2749_v8, %v2741_v32  ;;  %v2830_v4 = vpack.c.bf16 %v2750_v35, %v2742_v30  ;;  %v2287_v60 = vunpack.c.l.bf16 %v2016_v47  ;;  %v2288_v61 = vunpack.c.h.bf16 %v2016_v47 }
 0x28e   : > { %v2447_v41 = vadd.f32 %v7775_v10, %v2303_v12  ;;  %v2448_v45 = vadd.f32 %v7775_v10, %v2304_v39  ;;  %v2718_v7 = vmax.f32 %v8079_v55, 0.0  ;;  %v2279_v29 = vunpack.c.l.bf16 %v2012_v44  ;;  %v8157_v55 = vld [vmem:[%s9612_s6 + $0x38] sm:$0xff] }
 0x28f   : > { %v1917_v34 = vpop.f32.mrf.mxu2  ;;  %v1966_v11 = vpop.f32.mrf.mxu3  ;;  %v2280_v25 = vunpack.c.h.bf16 %v2012_v44  ;;  %v2439_v37 = vadd.f32 %v7779_v1, %v2295_v40  ;;  %v2440_v59 = vadd.f32 %v7779_v1, %v2296_v63  ;;  %v2775_v3 = vmax.f32 %v2455_v13, 0.0 }
 0x290   : > { %v2032_v33 = vpack.c.bf16 %v1966_v11, %v1917_v34  ;;  %3110 = vmatpush.bf16.msrb.mxu0 %v2837_v18  ;;  %3159 = vmatpush.bf16.msrb.mxu1 %v2838_v19  ;;  %v2776_v8 = vmax.f32 %v2456_v43, 0.0  ;;  %v2271_v2 = vunpack.c.l.bf16 %v2008_v21  ;;  %v2272_v53 = vunpack.c.h.bf16 %v2008_v21  ;;  %v8159_v19 = vpop.permute.xlu2 %3441 }
 0x291   : > { %v2432_v18 = vadd.f32 %v7784_v58, %v2288_v61  ;;  %v2767_v30 = vmax.f32 %v2447_v41, 0.0  ;;  %v2768_v47 = vmax.f32 %v2448_v45, 0.0  ;;  %v2263_v12 = vunpack.c.l.bf16 %v7935_v15 }
 0x292   : > { %v2319_v62 = vunpack.c.l.bf16 %v2032_v33  ;;  %v2320_v20 = vunpack.c.h.bf16 %v2032_v33  ;;  %v2264_v34 = vunpack.c.h.bf16 %v7935_v15  ;;  %v9766_v11 = vmax.f32 %v8064_v49, 0.0  ;;  %v8179_v43 = vpop.permute.xlu1 %3477 }
 0x293   : > { %v2423_v33 = vadd.f32 %v7786_v22, %v2279_v29  ;;  %v2759_v40 = vmax.f32 %v2439_v37, 0.0  ;;  %v2760_v63 = vmax.f32 %v2440_v59, 0.0  ;;  %v2255_v15 = vunpack.c.l.bf16 %v8127_v38  ;;  %v9772_v59 = vld [vmem:[#allocation16_spill] sm:$0xff] }
 0x294   : > { %v2463_v52 = vadd.f32 %v7782_v27, %v2319_v62  ;;  %v2464_v6 = vadd.f32 %v7782_v27, %v2320_v20  ;;  %3111 = vmatpush.bf16.msrb.mxu0 %v2829_v24  ;;  %3160 = vmatpush.bf16.msrb.mxu1 %v2830_v4  ;;  %v2431_v27 = vadd.f32 %v7784_v58, %v2287_v60  ;;  %v9765_v58 = vmax.f32 %v8048_v0, 0.0 }
 0x295   : > { %v2256_v24 = vunpack.c.h.bf16 %v8127_v38  ;;  %v2415_v0 = vadd.f32 %v7788_v57, %v2271_v2  ;;  %v2416_v49 = vadd.f32 %v7788_v57, %v2272_v53  ;;  %v2752_v13 = vmax.f32 %v2432_v18, 0.0  ;;  %v9775_v2 = vld [vmem:[#allocation31_spill] sm:$0xff] }
 0x296   : > { %v2783_v35 = vmax.f32 %v2463_v52, 0.0  ;;  %v2784_v10 = vmax.f32 %v2464_v6, 0.0  ;;  %v2813_v44 = vpack.c.bf16 %v9766_v11, %v9765_v58  ;;  %v2751_v4 = vmax.f32 %v2431_v27, 0.0  ;;  %v9777_v27 = vld [vmem:[#allocation30_spill] sm:$0xff] }
 0x297   : > { %v2247_v62 = vunpack.c.l.bf16 %v7914_v23  ;;  %v2248_v38 = vunpack.c.h.bf16 %v7914_v23  ;;  %v9768_v20 = vmax.f32 %v8026_v36, 0.0  ;;  %v9769_v57 = vmax.f32 %v8042_v46, 0.0 }
 0x298   : > { %3112 = vmatpush.bf16.msrb.mxu0 %v2821_v9  ;;  %3161 = vmatpush.bf16.msrb.mxu1 %v2822_v51  ;;  %v2847_v1 = vpack.c.bf16 %v2783_v35, %v2775_v3  ;;  %v2848_v32 = vpack.c.bf16 %v2784_v10, %v2776_v8  ;;  %v9767_v9 = vmax.f32 %v8051_v56, 0.0  ;;  %v2424_v51 = vadd.f32 %v7786_v22, %v2280_v25  ;;  %v9773_v35 = vld [vmem:[#allocation28_spill] sm:$0xff] }
 0x299   : > { %3049 = vmatmul.bf16.gmra.mxu2 %v8108_v42  ;;  %3098 = vmatmul.bf16.gmra.mxu3 %v8108_v42  ;;  %v2839_v56 = vpack.c.bf16 %v2767_v30, %v2759_v40  ;;  %v2840_v22 = vpack.c.bf16 %v2768_v47, %v2760_v63  ;;  %v2805_v21 = vpack.c.bf16 %v9769_v57, %v9768_v20  ;;  %v9770_v60 = vmax.f32 %v8029_v14, 0.0  ;;  %v8197_v14 = vpop.permute.xlu0 %3405  ;;  %v8209_v30 = vpop.permute.xlu2 %3432  ;;  %v9781_v47 = vld [vmem:[#allocation19_spill] sm:$0xff]  ;;  %v9789_v57 = vld [vmem:[#allocation25_spill] sm:$0xff] }
 0x29a   : > { %v2814_v39 = vpack.c.bf16 %v2718_v7, %v9767_v9  ;;  %3207 = vmatpush.bf16.msrb.mxu2 %v2847_v1  ;;  %3256 = vmatpush.bf16.msrb.mxu3 %v2848_v32  ;;  %v9771_v61 = vmax.f32 %v8045_v48, 0.0  ;;  %v2407_v45 = vadd.f32 %v7777_v5, %v2263_v12  ;;  %v2408_v52 = vadd.f32 %v7777_v5, %v2264_v34 }
 0x29b   : > { %2956 = vmatmul.bf16.gmra.mxu0 %v8157_v55  ;;  %3005 = vmatmul.bf16.gmra.mxu1 %v8157_v55  ;;  %v2743_v6 = vmax.f32 %v2423_v33, 0.0  ;;  %v2744_v7 = vmax.f32 %v2424_v51, 0.0  ;;  %v2239_v23 = vunpack.c.l.bf16 %v8076_v50  ;;  %v2240_v36 = vunpack.c.h.bf16 %v8076_v50  ;;  %v9783_v33 = vld [vmem:[#allocation14_spill] sm:$0xff] }
 0x29c   : > { %3113 = vmatpush.bf16.msrb.mxu0 %v2813_v44  ;;  %3162 = vmatpush.bf16.msrb.mxu1 %v2814_v39  ;;  %v2806_v41 = vpack.c.bf16 %v9771_v61, %v9770_v60  ;;  %v2399_v46 = vadd.f32 %v9762_v28, %v2255_v15  ;;  %v2400_v29 = vadd.f32 %v9762_v28, %v2256_v24  ;;  %v2735_v37 = vmax.f32 %v2415_v0, 0.0  ;;  %v9779_v28 = vld [vmem:[#allocation32_spill] sm:$0xff]  ;;  %v9782_v44 = vld [vmem:[#allocation34_spill] sm:$0xff]  ;;  %v9791_v60 = vld [vmem:[#allocation27_spill] sm:$0xff] }
 0x29d   : > { %v2831_v48 = vpack.c.bf16 %v2751_v4, %v2743_v6  ;;  %v2832_v25 = vpack.c.bf16 %v2752_v13, %v2744_v7  ;;  %v2736_v5 = vmax.f32 %v2416_v49, 0.0  ;;  %v2231_v3 = vunpack.c.l.bf16 %v9772_v59  ;;  %v9784_v49 = vld [vmem:[#allocation23_spill] sm:$0xff]  ;;  %v9785_v4 = vld [vmem:[#allocation24_spill] sm:$0xff] }
 0x29e   : > { %3208 = vmatpush.bf16.msrb.mxu2 %v2839_v56  ;;  %3257 = vmatpush.bf16.msrb.mxu3 %v2840_v22  ;;  %v2232_v8 = vunpack.c.h.bf16 %v9772_v59  ;;  %v9774_v10 = vmax.f32 %v9773_v35, 0.0  ;;  %v9776_v50 = vmax.f32 %v9775_v2, 0.0  ;;  %v9778_v18 = vmax.f32 %v9777_v27, 0.0 }
 0x29f   : > { %v9780_v1 = vmax.f32 %v9779_v28, 0.0  ;;  %v2391_v12 = vadd.f32 %v9781_v47, %v2247_v62  ;;  %v2392_v34 = vadd.f32 %v9781_v47, %v2248_v38  ;;  %v2727_v58 = vmax.f32 %v2407_v45, 0.0  ;;  %v9787_v62 = vld [vmem:[#allocation26_spill] sm:$0xff]  ;;  %v9793_v45 = vld [vmem:[#allocation15_spill] sm:$0xff] }
 0x2a0   : > { %3114 = vmatpush.bf16.msrb.mxu0 %v2805_v21  ;;  %3163 = vmatpush.bf16.msrb.mxu1 %v2806_v41  ;;  %v2797_v53 = vpack.c.bf16 %v9776_v50, %v9774_v10  ;;  %v2728_v11 = vmax.f32 %v2408_v52, 0.0  ;;  %v2223_v9 = vunpack.c.l.bf16 %v9782_v44  ;;  %v2224_v39 = vunpack.c.h.bf16 %v9782_v44  ;;  %v9796_v50 = vld [vmem:[#allocation21_spill] sm:$0xff] }
 0x2a1   : > { %v2798_v32 = vpack.c.bf16 %v9780_v1, %v9778_v18  ;;  %v2383_v51 = vadd.f32 %v9783_v33, %v2239_v23  ;;  %v2384_v40 = vadd.f32 %v9783_v33, %v2240_v36  ;;  %v2823_v63 = vpack.c.bf16 %v2735_v37, %v2727_v58  ;;  %v8229_v36 = vpop.permute.xlu1 %3468  ;;  %v3397_v28 = vpop.permute.xlu0 %3396  ;;  %v9797_v1 = vld [vmem:[#allocation10_spill] sm:$0xff]  ;;  %v9798_v58 = vld [vmem:[#allocation9_spill] sm:$0xff] }
 0x2a2   : > { %3209 = vmatpush.bf16.msrb.mxu2 %v2831_v48  ;;  %3258 = vmatpush.bf16.msrb.mxu3 %v2832_v25  ;;  %v2824_v15 = vpack.c.bf16 %v2736_v5, %v2728_v11  ;;  %v2719_v24 = vmax.f32 %v2399_v46, 0.0  ;;  %v2720_v0 = vmax.f32 %v2400_v29, 0.0  ;;  %v2215_v56 = vunpack.c.l.bf16 %v9784_v49  ;;  %v9794_v46 = vld [vmem:[#allocation33_spill] sm:$0xff]  ;;  %v9795_v25 = vld [vmem:[#allocation11_spill] sm:$0xff] }
 0x2a3   : > { %v2216_v22 = vunpack.c.h.bf16 %v9784_v49  ;;  %v9786_v13 = vmax.f32 %v9785_v4, 0.0  ;;  %v9788_v38 = vmax.f32 %v9787_v62, 0.0  ;;  %v9790_v21 = vmax.f32 %v9789_v57, 0.0  ;;  %v9801_v49 = vld [vmem:[#allocation8_spill] sm:$0xff] }
 0x2a4   : > { %3115 = vmatpush.bf16.msrb.mxu0 %v2797_v53  ;;  %3164 = vmatpush.bf16.msrb.mxu1 %v2798_v32  ;;  %v9792_v61 = vmax.f32 %v9791_v60, 0.0  ;;  %v2375_v52 = vadd.f32 %v9793_v45, %v2231_v3  ;;  %v2376_v6 = vadd.f32 %v9793_v45, %v2232_v8  ;;  %v2711_v7 = vmax.f32 %v2391_v12, 0.0 }
 0x2a5   : > { %v2789_v20 = vpack.c.bf16 %v9788_v38, %v9786_v13  ;;  %v2712_v23 = vmax.f32 %v2392_v34, 0.0  ;;  %v2207_v29 = vunpack.c.l.bf16 %v9794_v46  ;;  %v2208_v48 = vunpack.c.h.bf16 %v9794_v46 }
 0x2a6   : > { %v2790_v41 = vpack.c.bf16 %v9792_v61, %v9790_v21  ;;  %3210 = vmatpush.bf16.msrb.mxu2 %v2823_v63  ;;  %3259 = vmatpush.bf16.msrb.mxu3 %v2824_v15  ;;  %v2367_v37 = vadd.f32 %v9795_v25, %v2223_v9  ;;  %v2368_v5 = vadd.f32 %v9795_v25, %v2224_v39  ;;  %v2703_v10 = vmax.f32 %v2383_v51, 0.0  ;;  %v9799_v9 = vld [vmem:[#allocation22_spill] sm:$0xff]  ;;  %v3388_v39 = vpop.permute.xlu2 %3387  ;;  %v9800_v15 = vld [vmem:[#allocation7_spill] sm:$0xff] }
 0x2a7   : > { %v2815_v3 = vpack.c.bf16 %v2719_v24, %v2711_v7  ;;  %v2816_v8 = vpack.c.bf16 %v2720_v0, %v2712_v23  ;;  %v2704_v2 = vmax.f32 %v2384_v40, 0.0  ;;  %v2199_v53 = vunpack.c.l.bf16 %v9796_v50 }
 0x2a8   : > { %v2922_v59 = vpop.f32.mrf.mxu0  ;;  %v2971_v35 = vpop.f32.mrf.mxu1  ;;  %3116 = vmatpush.bf16.msrb.mxu0 %v2789_v20  ;;  %3165 = vmatpush.bf16.msrb.mxu1 %v2790_v41  ;;  %v2200_v27 = vunpack.c.h.bf16 %v9796_v50  ;;  %v2359_v32 = vadd.f32 %v9797_v1, %v2215_v56  ;;  %v2360_v47 = vadd.f32 %v9797_v1, %v2216_v22  ;;  %v2695_v12 = vmax.f32 %v2375_v52, 0.0 }
 0x2a9   : > { %3054 = vmatmul.bf16.gmra.mxu2 %v8157_v55  ;;  %3103 = vmatmul.bf16.gmra.mxu3 %v8157_v55  ;;  %v3305_v18 = vpack.c.bf16 %v2971_v35, %v2922_v59  ;;  %v2696_v34 = vmax.f32 %v2376_v6, 0.0  ;;  %v2351_v11 = vadd.f32 %v9798_v58, %v2207_v29  ;;  %v2352_v44 = vadd.f32 %v9798_v58, %v2208_v48  ;;  %v8251_v52 = vpop.permute.xlu1 %3423 }
 0x2aa   : > { %3211 = vmatpush.bf16.msrb.mxu2 %v2815_v3  ;;  %3260 = vmatpush.bf16.msrb.mxu3 %v2816_v8  ;;  %v2807_v33 = vpack.c.bf16 %v2703_v10, %v2695_v12  ;;  %v2687_v40 = vmax.f32 %v2367_v37, 0.0  ;;  %v2688_v63 = vmax.f32 %v2368_v5, 0.0  ;;  %v3393_v24 = vperm.slane %v3388_v39, %v9800_v15 }
 0x2ab   : > { %3117 = vmatmul.bf16.vlgmr.msrb.gmra.mxu0 %v9799_v9  ;;  %3166 = vmatmul.bf16.vlgmr.msrb.gmra.mxu1 %v9799_v9  ;;  %v2808_v51 = vpack.c.bf16 %v2704_v2, %v2696_v34  ;;  %v3402_v0 = vperm.slane %v3397_v28, %v9800_v15  ;;  %v2343_v56 = vadd.f32 %v9801_v49, %v2199_v53  ;;  %v2679_v4 = vmax.f32 %v2359_v32, 0.0 }
 0x2ac   : > { %v2344_v22 = vadd.f32 %v9801_v49, %v2200_v27  ;;  %v2680_v13 = vmax.f32 %v2360_v47, 0.0  ;;  %v3529_v62 = vunpack.c.l.bf16 %v3305_v18  ;;  %v3530_v38 = vunpack.c.h.bf16 %v3305_v18  ;;  %v9804_v47 = vld [vmem:[#allocation20_spill] sm:$0xff] }
 0x2ad   : > { %v2799_v21 = vpack.c.bf16 %v2687_v40, %v2679_v4  ;;  %v2671_v61 = vmax.f32 %v2351_v11, 0.0  ;;  %v2672_v41 = vmax.f32 %v2352_v44, 0.0  ;;  %v8249_v45 = vunpack.c.l.bf16 %v3393_v24 }
 0x2ae   : > { %3212 = vmatpush.bf16.msrb.mxu2 %v2807_v33  ;;  %3261 = vmatpush.bf16.msrb.mxu3 %v2808_v51  ;;  %v2800_v60 = vpack.c.bf16 %v2688_v63, %v2680_v13  ;;  %v8253_v7 = vunpack.c.l.bf16 %v3402_v0  ;;  %v2663_v23 = vmax.f32 %v2343_v56, 0.0  ;;  %v2664_v46 = vmax.f32 %v2344_v22, 0.0 }
 0x2af   : > { %9802 = vst [vmem:[#allocation16_spill] sm:$0xff] %v8249_v45  ;;  %v3673_v29 = vadd.f32 %v8249_v45, %v3529_v62  ;;  %v3674_v48 = vadd.f32 %v8249_v45, %v3530_v38  ;;  %v3411_v11 = vperm.slane %v8197_v14, %v9800_v15 }
 0x2b0   : > { %v2924_v20 = vpop.f32.mrf.mxu0  ;;  %v2973_v57 = vpop.f32.mrf.mxu1  ;;  %9803 = vst [vmem:[#allocation28_spill] sm:$0xff] %v8253_v7  ;;  %v2791_v5 = vpack.c.bf16 %v2671_v61, %v2663_v23  ;;  %v2792_v59 = vpack.c.bf16 %v2672_v41, %v2664_v46 }
 0x2b1   : > { %v3309_v6 = vpack.c.bf16 %v2973_v57, %v2924_v20  ;;  %v3993_v8 = vmax.f32 %v3673_v29, 0.0  ;;  %v3994_v10 = vmax.f32 %v3674_v48, 0.0  ;;  %v3415_v32 = vpop.permute.xlu1 %3414  ;;  %v8270_v63 = vunpack.c.l.bf16 %v3411_v11 }
 0x2b2   : > { %3213 = vmatpush.bf16.msrb.mxu2 %v2799_v21  ;;  %3262 = vmatpush.bf16.msrb.mxu3 %v2800_v60  ;;  %v3420_v44 = vperm.slane %v3415_v32, %v9800_v15 }
 0x2b3   : > { %v3537_v25 = vunpack.c.l.bf16 %v3309_v6  ;;  %v3538_v37 = vunpack.c.h.bf16 %v3309_v6  ;;  %9805 = vst [vmem:[#allocation31_spill] sm:$0xff] %v8270_v63 }
 0x2b4   : > { %v8272_v0 = vunpack.c.l.bf16 %v3420_v44 }
 0x2b5   : > { %v3681_v35 = vadd.f32 %v8253_v7, %v3537_v25  ;;  %v3682_v3 = vadd.f32 %v8253_v7, %v3538_v37 }
 0x2b6   : > { %3214 = vmatpush.bf16.msrb.mxu2 %v2791_v5  ;;  %3263 = vmatpush.bf16.msrb.mxu3 %v2792_v59  ;;  %9806 = vst [vmem:[#allocation30_spill] sm:$0xff] %v8272_v0 }
 0x2b7   : > { %v4001_v2 = vmax.f32 %v3681_v35, 0.0  ;;  %v4002_v50 = vmax.f32 %v3682_v3, 0.0 }
 0x2b8   : > { %v2927_v53 = vpop.f32.mrf.mxu0  ;;  %v2976_v27 = vpop.f32.mrf.mxu1 }
 0x2b9   : > { %3215 = vmatmul.bf16.vlgmr.msrb.gmra.mxu2 %v9799_v9  ;;  %3264 = vmatmul.bf16.vlgmr.msrb.gmra.mxu3 %v9799_v9  ;;  %v3313_v18 = vpack.c.bf16 %v2976_v27, %v2927_v53  ;;  %v8261_v28 = vpack.c.bf16 %v4001_v2, %v3993_v8  ;;  %v8263_v1 = vpack.c.bf16 %v4002_v50, %v3994_v10  ;;  %v9807_v10 = vld [vmem:[#allocation17_spill] sm:$0xff] }
 0x2bb   : > { %3122 = vmatmul.bf16.gmra.mxu0 %v9804_v47  ;;  %3171 = vmatmul.bf16.gmra.mxu1 %v9804_v47  ;;  %v3545_v39 = vunpack.c.l.bf16 %v3313_v18  ;;  %v3546_v9 = vunpack.c.h.bf16 %v3313_v18 }
 0x2bc   : > { %v3020_v12 = vpop.f32.mrf.mxu2  ;;  %v3069_v34 = vpop.f32.mrf.mxu3 }
 0x2bd   : > { %v3306_v58 = vpack.c.bf16 %v3069_v34, %v3020_v12  ;;  %v3689_v22 = vadd.f32 %v8270_v63, %v3545_v39  ;;  %v3690_v4 = vadd.f32 %v8270_v63, %v3546_v9 }
 0x2bf   : > { %v3531_v24 = vunpack.c.l.bf16 %v3306_v58  ;;  %v3532_v13 = vunpack.c.h.bf16 %v3306_v58  ;;  %v4009_v23 = vmax.f32 %v3689_v22, 0.0  ;;  %v4010_v46 = vmax.f32 %v3690_v4, 0.0 }
 0x2c0   : > { %v2929_v33 = vpop.f32.mrf.mxu0  ;;  %v2978_v51 = vpop.f32.mrf.mxu1  ;;  %v3438_v58 = vperm.slane %v8209_v30, %v9800_v15 }
 0x2c1   : > { %v3317_v40 = vpack.c.bf16 %v2978_v51, %v2929_v33  ;;  %v3675_v21 = vadd.f32 %v8249_v45, %v3531_v24  ;;  %v3676_v29 = vadd.f32 %v8249_v45, %v3532_v13 }
 0x2c2   : > { %v8300_v24 = vunpack.c.l.bf16 %v3438_v58 }
 0x2c3   : > { %v3553_v49 = vunpack.c.l.bf16 %v3317_v40  ;;  %v3554_v56 = vunpack.c.h.bf16 %v3317_v40  ;;  %v3995_v8 = vmax.f32 %v3675_v21, 0.0  ;;  %v3996_v53 = vmax.f32 %v3676_v29, 0.0 }
 0x2c4   : > { %v3022_v14 = vpop.f32.mrf.mxu2  ;;  %v3071_v62 = vpop.f32.mrf.mxu3  ;;  %9811 = vst [vmem:[#allocation14_spill] sm:$0xff] %v8300_v24 }
 0x2c5   : > { %v3697_v38 = vadd.f32 %v8272_v0, %v3553_v49  ;;  %v3698_v20 = vadd.f32 %v8272_v0, %v3554_v56  ;;  %v3310_v57 = vpack.c.bf16 %v3071_v62, %v3022_v14 }
 0x2c7   : > { %v3539_v60 = vunpack.c.l.bf16 %v3310_v57  ;;  %v3540_v61 = vunpack.c.h.bf16 %v3310_v57  ;;  %v4017_v41 = vmax.f32 %v3697_v38, 0.0  ;;  %v4018_v6 = vmax.f32 %v3698_v20, 0.0 }
 0x2c8   : > { %v2932_v48 = vpop.f32.mrf.mxu0  ;;  %v2981_v25 = vpop.f32.mrf.mxu1 }
 0x2c9   : > { %v3683_v37 = vadd.f32 %v8253_v7, %v3539_v60  ;;  %v3684_v5 = vadd.f32 %v8253_v7, %v3540_v61  ;;  %3220 = vmatmul.bf16.gmra.mxu2 %v9804_v47  ;;  %3269 = vmatmul.bf16.gmra.mxu3 %v9804_v47  ;;  %v3321_v59 = vpack.c.bf16 %v2981_v25, %v2932_v48 }
 0x2ca   : > { %v8284_v35 = vpack.c.bf16 %v4017_v41, %v4009_v23  ;;  %v8286_v3 = vpack.c.bf16 %v4018_v6, %v4010_v46  ;;  %v3429_v47 = vperm.slane %v8251_v52, %v9800_v15 }
 0x2cb   : > { %3127 = vmatmul.bf16.gmra.mxu0 %v9807_v10  ;;  %3176 = vmatmul.bf16.gmra.mxu1 %v9807_v10  ;;  %v4003_v2 = vmax.f32 %v3683_v37, 0.0  ;;  %v4004_v50 = vmax.f32 %v3684_v5, 0.0  ;;  %v3561_v11 = vunpack.c.l.bf16 %v3321_v59  ;;  %v3562_v44 = vunpack.c.h.bf16 %v3321_v59 }
 0x2cc   : > { %v3025_v27 = vpop.f32.mrf.mxu2  ;;  %v3074_v18 = vpop.f32.mrf.mxu3  ;;  %v8298_v51 = vunpack.c.l.bf16 %v3429_v47 }
 0x2cd   : > { %v3314_v32 = vpack.c.bf16 %v3074_v18, %v3025_v27  ;;  %v8290_v12 = vpack.c.bf16 %v4003_v2, %v3995_v8  ;;  %v8294_v34 = vpack.c.bf16 %v4004_v50, %v3996_v53  ;;  %v9812_v2 = vld [vmem:[#allocation12_spill] sm:$0xff] }
 0x2ce   : > { %9810 = vst [vmem:[#allocation34_spill] sm:$0xff] %v8298_v51  ;;  %v3705_v22 = vadd.f32 %v8298_v51, %v3561_v11  ;;  %v3706_v52 = vadd.f32 %v8298_v51, %v3562_v44  ;;  %v3456_v44 = vperm.slane %v8150_v16, %v9800_v15 }
 0x2cf   : > { %9808 = vst [vmem:[#allocation32_spill] sm:$0xff] %v8290_v12  ;;  %v3547_v40 = vunpack.c.l.bf16 %v3314_v32  ;;  %v3548_v4 = vunpack.c.h.bf16 %v3314_v32 }
 0x2d0   : > { %9809 = vst [vmem:[#allocation19_spill] sm:$0xff] %v8294_v34  ;;  %v2934_v39 = vpop.f32.mrf.mxu0  ;;  %v2983_v9 = vpop.f32.mrf.mxu1  ;;  %v4025_v41 = vmax.f32 %v3705_v22, 0.0  ;;  %v4026_v6 = vmax.f32 %v3706_v52, 0.0  ;;  %v8328_v52 = vunpack.c.l.bf16 %v3456_v44 }
 0x2d1   : > { %v3325_v33 = vpack.c.bf16 %v2983_v9, %v2934_v39  ;;  %v3691_v20 = vadd.f32 %v8270_v63, %v3547_v40  ;;  %v3692_v23 = vadd.f32 %v8270_v63, %v3548_v4 }
 0x2d2   : > { %9814 = vst [vmem:[#allocation24_spill] sm:$0xff] %v8328_v52 }
 0x2d3   : > { %v3569_v49 = vunpack.c.l.bf16 %v3325_v33  ;;  %v3570_v56 = vunpack.c.h.bf16 %v3325_v33  ;;  %v4011_v8 = vmax.f32 %v3691_v20, 0.0  ;;  %v4012_v27 = vmax.f32 %v3692_v23, 0.0 }
 0x2d4   : > { %v3027_v13 = vpop.f32.mrf.mxu2  ;;  %v3076_v14 = vpop.f32.mrf.mxu3 }
 0x2d5   : > { %v3713_v30 = vadd.f32 %v8300_v24, %v3569_v49  ;;  %v3714_v62 = vadd.f32 %v8300_v24, %v3570_v56  ;;  %v3318_v38 = vpack.c.bf16 %v3076_v14, %v3027_v13 }
 0x2d7   : > { %v3555_v57 = vunpack.c.l.bf16 %v3318_v38  ;;  %v3556_v21 = vunpack.c.h.bf16 %v3318_v38  ;;  %v4033_v60 = vmax.f32 %v3713_v30, 0.0  ;;  %v4034_v61 = vmax.f32 %v3714_v62, 0.0 }
 0x2d8   : > { %v2937_v46 = vpop.f32.mrf.mxu0  ;;  %v2986_v29 = vpop.f32.mrf.mxu1 }
 0x2d9   : > { %v3699_v48 = vadd.f32 %v8272_v0, %v3555_v57  ;;  %v3700_v25 = vadd.f32 %v8272_v0, %v3556_v21  ;;  %3225 = vmatmul.bf16.gmra.mxu2 %v9807_v10  ;;  %3274 = vmatmul.bf16.gmra.mxu3 %v9807_v10  ;;  %v3329_v37 = vpack.c.bf16 %v2986_v29, %v2937_v46 }
 0x2da   : > { %v8312_v5 = vpack.c.bf16 %v4033_v60, %v4025_v41  ;;  %v8314_v59 = vpack.c.bf16 %v4034_v61, %v4026_v6  ;;  %v3447_v10 = vperm.slane %v8159_v19, %v9800_v15 }
 0x2db   : > { %3132 = vmatmul.bf16.gmra.mxu0 %v9812_v2  ;;  %3181 = vmatmul.bf16.gmra.mxu1 %v9812_v2  ;;  %v4019_v50 = vmax.f32 %v3699_v48, 0.0  ;;  %v4020_v53 = vmax.f32 %v3700_v25, 0.0  ;;  %v3577_v39 = vunpack.c.l.bf16 %v3329_v37  ;;  %v3578_v9 = vunpack.c.h.bf16 %v3329_v37  ;;  %v6667_v2 = vld [vmem:[%s9612_s6 + $0x18] sm:$0xff] }
 0x2dc   : > { %v3030_v18 = vpop.f32.mrf.mxu2  ;;  %v3079_v32 = vpop.f32.mrf.mxu3  ;;  %v8326_v56 = vunpack.c.l.bf16 %v3447_v10 }
 0x2dd   : > { %v3322_v47 = vpack.c.bf16 %v3079_v32, %v3030_v18  ;;  %v8318_v58 = vpack.c.bf16 %v4019_v50, %v4011_v8  ;;  %v8322_v11 = vpack.c.bf16 %v4020_v53, %v4012_v27  ;;  %v9815_v32 = vld [vmem:[#allocation13_spill] sm:$0xff] }
 0x2de   : > { %9813 = vst [vmem:[#allocation23_spill] sm:$0xff] %v8326_v56  ;;  %v3721_v14 = vadd.f32 %v8326_v56, %v3577_v39  ;;  %v3722_v19 = vadd.f32 %v8326_v56, %v3578_v9 }
 0x2df   : > { %v3563_v22 = vunpack.c.l.bf16 %v3322_v47  ;;  %v3564_v30 = vunpack.c.h.bf16 %v3322_v47 }
 0x2e0   : > { %v2939_v33 = vpop.f32.mrf.mxu0  ;;  %v2988_v40 = vpop.f32.mrf.mxu1  ;;  %v4041_v23 = vmax.f32 %v3721_v14, 0.0  ;;  %v4042_v46 = vmax.f32 %v3722_v19, 0.0 }
 0x2e1   : > { %v3333_v49 = vpack.c.bf16 %v2988_v40, %v2939_v33  ;;  %v3707_v21 = vadd.f32 %v8298_v51, %v3563_v22  ;;  %v3708_v29 = vadd.f32 %v8298_v51, %v3564_v30 }
 0x2e3   : > { %v3585_v4 = vunpack.c.l.bf16 %v3333_v49  ;;  %v3586_v13 = vunpack.c.h.bf16 %v3333_v49  ;;  %v4027_v18 = vmax.f32 %v3707_v21, 0.0  ;;  %v4028_v44 = vmax.f32 %v3708_v29, 0.0 }
 0x2e4   : > { %v3032_v62 = vpop.f32.mrf.mxu2  ;;  %v3081_v38 = vpop.f32.mrf.mxu3 }
 0x2e5   : > { %v3729_v16 = vadd.f32 %v8328_v52, %v3585_v4  ;;  %v3730_v20 = vadd.f32 %v8328_v52, %v3586_v13  ;;  %v3326_v57 = vpack.c.bf16 %v3081_v38, %v3032_v62 }
 0x2e7   : > { %v3571_v60 = vunpack.c.l.bf16 %v3326_v57  ;;  %v3572_v61 = vunpack.c.h.bf16 %v3326_v57  ;;  %v4049_v41 = vmax.f32 %v3729_v16, 0.0  ;;  %v4050_v6 = vmax.f32 %v3730_v20, 0.0 }
 0x2e8   : > { %v2942_v48 = vpop.f32.mrf.mxu0  ;;  %v2991_v25 = vpop.f32.mrf.mxu1 }
 0x2e9   : > { %v3715_v37 = vadd.f32 %v8300_v24, %v3571_v60  ;;  %v3716_v8 = vadd.f32 %v8300_v24, %v3572_v61  ;;  %3230 = vmatmul.bf16.gmra.mxu2 %v6667_v2  ;;  %3279 = vmatmul.bf16.gmra.mxu3 %v6667_v2  ;;  %v8341_v50 = vpack.c.bf16 %v2991_v25, %v2942_v48 }
 0x2ea   : > { %v8343_v53 = vpack.c.bf16 %v4049_v41, %v4041_v23  ;;  %v8345_v27 = vpack.c.bf16 %v4050_v6, %v4042_v46  ;;  %v6668_v6 = vld [vmem:[%s9612_s6 + $0x20] sm:$0xff] }
 0x2eb   : > { %3137 = vmatmul.bf16.gmra.mxu0 %v9815_v32  ;;  %3186 = vmatmul.bf16.gmra.mxu1 %v9815_v32  ;;  %v4035_v47 = vmax.f32 %v3715_v37, 0.0  ;;  %v4036_v10 = vmax.f32 %v3716_v8, 0.0 }
 0x2ec   : > { %v3035_v39 = vpop.f32.mrf.mxu2  ;;  %v3084_v9 = vpop.f32.mrf.mxu3 }
 0x2ed   : > { %v3330_v33 = vpack.c.bf16 %v3084_v9, %v3035_v39  ;;  %v8349_v40 = vpack.c.bf16 %v4035_v47, %v4027_v18  ;;  %v8351_v49 = vpack.c.bf16 %v4036_v10, %v4028_v44 }
 0x2ef   : > { %v3579_v13 = vunpack.c.l.bf16 %v3330_v33  ;;  %v3580_v14 = vunpack.c.h.bf16 %v3330_v33 }
 0x2f0   : > { %v8353_v22 = vpop.f32.mrf.mxu0  ;;  %v8355_v4 = vpop.f32.mrf.mxu1 }
 0x2f1   : > { %v3723_v38 = vadd.f32 %v8326_v56, %v3579_v13  ;;  %v3724_v57 = vadd.f32 %v8326_v56, %v3580_v14 }
 0x2f3   : > { %v4043_v23 = vmax.f32 %v3723_v38, 0.0  ;;  %v4044_v48 = vmax.f32 %v3724_v57, 0.0  ;;  %v3492_v57 = vperm.slane %v8131_v31, %v9800_v15  ;;  %v9818_v31 = vld [vmem:[#allocation18_spill] sm:$0xff] }
 0x2f4   : > { %v3037_v19 = vpop.f32.mrf.mxu2  ;;  %v3086_v30 = vpop.f32.mrf.mxu3 }
 0x2f5   : > { %v3334_v62 = vpack.c.bf16 %v3086_v30, %v3037_v19 }
 0x2f7   : > { %v3587_v16 = vunpack.c.l.bf16 %v3334_v62  ;;  %v3588_v20 = vunpack.c.h.bf16 %v3334_v62 }
 0x2f8   : > { %v8359_v21 = vpop.f32.mrf.mxu0  ;;  %v8361_v60 = vpop.f32.mrf.mxu1 }
 0x2f9   : > { %v3731_v61 = vadd.f32 %v8328_v52, %v3587_v16  ;;  %v3732_v41 = vadd.f32 %v8328_v52, %v3588_v20  ;;  %3235 = vmatmul.bf16.gmra.mxu2 %v6668_v6  ;;  %3284 = vmatmul.bf16.gmra.mxu3 %v6668_v6 }
 0x2fb   : > { %3142 = vmatmul.bf16.gmra.mxu0 %v8019_v54  ;;  %3191 = vmatmul.bf16.gmra.mxu1 %v8019_v54  ;;  %v4051_v46 = vmax.f32 %v3731_v61, 0.0  ;;  %v4052_v29 = vmax.f32 %v3732_v41, 0.0  ;;  %v3528_v61 = vperm.slane %v8139_v17, %v9800_v15 }
 0x2fc   : > { %v3040_v25 = vpop.f32.mrf.mxu2  ;;  %v3089_v37 = vpop.f32.mrf.mxu3 }
 0x2fd   : > { %v8370_v8 = vpack.c.bf16 %v3089_v37, %v3040_v25  ;;  %v8372_v2 = vpack.c.bf16 %v4051_v46, %v4043_v23  ;;  %v8374_v18 = vpack.c.bf16 %v4052_v29, %v4044_v48  ;;  %v3483_v29 = vperm.slane %v8179_v43, %v9800_v15 }
 0x2fe   : > { %v3510_v48 = vperm.slane %v9818_v31, %v9800_v15  ;;  %v8416_v17 = vunpack.c.l.bf16 %v3528_v61 }
 0x300   : > { %v2949_v32 = vpop.f32.mrf.mxu0  ;;  %v2998_v47 = vpop.f32.mrf.mxu1  ;;  %v8422_v0 = vunpack.c.l.bf16 %v3510_v48 }
 0x301   : > { %v3349_v43 = vpack.c.bf16 %v2998_v47, %v2949_v32 }
 0x304   : > { %v8376_v10 = vpop.f32.mrf.mxu2  ;;  %v8378_v44 = vpop.f32.mrf.mxu3 }
 0x308   : > { %v2952_v39 = vpop.f32.mrf.mxu0  ;;  %v3001_v9 = vpop.f32.mrf.mxu1 }
 0x309   : > { %3240 = vmatmul.bf16.gmra.mxu2 %v8019_v54  ;;  %3289 = vmatmul.bf16.gmra.mxu3 %v8019_v54  ;;  %v9816_v54 = vld [vmem:[#allocation35_spill] sm:$0xff] }
 0x30a   : > { %v3501_v20 = vperm.slane %v9816_v54, %v9800_v15  ;;  %v8414_v54 = vunpack.c.l.bf16 %v3492_v57 }
 0x30b   : > { %3147 = vmatmul.bf16.gmra.mxu0 %v8108_v42  ;;  %3196 = vmatmul.bf16.gmra.mxu1 %v8108_v42 }
 0x30c   : > { %v8384_v33 = vpop.f32.mrf.mxu2  ;;  %v8386_v13 = vpop.f32.mrf.mxu3  ;;  %v8412_v37 = vunpack.c.l.bf16 %v3501_v20 }
 0x310   : > { %v2954_v14 = vpop.f32.mrf.mxu0  ;;  %v3003_v19 = vpop.f32.mrf.mxu1 }
 0x311   : > { %v3357_v25 = vpack.c.bf16 %v3003_v19, %v2954_v14  ;;  %v3341_v14 = vpack.c.bf16 %v8355_v4, %v8353_v22  ;;  %v3618_v22 = vunpack.c.h.bf16 %v3349_v43 }
 0x313   : > { %v3633_v19 = vunpack.c.l.bf16 %v3357_v25  ;;  %v3634_v20 = vunpack.c.h.bf16 %v3357_v25  ;;  %v3602_v34 = vunpack.c.h.bf16 %v3341_v14 }
 0x314   : > { %v8388_v30 = vpop.f32.mrf.mxu2  ;;  %v8390_v62 = vpop.f32.mrf.mxu3 }
 0x318   : > { %v2957_v38 = vpop.f32.mrf.mxu0  ;;  %v3006_v16 = vpop.f32.mrf.mxu1 }
 0x319   : > { %3245 = vmatmul.bf16.gmra.mxu2 %v8108_v42  ;;  %3294 = vmatmul.bf16.gmra.mxu3 %v8108_v42  ;;  %v3361_v41 = vpack.c.bf16 %v3006_v16, %v2957_v38  ;;  %v9817_v42 = vld [vmem:[#allocation29_spill] sm:$0xff]  ;;  %v3353_v38 = vpack.c.bf16 %v3001_v9, %v2952_v39  ;;  %v3474_v39 = vperm.slane %v8229_v36, %v9800_v15 }
 0x31a   : > { %v3519_v46 = vperm.slane %v9817_v42, %v9800_v15  ;;  %v8420_v42 = vunpack.c.l.bf16 %v3483_v29  ;;  %v3345_v9 = vpack.c.bf16 %v8361_v60, %v8359_v21  ;;  %v3617_v29 = vunpack.c.l.bf16 %v3349_v43 }
 0x31b   : > { %3152 = vmatmul.bf16.gmra.mxu0 %v8157_v55  ;;  %3201 = vmatmul.bf16.gmra.mxu1 %v8157_v55  ;;  %v3641_v16 = vunpack.c.l.bf16 %v3361_v41  ;;  %v3642_v52 = vunpack.c.h.bf16 %v3361_v41  ;;  %v3625_v41 = vunpack.c.l.bf16 %v3353_v38  ;;  %v3465_v36 = vperm.slane %v8123_v26, %v9800_v15 }
 0x31c   : > { %v8402_v6 = vpop.f32.mrf.mxu2  ;;  %v8404_v23 = vpop.f32.mrf.mxu3  ;;  %v8418_v51 = vunpack.c.l.bf16 %v3519_v46  ;;  %v3626_v46 = vunpack.c.h.bf16 %v3353_v38  ;;  %v3601_v21 = vunpack.c.l.bf16 %v3341_v14  ;;  %v3778_v60 = vadd.f32 %v8422_v0, %v3634_v20 }
 0x31d   : > { %v3609_v48 = vunpack.c.l.bf16 %v3345_v9  ;;  %v3610_v25 = vunpack.c.h.bf16 %v3345_v9  ;;  %v3761_v26 = vadd.f32 %v8414_v54, %v3617_v29  ;;  %v3762_v15 = vadd.f32 %v8414_v54, %v3618_v22 }
 0x31e   : > { %v3785_v32 = vadd.f32 %v8418_v51, %v3641_v16  ;;  %v3769_v16 = vadd.f32 %v8412_v37, %v3625_v41  ;;  %v3770_v43 = vadd.f32 %v8412_v37, %v3626_v46  ;;  %v8446_v46 = vunpack.c.l.bf16 %v3474_v39 }
 0x31f   : > { %v3594_v14 = vunpack.c.h.bf16 %v8341_v50  ;;  %v3754_v29 = vadd.f32 %v8420_v42, %v3610_v25 }
 0x320   : > { %v2959_v56 = vpop.f32.mrf.mxu0  ;;  %v3008_v24 = vpop.f32.mrf.mxu1  ;;  %v4105_v45 = vmax.f32 %v3785_v32, 0.0  ;;  %v3593_v32 = vunpack.c.l.bf16 %v8341_v50  ;;  %v4089_v22 = vmax.f32 %v3769_v16, 0.0  ;;  %v3746_v39 = vadd.f32 %v8446_v46, %v3602_v34 }
 0x321   : > { %v3365_v63 = vpack.c.bf16 %v3008_v24, %v2959_v56  ;;  %v3786_v24 = vadd.f32 %v8418_v51, %v3642_v52  ;;  %v4082_v50 = vmax.f32 %v3762_v15, 0.0  ;;  %v3354_v15 = vpack.c.bf16 %v8404_v23, %v8402_v6 }
 0x323   : > { %v3649_v57 = vunpack.c.l.bf16 %v3365_v63  ;;  %v3650_v61 = vunpack.c.h.bf16 %v3365_v63  ;;  %v3777_v63 = vadd.f32 %v8422_v0, %v3633_v19  ;;  %v3627_v6 = vunpack.c.l.bf16 %v3354_v15 }
 0x324   : > { %v3052_v56 = vpop.f32.mrf.mxu2  ;;  %v3101_v47 = vpop.f32.mrf.mxu3 }
 0x325   : > { %v3793_v4 = vadd.f32 %v8416_v17, %v3649_v57  ;;  %v3794_v31 = vadd.f32 %v8416_v17, %v3650_v61  ;;  %v4106_v57 = vmax.f32 %v3786_v24, 0.0  ;;  %v4097_v41 = vmax.f32 %v3777_v63, 0.0 }
 0x326   : > { %v3753_v24 = vadd.f32 %v8420_v42, %v3609_v48 }
 0x327   : > { %v4113_v38 = vmax.f32 %v3793_v4, 0.0  ;;  %v4114_v52 = vmax.f32 %v3794_v31, 0.0  ;;  %v4098_v4 = vmax.f32 %v3778_v60, 0.0  ;;  %v4090_v31 = vmax.f32 %v3770_v43, 0.0 }
 0x328   : > { %v3118_v7 = vpop.f32.mrf.mxu0  ;;  %v3167_v61 = vpop.f32.mrf.mxu1  ;;  %v4169_v63 = vpack.c.bf16 %v4097_v41, %v4089_v22  ;;  %v4073_v16 = vmax.f32 %v3753_v24, 0.0  ;;  %v4074_v43 = vmax.f32 %v3754_v29, 0.0 }
 0x329   : > { %3250 = vmatmul.bf16.gmra.mxu2 %v8157_v55  ;;  %3299 = vmatmul.bf16.gmra.mxu3 %v8157_v55  ;;  %v8444_v19 = vpack.c.bf16 %v3167_v61, %v3118_v7  ;;  %v4177_v20 = vpack.c.bf16 %v4113_v38, %v4105_v45  ;;  %v4178_v9 = vpack.c.bf16 %v4114_v52, %v4106_v57  ;;  %v8452_v45 = vunpack.c.l.bf16 %v3465_v36 }
 0x32a   : > { %v3745_v7 = vadd.f32 %v8446_v46, %v3601_v21  ;;  %v4170_v60 = vpack.c.bf16 %v4098_v4, %v4090_v31  ;;  %v4081_v38 = vmax.f32 %v3761_v26, 0.0  ;;  %v3358_v21 = vpack.c.bf16 %v3101_v47, %v3052_v56 }
 0x32b   : > { %4254 = vmatpush.bf16.msra.mxu0 %v4177_v20  ;;  %4307 = vmatpush.bf16.msra.mxu1 %v4178_v9  ;;  %v3737_v48 = vadd.f32 %v8452_v45, %v3593_v32  ;;  %v3738_v25 = vadd.f32 %v8452_v45, %v3594_v14  ;;  %v4162_v34 = vpack.c.bf16 %v4082_v50, %v4074_v43  ;;  %v4066_v9 = vmax.f32 %v3746_v39, 0.0 }
 0x32c   : > { %v3055_v12 = vpop.f32.mrf.mxu2  ;;  %v3104_v55 = vpop.f32.mrf.mxu3  ;;  %v4161_v61 = vpack.c.bf16 %v4081_v38, %v4073_v16  ;;  %v4065_v20 = vmax.f32 %v3745_v7, 0.0  ;;  %v3350_v4 = vpack.c.bf16 %v8390_v62, %v8388_v30  ;;  %v3635_v29 = vunpack.c.l.bf16 %v3358_v21 }
 0x32d   : > { %v3362_v52 = vpack.c.bf16 %v3104_v55, %v3055_v12  ;;  %v4057_v26 = vmax.f32 %v3737_v48, 0.0  ;;  %v4058_v41 = vmax.f32 %v3738_v25, 0.0  ;;  %v3346_v47 = vpack.c.bf16 %v8386_v13, %v8384_v33 }
 0x32e   : > { %v3636_v22 = vunpack.c.h.bf16 %v3358_v21  ;;  %v3342_v30 = vpack.c.bf16 %v8378_v44, %v8376_v10  ;;  %v3619_v62 = vunpack.c.l.bf16 %v3350_v4  ;;  %v3779_v33 = vadd.f32 %v8422_v0, %v3635_v29 }
 0x32f   : > { %4255 = vmatpush.bf16.msra.mxu0 %v4169_v63  ;;  %4308 = vmatpush.bf16.msra.mxu1 %v4170_v60  ;;  %v3643_v12 = vunpack.c.l.bf16 %v3362_v52  ;;  %v3644_v32 = vunpack.c.h.bf16 %v3362_v52  ;;  %v4153_v31 = vpack.c.bf16 %v4065_v20, %v4057_v26  ;;  %v4154_v55 = vpack.c.bf16 %v4066_v9, %v4058_v41 }
 0x330   : > { %v8458_v57 = vpop.f32.mrf.mxu0  ;;  %v8460_v36 = vpop.f32.mrf.mxu1  ;;  %v3628_v63 = vunpack.c.h.bf16 %v3354_v15  ;;  %v3611_v25 = vunpack.c.l.bf16 %v3346_v47  ;;  %v3620_v16 = vunpack.c.h.bf16 %v3350_v4  ;;  %v3780_v10 = vadd.f32 %v8422_v0, %v3636_v22 }
 0x331   : > { %v3787_v23 = vadd.f32 %v8418_v51, %v3643_v12  ;;  %v3788_v60 = vadd.f32 %v8418_v51, %v3644_v32  ;;  %v3771_v44 = vadd.f32 %v8412_v37, %v3627_v6  ;;  %v3612_v20 = vunpack.c.h.bf16 %v3346_v47 }
 0x332   : > { %v3772_v9 = vadd.f32 %v8412_v37, %v3628_v63  ;;  %v3763_v41 = vadd.f32 %v8414_v54, %v3619_v62  ;;  %v3764_v29 = vadd.f32 %v8414_v54, %v3620_v16  ;;  %v4100_v47 = vmax.f32 %v3780_v10, 0.0 }
 0x333   : > { %4256 = vmatpush.bf16.msra.mxu0 %v4161_v61  ;;  %4309 = vmatpush.bf16.msra.mxu1 %v4162_v34  ;;  %v4107_v43 = vmax.f32 %v3787_v23, 0.0  ;;  %v3603_v34 = vunpack.c.l.bf16 %v3342_v30  ;;  %v4108_v15 = vmax.f32 %v3788_v60, 0.0  ;;  %v3595_v22 = vunpack.c.l.bf16 %v8370_v8 }
 0x334   : > { %v3057_v14 = vpop.f32.mrf.mxu2  ;;  %v3106_v24 = vpop.f32.mrf.mxu3  ;;  %v4092_v6 = vmax.f32 %v3772_v9, 0.0  ;;  %v4083_v62 = vmax.f32 %v3763_v41, 0.0 }
 0x335   : > { %v3366_v56 = vpack.c.bf16 %v3106_v24, %v3057_v14  ;;  %v4099_v14 = vmax.f32 %v3779_v33, 0.0  ;;  %v3604_v24 = vunpack.c.h.bf16 %v3342_v30 }
 0x336   : > { %v4172_v60 = vpack.c.bf16 %v4100_v47, %v4092_v6 }
 0x337   : > { %v3651_v7 = vunpack.c.l.bf16 %v3366_v56  ;;  %v3652_v39 = vunpack.c.h.bf16 %v3366_v56  ;;  %4257 = vmatpush.bf16.msra.mxu0 %v4153_v31  ;;  %4310 = vmatpush.bf16.msra.mxu1 %v4154_v55  ;;  %v3755_v31 = vadd.f32 %v8420_v42, %v3611_v25  ;;  %v4091_v55 = vmax.f32 %v3771_v44, 0.0 }
 0x338   : > { %v3123_v38 = vpop.f32.mrf.mxu0  ;;  %v3172_v50 = vpop.f32.mrf.mxu1  ;;  %v3748_v63 = vadd.f32 %v8446_v46, %v3604_v24 }
 0x339   : > { %v3795_v13 = vadd.f32 %v8416_v17, %v3651_v7  ;;  %v3796_v52 = vadd.f32 %v8416_v17, %v3652_v39  ;;  %v8475_v48 = vpack.c.bf16 %v3172_v50, %v3123_v38  ;;  %v3747_v39 = vadd.f32 %v8446_v46, %v3603_v34 }
 0x33a   : > { %v4171_v30 = vpack.c.bf16 %v4099_v14, %v4091_v55  ;;  %v3739_v38 = vadd.f32 %v8452_v45, %v3595_v22  ;;  %v4075_v50 = vmax.f32 %v3755_v31, 0.0  ;;  %v4068_v10 = vmax.f32 %v3748_v63, 0.0  ;;  %v8556_v31 = vpop.permute.xlu1 %4886  ;;  %v8561_v55 = vld [vmem:[%s9614_s8 + $0x10] sm:$0xff] }
 0x33b   : > { %v4115_v21 = vmax.f32 %v3795_v13, 0.0  ;;  %v4116_v61 = vmax.f32 %v3796_v52, 0.0  ;;  %4258 = vmatpush.bf16.msra.mxu0 %v8343_v53  ;;  %4311 = vmatpush.bf16.msra.mxu1 %v8345_v27  ;;  %v3596_v53 = vunpack.c.h.bf16 %v8370_v8  ;;  %v3756_v27 = vadd.f32 %v8420_v42, %v3612_v20  ;;  %9830 = vst [vmem:[#allocation22_spill] sm:$0xff] %v8556_v31 }
 0x33c   : > { %v3216_v12 = vpop.f32.mrf.mxu2  ;;  %v3265_v26 = vpop.f32.mrf.mxu3  ;;  %v4084_v8 = vmax.f32 %v3764_v29, 0.0  ;;  %v4067_v25 = vmax.f32 %v3747_v39, 0.0  ;;  %v4059_v44 = vmax.f32 %v3739_v38, 0.0  ;;  %9831 = vst [vmem:[#allocation8_spill] sm:$0xff] %v8561_v55 }
 0x33d   : > { %v8483_v4 = vpack.c.bf16 %v3265_v26, %v3216_v12  ;;  %v4179_v32 = vpack.c.bf16 %v4115_v21, %v4107_v43  ;;  %v4180_v56 = vpack.c.bf16 %v4116_v61, %v4108_v15  ;;  %v4076_v33 = vmax.f32 %v3756_v27, 0.0  ;;  %v8509_v43 = vld [vmem:[%s9614_s8] sm:$0xff] }
 0x33e   : > { %9820 = vst [vmem:[#allocation25_spill] sm:$0xff] %v8509_v43 }
 0x33f   : > { %9819 = vst [vmem:[#allocation26_spill] sm:$0xff] %v8483_v4  ;;  %4360 = vmatpush.bf16.msra.mxu2 %v4179_v32  ;;  %4413 = vmatpush.bf16.msra.mxu3 %v4180_v56  ;;  %v4164_v16 = vpack.c.bf16 %v4084_v8, %v4076_v33 }
 0x340   : > { %4259 = vmatpush.bf16.msra.mxu0 %v8312_v5  ;;  %v8491_v23 = vpop.f32.mrf.mxu0  ;;  %v8493_v7 = vpop.f32.mrf.mxu1  ;;  %4312 = vmatpush.bf16.msra.mxu1 %v8314_v59  ;;  %v3740_v5 = vadd.f32 %v8452_v45, %v3596_v53  ;;  %v4163_v59 = vpack.c.bf16 %v4083_v62, %v4075_v50 }
 0x342   : > { %v4060_v21 = vmax.f32 %v3740_v5, 0.0  ;;  %v8575_v8 = vpop.permute.xlu1 %4877  ;;  %v6567_v5 = vld [vmem:[%s9614_s8 + $0x18] sm:$0xff] }
 0x343   : > { %4361 = vmatpush.bf16.msra.mxu2 %v4171_v30  ;;  %4414 = vmatpush.bf16.msra.mxu3 %v4172_v60  ;;  %9833 = vst [vmem:[#allocation17_spill] sm:$0xff] %v8575_v8 }
 0x344   : > { %v8500_v13 = vpop.f32.mrf.mxu2  ;;  %v8502_v52 = vpop.f32.mrf.mxu3  ;;  %4260 = vmatpush.bf16.msra.mxu0 %v8284_v35  ;;  %4313 = vmatpush.bf16.msra.mxu1 %v8286_v3  ;;  %v4155_v3 = vpack.c.bf16 %v4067_v25, %v4059_v44  ;;  %v4156_v20 = vpack.c.bf16 %v4068_v10, %v4060_v21 }
 0x347   : > { %4362 = vmatpush.bf16.msra.mxu2 %v4163_v59  ;;  %4415 = vmatpush.bf16.msra.mxu3 %v4164_v16 }
 0x348   : > { %4261 = vmatpush.bf16.msra.mxu0 %v8261_v28  ;;  %v3128_v61 = vpop.f32.mrf.mxu0  ;;  %v3177_v34 = vpop.f32.mrf.mxu1  ;;  %4314 = vmatpush.bf16.msra.mxu1 %v8263_v1 }
 0x349   : > { %v8513_v35 = vpack.c.bf16 %v3177_v34, %v3128_v61 }
 0x34a   : > { %v8588_v25 = vpop.permute.xlu1 %4832 }
 0x34b   : > { %4363 = vmatpush.bf16.msra.mxu2 %v4155_v3  ;;  %4262 = vmatmul.bf16.vlgmr.msra.gmra.mxu0 %v8509_v43  ;;  %9834 = vst [vmem:[#allocation12_spill] sm:$0xff] %v8588_v25 }
 0x34c   : > { %4416 = vmatpush.bf16.msra.mxu3 %v4156_v20  ;;  %v3221_v9 = vpop.f32.mrf.mxu2  ;;  %v3270_v15 = vpop.f32.mrf.mxu3  ;;  %4315 = vmatmul.bf16.vlgmr.msra.gmra.mxu1 %v8509_v43 }
 0x34d   : > { %v8517_v12 = vpack.c.bf16 %v3270_v15, %v3221_v9  ;;  %v6568_v9 = vld [vmem:[%s9614_s8 + $0x20] sm:$0xff] }
 0x34f   : > { %9821 = vst [vmem:[#allocation27_spill] sm:$0xff] %v8517_v12  ;;  %4364 = vmatpush.bf16.msra.mxu2 %v8372_v2  ;;  %v8535_v2 = vld [vmem:[%s9614_s8 + $0x8] sm:$0xff] }
 0x350   : > { %4417 = vmatpush.bf16.msra.mxu3 %v8374_v18  ;;  %v8521_v28 = vpop.f32.mrf.mxu0  ;;  %v8523_v1 = vpop.f32.mrf.mxu1  ;;  %9824 = vst [vmem:[#allocation11_spill] sm:$0xff] %v8535_v2 }
 0x352   : > { %v8602_v20 = vpop.permute.xlu1 %4823 }
 0x353   : > { %4365 = vmatpush.bf16.msra.mxu2 %v8349_v40  ;;  %v9825_v40 = vld [vmem:[#allocation32_spill] sm:$0xff]  ;;  %9835 = vst [vmem:[#allocation13_spill] sm:$0xff] %v8602_v20 }
 0x354   : > { %4418 = vmatpush.bf16.msra.mxu3 %v8351_v49  ;;  %v8527_v26 = vpop.f32.mrf.mxu2  ;;  %v8529_v41 = vpop.f32.mrf.mxu3  ;;  %v9826_v49 = vld [vmem:[#allocation19_spill] sm:$0xff] }
 0x355   : > { %9822 = vst [vmem:[#allocation15_spill] sm:$0xff] %v8527_v26 }
 0x356   : > { %9823 = vst [vmem:[#allocation33_spill] sm:$0xff] %v8529_v41 }
 0x357   : > { %4366 = vmatpush.bf16.msra.mxu2 %v8318_v58 }
 0x358   : > { %4419 = vmatpush.bf16.msra.mxu3 %v8322_v11  ;;  %v3133_v18 = vpop.f32.mrf.mxu0  ;;  %v3182_v32 = vpop.f32.mrf.mxu1 }
 0x359   : > { %v8538_v14 = vpack.c.bf16 %v3182_v32, %v3133_v18 }
 0x35b   : > { %4367 = vmatpush.bf16.msra.mxu2 %v9825_v40  ;;  %4267 = vmatmul.bf16.gmra.mxu0 %v8535_v2 }
 0x35c   : > { %4420 = vmatpush.bf16.msra.mxu3 %v9826_v49  ;;  %v3226_v24 = vpop.f32.mrf.mxu2  ;;  %v3275_v29 = vpop.f32.mrf.mxu3  ;;  %4320 = vmatmul.bf16.gmra.mxu1 %v8535_v2  ;;  %v3311_v49 = vpack.c.bf16 %v8460_v36, %v8458_v57  ;;  %v3534_v57 = vunpack.c.h.bf16 %v8444_v19  ;;  %v9837_v36 = vld [vmem:[#allocation28_spill] sm:$0xff] }
 0x35d   : > { %v8544_v58 = vpack.c.bf16 %v3275_v29, %v3226_v24  ;;  %v8613_v24 = vpop.permute.xlu1 %4778  ;;  %v3319_v29 = vpack.c.bf16 %v8493_v7, %v8491_v23  ;;  %v3550_v23 = vunpack.c.h.bf16 %v8475_v48  ;;  %v9838_v7 = vld [vmem:[#allocation16_spill] sm:$0xff] }
 0x35e   : > { %4368 = vmatmul.bf16.vlgmr.msra.gmra.mxu2 %v8509_v43  ;;  %9836 = vst [vmem:[#allocation35_spill] sm:$0xff] %v8613_v24  ;;  %v3678_v12 = vadd.f32 %v9838_v7, %v3534_v57  ;;  %v8648_v57 = vpack.c.bf16 %v8523_v1, %v8521_v28 }
 0x35f   : > { %9827 = vst [vmem:[#allocation21_spill] sm:$0xff] %v8544_v58  ;;  %4421 = vmatmul.bf16.vlgmr.msra.gmra.mxu3 %v8509_v43  ;;  %v3558_v8 = vunpack.c.h.bf16 %v3319_v29 }
 0x360   : > { %v8548_v11 = vpop.f32.mrf.mxu0  ;;  %v8550_v56 = vpop.f32.mrf.mxu1 }
 0x364   : > { %v8552_v47 = vpop.f32.mrf.mxu2  ;;  %v8554_v22 = vpop.f32.mrf.mxu3 }
 0x365   : > { %9828 = vst [vmem:[#allocation10_spill] sm:$0xff] %v8552_v47 }
 0x366   : > { %9829 = vst [vmem:[#allocation9_spill] sm:$0xff] %v8554_v22  ;;  %v8664_v22 = vpack.c.bf16 %v8502_v52, %v8500_v13 }
 0x368   : > { %v3138_v53 = vpop.f32.mrf.mxu0  ;;  %v3187_v27 = vpop.f32.mrf.mxu1  ;;  %9844 = vst [vmem:[#allocation18_spill] sm:$0xff] %v8664_v22 }
 0x369   : > { %v8563_v6 = vpack.c.bf16 %v3187_v27, %v3138_v53 }
 0x36b   : > { %4272 = vmatmul.bf16.gmra.mxu0 %v8561_v55 }
 0x36c   : > { %v3231_v39 = vpop.f32.mrf.mxu2  ;;  %v3280_v30 = vpop.f32.mrf.mxu3  ;;  %4325 = vmatmul.bf16.gmra.mxu1 %v8561_v55 }
 0x36d   : > { %v8567_v62 = vpack.c.bf16 %v3280_v30, %v3231_v39  ;;  %v3541_v39 = vunpack.c.l.bf16 %v3311_v49  ;;  %v3533_v30 = vunpack.c.l.bf16 %v8444_v19  ;;  %v3565_v19 = vunpack.c.l.bf16 %v8513_v35 }
 0x36e   : > { %4373 = vmatmul.bf16.gmra.mxu2 %v8535_v2 }
 0x36f   : > { %9832 = vst [vmem:[#allocation20_spill] sm:$0xff] %v8567_v62  ;;  %4426 = vmatmul.bf16.gmra.mxu3 %v8535_v2  ;;  %v3685_v20 = vadd.f32 %v9837_v36, %v3541_v39 }
 0x370   : > { %v8571_v63 = vpop.f32.mrf.mxu0  ;;  %v8573_v60 = vpop.f32.mrf.mxu1 }
 0x371   : > { %v4005_v41 = vmax.f32 %v3685_v20, 0.0 }
 0x374   : > { %v8577_v38 = vpop.f32.mrf.mxu2  ;;  %v8579_v50 = vpop.f32.mrf.mxu3 }
 0x378   : > { %v8584_v33 = vpop.f32.mrf.mxu0  ;;  %v8586_v59 = vpop.f32.mrf.mxu1 }
 0x37b   : > { %4277 = vmatmul.bf16.gmra.mxu0 %v6567_v5 }
 0x37c   : > { %v3236_v16 = vpop.f32.mrf.mxu2  ;;  %v3285_v10 = vpop.f32.mrf.mxu3  ;;  %4330 = vmatmul.bf16.gmra.mxu1 %v6567_v5 }
 0x37d   : > { %v8590_v44 = vpack.c.bf16 %v3285_v10, %v3236_v16  ;;  %v3542_v16 = vunpack.c.h.bf16 %v3311_v49  ;;  %v3557_v10 = vunpack.c.l.bf16 %v3319_v29  ;;  %v8631_v49 = vld [vmem:[%s9614_s8 + $0x28] sm:$0xff]  ;;  %v9839_v29 = vld [vmem:[#allocation30_spill] sm:$0xff] }
 0x37e   : > { %4378 = vmatmul.bf16.gmra.mxu2 %v8561_v55  ;;  %v3702_v43 = vadd.f32 %v9839_v29, %v3558_v8 }
 0x37f   : > { %4431 = vmatmul.bf16.gmra.mxu3 %v8561_v55  ;;  %v3677_v55 = vadd.f32 %v9838_v7, %v3533_v30  ;;  %v3686_v2 = vadd.f32 %v9837_v36, %v3542_v16  ;;  %v3701_v24 = vadd.f32 %v9839_v29, %v3557_v10  ;;  %v8638_v30 = vpop.permute.xlu1 %4769  ;;  %v9841_v16 = vld [vmem:[#allocation31_spill] sm:$0xff]  ;;  %v9842_v10 = vld [vmem:[#allocation34_spill] sm:$0xff] }
 0x380   : > { %v8594_v21 = vpop.f32.mrf.mxu0  ;;  %v8596_v61 = vpop.f32.mrf.mxu1  ;;  %9840 = vst [vmem:[#allocation29_spill] sm:$0xff] %v8638_v30  ;;  %v3694_v58 = vadd.f32 %v9841_v16, %v3550_v23  ;;  %v8644_v29 = vadd.f32 %v9842_v10, %v3565_v19  ;;  %v4022_v20 = vmax.f32 %v3702_v43, 0.0  ;;  %v3998_v23 = vmax.f32 %v3678_v12, 0.0 }
 0x381   : > { %v3997_v26 = vmax.f32 %v3677_v55, 0.0  ;;  %v4006_v8 = vmax.f32 %v3686_v2, 0.0  ;;  %v3351_v52 = vpack.c.bf16 %v8596_v61, %v8594_v21  ;;  %v3335_v21 = vpack.c.bf16 %v8550_v56, %v8548_v11 }
 0x382   : > { %v3343_v61 = vpack.c.bf16 %v8573_v60, %v8571_v63  ;;  %v8699_v60 = vld [vmem:[%s9614_s8 + $0x30] sm:$0xff]  ;;  %v3598_v55 = vunpack.c.h.bf16 %v8563_v6 }
 0x383   : > { %v8660_v1 = vpack.c.bf16 %v4005_v41, %v3997_v26  ;;  %v8666_v47 = vpack.c.bf16 %v4006_v8, %v3998_v23  ;;  %v8674_v26 = vpop.permute.xlu0 %4868  ;;  %v3589_v22 = vunpack.c.l.bf16 %v3335_v21 }
 0x384   : > { %v8598_v34 = vpop.f32.mrf.mxu2  ;;  %v8600_v3 = vpop.f32.mrf.mxu3  ;;  %9845 = vst [vmem:[#allocation32_spill] sm:$0xff] %v8674_v26 }
 0x388   : > { %v3148_v15 = vpop.f32.mrf.mxu0  ;;  %v3197_v18 = vpop.f32.mrf.mxu1 }
 0x389   : > { %v3355_v28 = vpack.c.bf16 %v3197_v18, %v3148_v15  ;;  %v3347_v18 = vpack.c.bf16 %v8586_v59, %v8584_v33  ;;  %v3622_v59 = vunpack.c.h.bf16 %v3351_v52 }
 0x38b   : > { %4282 = vmatmul.bf16.gmra.mxu0 %v6568_v9  ;;  %v8706_v30 = vpop.permute.xlu0 %4859 }
 0x38c   : > { %v8607_v32 = vpop.f32.mrf.mxu2  ;;  %v8609_v40 = vpop.f32.mrf.mxu3  ;;  %4335 = vmatmul.bf16.gmra.mxu1 %v6568_v9 }
 0x38e   : > { %4383 = vmatmul.bf16.gmra.mxu2 %v6567_v5 }
 0x38f   : > { %4436 = vmatmul.bf16.gmra.mxu3 %v6567_v5  ;;  %v3549_v5 = vunpack.c.l.bf16 %v8475_v48  ;;  %v3566_v48 = vunpack.c.h.bf16 %v8513_v35 }
 0x390   : > { %v3150_v53 = vpop.f32.mrf.mxu0  ;;  %v3199_v27 = vpop.f32.mrf.mxu1 }
 0x391   : > { %v3693_v36 = vadd.f32 %v9841_v16, %v3549_v5  ;;  %v4021_v5 = vmax.f32 %v3701_v24, 0.0  ;;  %v8658_v2 = vadd.f32 %v9842_v10, %v3566_v48  ;;  %v3359_v19 = vpack.c.bf16 %v3199_v27, %v3150_v53 }
 0x392   : > { %v4014_v16 = vmax.f32 %v3694_v58, 0.0  ;;  %v3573_v48 = vunpack.c.l.bf16 %v8648_v57 }
 0x393   : > { %v3638_v41 = vunpack.c.h.bf16 %v3359_v19  ;;  %v3637_v8 = vunpack.c.l.bf16 %v3359_v19 }
 0x394   : > { %v8618_v31 = vpop.f32.mrf.mxu2  ;;  %v8620_v25 = vpop.f32.mrf.mxu3  ;;  %v8672_v15 = vpack.c.bf16 %v4022_v20, %v4014_v16 }
 0x395   : > { %v3782_v19 = vadd.f32 %v8422_v0, %v3638_v41  ;;  %v3781_v13 = vadd.f32 %v8422_v0, %v3637_v8  ;;  %v3606_v41 = vunpack.c.h.bf16 %v3343_v61 }
 0x397   : > { %v4102_v8 = vmax.f32 %v3782_v19, 0.0 }
 0x398   : > { %v3153_v39 = vpop.f32.mrf.mxu0  ;;  %v3202_v4 = vpop.f32.mrf.mxu1 }
 0x399   : > { %v3363_v62 = vpack.c.bf16 %v3202_v4, %v3153_v39  ;;  %v4013_v39 = vmax.f32 %v3693_v36, 0.0  ;;  %v3630_v36 = vunpack.c.h.bf16 %v3355_v28 }
 0x39b   : > { %4287 = vmatmul.bf16.gmra.mxu0 %v8631_v49  ;;  %v3645_v24 = vunpack.c.l.bf16 %v3363_v62  ;;  %v3646_v43 = vunpack.c.h.bf16 %v3363_v62  ;;  %v8670_v58 = vpack.c.bf16 %v4021_v5, %v4013_v39  ;;  %v9846_v39 = vld [vmem:[#allocation14_spill] sm:$0xff] }
 0x39c   : > { %v8650_v35 = vpop.f32.mrf.mxu2  ;;  %v8652_v7 = vpop.f32.mrf.mxu3  ;;  %4340 = vmatmul.bf16.gmra.mxu1 %v8631_v49  ;;  %v8685_v4 = vadd.f32 %v9846_v39, %v3573_v48  ;;  %v3774_v48 = vadd.f32 %v8412_v37, %v3630_v36 }
 0x39d   : > { %v3789_v5 = vadd.f32 %v8418_v51, %v3645_v24  ;;  %v3790_v16 = vadd.f32 %v8418_v51, %v3646_v43 }
 0x39e   : > { %4388 = vmatmul.bf16.gmra.mxu2 %v6568_v9  ;;  %v4094_v10 = vmax.f32 %v3774_v48, 0.0 }
 0x39f   : > { %4441 = vmatmul.bf16.gmra.mxu3 %v6568_v9  ;;  %v3574_v9 = vunpack.c.h.bf16 %v8648_v57  ;;  %v3629_v57 = vunpack.c.l.bf16 %v3355_v28  ;;  %v4109_v11 = vmax.f32 %v3789_v5, 0.0  ;;  %v4110_v56 = vmax.f32 %v3790_v16, 0.0 }
 0x3a0   : > { %v3155_v53 = vpop.f32.mrf.mxu0  ;;  %v3204_v27 = vpop.f32.mrf.mxu1  ;;  %v3581_v28 = vunpack.c.l.bf16 %v8538_v14  ;;  %v3582_v5 = vunpack.c.h.bf16 %v8538_v14  ;;  %v3605_v16 = vunpack.c.l.bf16 %v3343_v61 }
 0x3a1   : > { %v3367_v62 = vpack.c.bf16 %v3204_v27, %v3155_v53  ;;  %v3614_v27 = vunpack.c.h.bf16 %v3347_v18 }
 0x3a3   : > { %v3653_v20 = vunpack.c.l.bf16 %v3367_v62  ;;  %v3654_v23 = vunpack.c.h.bf16 %v3367_v62  ;;  %v3621_v62 = vunpack.c.l.bf16 %v3351_v52  ;;  %v3766_v52 = vadd.f32 %v8414_v54, %v3622_v59 }
 0x3a4   : > { %v3248_v53 = vpop.f32.mrf.mxu2  ;;  %v3297_v33 = vpop.f32.mrf.mxu3 }
 0x3a5   : > { %v3797_v24 = vadd.f32 %v8416_v17, %v3653_v20  ;;  %v3798_v43 = vadd.f32 %v8416_v17, %v3654_v23  ;;  %v3613_v20 = vunpack.c.l.bf16 %v3347_v18  ;;  %v3773_v23 = vadd.f32 %v8412_v37, %v3629_v57 }
 0x3a6   : > { %v3758_v18 = vadd.f32 %v8420_v42, %v3614_v27  ;;  %v3597_v57 = vunpack.c.l.bf16 %v8563_v6  ;;  %v3750_v27 = vadd.f32 %v8446_v46, %v3606_v41  ;;  %v4086_v48 = vmax.f32 %v3766_v52, 0.0 }
 0x3a7   : > { %v4117_v12 = vmax.f32 %v3797_v24, 0.0  ;;  %v4118_v63 = vmax.f32 %v3798_v43, 0.0  ;;  %v3765_v24 = vadd.f32 %v8414_v54, %v3621_v62  ;;  %v4101_v43 = vmax.f32 %v3781_v13, 0.0 }
 0x3a8   : > { %v3757_v14 = vadd.f32 %v8420_v42, %v3613_v20  ;;  %v4093_v61 = vmax.f32 %v3773_v23, 0.0  ;;  %v8715_v13 = vadd.f32 %v9846_v39, %v3574_v9  ;;  %v4174_v62 = vpack.c.bf16 %v4102_v8, %v4094_v10  ;;  %v9848_v9 = vld [vmem:[#allocation24_spill] sm:$0xff] }
 0x3a9   : > { %v4181_v36 = vpack.c.bf16 %v4117_v12, %v4109_v11  ;;  %v4182_v26 = vpack.c.bf16 %v4118_v63, %v4110_v56  ;;  %v3590_v12 = vunpack.c.h.bf16 %v3335_v21  ;;  %v9847_v11 = vld [vmem:[#allocation23_spill] sm:$0xff]  ;;  %v3749_v21 = vadd.f32 %v8446_v46, %v3605_v16 }
 0x3aa   : > { %v4173_v6 = vpack.c.bf16 %v4101_v43, %v4093_v61  ;;  %v4085_v56 = vmax.f32 %v3765_v24, 0.0  ;;  %v3726_v63 = vadd.f32 %v9847_v11, %v3582_v5  ;;  %v3742_v20 = vadd.f32 %v8452_v45, %v3598_v55  ;;  %v8731_v61 = vpop.permute.xlu2 %4895 }
 0x3ab   : > { %4292 = vmatmul.bf16.gmra.mxu0 %v8699_v60  ;;  %4519 = vmatpush.bf16.msrb.mxu1 %v4182_v26  ;;  %v3725_v26 = vadd.f32 %v9847_v11, %v3581_v28  ;;  %v4078_v23 = vmax.f32 %v3758_v18, 0.0  ;;  %v3733_v10 = vadd.f32 %v9848_v9, %v3589_v22  ;;  %v3734_v41 = vadd.f32 %v9848_v9, %v3590_v12 }
 0x3ac   : > { %v3251_v59 = vpop.f32.mrf.mxu2  ;;  %v3300_v19 = vpop.f32.mrf.mxu3  ;;  %4345 = vmatmul.bf16.gmra.mxu1 %v8699_v60  ;;  %4466 = vmatpush.bf16.msrb.mxu0 %v4181_v36  ;;  %v3741_v28 = vadd.f32 %v8452_v45, %v3597_v57  ;;  %v4077_v52 = vmax.f32 %v3757_v14, 0.0  ;;  %v3360_v8 = vpack.c.bf16 %v3297_v33, %v3248_v53  ;;  %v4070_v24 = vmax.f32 %v3750_v27, 0.0 }
 0x3ad   : > { %v3364_v36 = vpack.c.bf16 %v3300_v19, %v3251_v59  ;;  %v4166_v16 = vpack.c.bf16 %v4086_v48, %v4078_v23  ;;  %v4037_v5 = vmax.f32 %v8685_v4, 0.0  ;;  %v3356_v55 = vpack.c.bf16 %v8652_v7, %v8650_v35  ;;  %v8733_v48 = vpop.permute.xlu0 %4814 }
 0x3ae   : > { %4393 = vmatmul.bf16.gmra.mxu2 %v8631_v49  ;;  %v4165_v43 = vpack.c.bf16 %v4085_v56, %v4077_v52  ;;  %v4069_v18 = vmax.f32 %v3749_v21, 0.0  ;;  %v4045_v22 = vmax.f32 %v3725_v26, 0.0  ;;  %v4062_v12 = vmax.f32 %v3742_v20, 0.0 }
 0x3af   : > { %4446 = vmatmul.bf16.gmra.mxu3 %v8631_v49  ;;  %4520 = vmatpush.bf16.msrb.mxu1 %v4174_v62  ;;  %v4038_v49 = vmax.f32 %v8715_v13, 0.0  ;;  %v3647_v59 = vunpack.c.l.bf16 %v3364_v36  ;;  %v3648_v57 = vunpack.c.h.bf16 %v3364_v36  ;;  %v4046_v14 = vmax.f32 %v3726_v63, 0.0 }
 0x3b0   : > { %4467 = vmatpush.bf16.msrb.mxu0 %v4173_v6  ;;  %v4061_v53 = vmax.f32 %v3741_v28, 0.0  ;;  %v4053_v27 = vmax.f32 %v3733_v10, 0.0  ;;  %v4054_v62 = vmax.f32 %v3734_v41, 0.0  ;;  %v3352_v7 = vpack.c.bf16 %v8620_v25, %v8618_v31  ;;  %v8744_v31 = vld [vmem:[%s9614_s8 + $0x38] sm:$0xff] }
 0x3b1   : > { %v3639_v35 = vunpack.c.l.bf16 %v3360_v8  ;;  %v4158_v6 = vpack.c.bf16 %v4070_v24, %v4062_v12  ;;  %v3348_v26 = vpack.c.bf16 %v8609_v40, %v8607_v32  ;;  %v3631_v56 = vunpack.c.l.bf16 %v3356_v55 }
 0x3b2   : > { %v3640_v20 = vunpack.c.h.bf16 %v3360_v8  ;;  %v4157_v63 = vpack.c.bf16 %v4069_v18, %v4061_v53  ;;  %v3791_v23 = vadd.f32 %v8418_v51, %v3647_v59  ;;  %v3792_v36 = vadd.f32 %v8418_v51, %v3648_v57 }
 0x3b3   : > { %4521 = vmatpush.bf16.msrb.mxu1 %v4166_v16  ;;  %v3344_v25 = vpack.c.bf16 %v8600_v3, %v8598_v34  ;;  %v3632_v28 = vunpack.c.h.bf16 %v3356_v55  ;;  %v4149_v32 = vpack.c.bf16 %v4053_v27, %v4045_v22  ;;  %v4150_v40 = vpack.c.bf16 %v4054_v62, %v4046_v14  ;;  %v8759_v27 = vpop.permute.xlu2 %4850 }
 0x3b4   : > { %v3253_v33 = vpop.f32.mrf.mxu2  ;;  %v3302_v19 = vpop.f32.mrf.mxu3  ;;  %4468 = vmatpush.bf16.msrb.mxu0 %v4165_v43  ;;  %v3623_v52 = vunpack.c.l.bf16 %v3352_v7  ;;  %v3783_v8 = vadd.f32 %v8422_v0, %v3639_v35  ;;  %v3615_v24 = vunpack.c.l.bf16 %v3348_v26  ;;  %v3624_v43 = vunpack.c.h.bf16 %v3352_v7 }
 0x3b5   : > { %v3368_v21 = vpack.c.bf16 %v3302_v19, %v3253_v33  ;;  %v3775_v18 = vadd.f32 %v8412_v37, %v3631_v56  ;;  %v3784_v12 = vadd.f32 %v8422_v0, %v3640_v20  ;;  %v4111_v59 = vmax.f32 %v3791_v23, 0.0  ;;  %v8767_v35 = vpop.permute.xlu0 %4805  ;;  %v9852_v20 = vld [vmem:[#allocation9_spill] sm:$0xff] }
 0x3b6   : > { %v4112_v57 = vmax.f32 %v3792_v36, 0.0  ;;  %v3336_v55 = vpack.c.bf16 %v8579_v50, %v8577_v38  ;;  %v3607_v22 = vunpack.c.l.bf16 %v3344_v25  ;;  %v3616_v14 = vunpack.c.h.bf16 %v3348_v26  ;;  %v4201_v36 = vld [vmem:[%s9614_s8 + $0x40] sm:$0x3] }
 0x3b7   : > { %v3655_v10 = vunpack.c.l.bf16 %v3368_v21  ;;  %v3656_v41 = vunpack.c.h.bf16 %v3368_v21  ;;  %4522 = vmatpush.bf16.msrb.mxu1 %v4158_v6  ;;  %v3767_v53 = vadd.f32 %v8414_v54, %v3623_v52  ;;  %v4103_v19 = vmax.f32 %v3783_v8, 0.0 }
 0x3b8   : > { %4469 = vmatpush.bf16.msrb.mxu0 %v4157_v63  ;;  %v3608_v62 = vunpack.c.h.bf16 %v3344_v25  ;;  %v3768_v7 = vadd.f32 %v8414_v54, %v3624_v43  ;;  %v9849_v38 = vmax.f32 %v8644_v29, 0.0  ;;  %v4104_v50 = vmax.f32 %v3784_v12, 0.0  ;;  %v9851_v29 = vld [vmem:[#allocation10_spill] sm:$0xff] }
 0x3b9   : > { %v3799_v51 = vadd.f32 %v8416_v17, %v3655_v10  ;;  %v3800_v16 = vadd.f32 %v8416_v17, %v3656_v41  ;;  %v3776_v17 = vadd.f32 %v8412_v37, %v3632_v28  ;;  %v3599_v21 = vunpack.c.l.bf16 %v8590_v44 }
 0x3ba   : > { %v4141_v37 = vpack.c.bf16 %v4037_v5, %v9849_v38  ;;  %v3759_v6 = vadd.f32 %v8420_v42, %v3615_v24  ;;  %v4095_v26 = vmax.f32 %v3775_v18, 0.0  ;;  %v9850_v54 = vmax.f32 %v8658_v2, 0.0 }
 0x3bb   : > { %v4119_v34 = vmax.f32 %v3799_v51, 0.0  ;;  %v4120_v3 = vmax.f32 %v3800_v16, 0.0  ;;  %4297 = vmatmul.bf16.gmra.mxu0 %v8744_v31  ;;  %4523 = vmatpush.bf16.msrb.mxu1 %v4150_v40  ;;  %v3328_v4 = vpack.c.bf16 %v9852_v20, %v9851_v29  ;;  %v3600_v5 = vunpack.c.h.bf16 %v8590_v44  ;;  %v9854_v51 = vld [vmem:[#allocation15_spill] sm:$0xff]  ;;  %v9855_v16 = vld [vmem:[#allocation33_spill] sm:$0xff] }
 0x3bc   : > { %4350 = vmatmul.bf16.gmra.mxu1 %v8744_v31  ;;  %4470 = vmatpush.bf16.msrb.mxu0 %v4149_v32  ;;  %v4142_v56 = vpack.c.bf16 %v4038_v49, %v9850_v54  ;;  %v3760_v63 = vadd.f32 %v8420_v42, %v3616_v14  ;;  %v4096_v23 = vmax.f32 %v3776_v17, 0.0  ;;  %v3591_v10 = vunpack.c.l.bf16 %v3336_v55  ;;  %v9853_v32 = vld [vmem:[#allocation20_spill] sm:$0xff]  ;;  %v9856_v17 = vld [vmem:[#allocation21_spill] sm:$0xff] }
 0x3bd   : > { %v4183_v0 = vpack.c.bf16 %v4119_v34, %v4111_v59  ;;  %v4184_v33 = vpack.c.bf16 %v4120_v3, %v4112_v57  ;;  %v3751_v2 = vadd.f32 %v8446_v46, %v3607_v22  ;;  %v4175_v13 = vpack.c.bf16 %v4103_v19, %v4095_v26  ;;  %v4761_v38 = vpop.permute.xlu0 %4760 }
 0x3be   : > { %4398 = vmatmul.bf16.gmra.mxu2 %v8699_v60  ;;  %v4087_v49 = vmax.f32 %v3767_v53, 0.0  ;;  %v3592_v41 = vunpack.c.h.bf16 %v3336_v55  ;;  %v3752_v25 = vadd.f32 %v8446_v46, %v3608_v62  ;;  %v4176_v28 = vpack.c.bf16 %v4104_v50, %v4096_v23 }
 0x3bf   : > { %4451 = vmatmul.bf16.gmra.mxu3 %v8699_v60  ;;  %4572 = vmatpush.bf16.msrb.mxu2 %v4183_v0  ;;  %v4088_v44 = vmax.f32 %v3768_v7, 0.0  ;;  %v3583_v42 = vunpack.c.l.bf16 %v9853_v32  ;;  %v3743_v40 = vadd.f32 %v8452_v45, %v3599_v21  ;;  %v4079_v52 = vmax.f32 %v3759_v6, 0.0 }
 0x3c0   : > { %4625 = vmatpush.bf16.msrb.mxu3 %v4184_v33  ;;  %4471 = vmatpush.bf16.msrb.mxu0 %v4141_v37  ;;  %v4235_v8 = vunpack.c.l.b16 %v4201_v36  ;;  %v3320_v24 = vpack.c.bf16 %v9855_v16, %v9854_v51  ;;  %v3584_v43 = vunpack.c.h.bf16 %v9853_v32  ;;  %v3744_v18 = vadd.f32 %v8452_v45, %v3600_v5  ;;  %v9859_v36 = vld [vmem:[#allocation7_spill] sm:$0xff] }
 0x3c1   : > { %4524 = vmatpush.bf16.msrb.mxu1 %v4142_v56  ;;  %v4080_v12 = vmax.f32 %v3760_v63, 0.0  ;;  %v3575_v46 = vunpack.c.l.bf16 %v3328_v4  ;;  %v3735_v59 = vadd.f32 %v9848_v9, %v3591_v10  ;;  %v4167_v57 = vpack.c.bf16 %v4087_v49, %v4079_v52  ;;  %v9858_v63 = vld [vmem:[#allocation34_spill] sm:$0xff]  ;;  %v9863_v16 = vld [vmem:[#allocation31_spill] sm:$0xff] }
 0x3c2   : > { %v4071_v34 = vmax.f32 %v3751_v2, 0.0  ;;  %v3576_v3 = vunpack.c.h.bf16 %v3328_v4  ;;  %v3736_v55 = vadd.f32 %v9848_v9, %v3592_v41  ;;  %v4072_v14 = vmax.f32 %v3752_v25, 0.0  ;;  %v9861_v49 = vld [vmem:[#allocation18_spill] sm:$0xff] }
 0x3c3   : > { %4573 = vmatpush.bf16.msrb.mxu2 %v4175_v13  ;;  %v4168_v22 = vpack.c.bf16 %v4088_v44, %v4080_v12  ;;  %v3567_v53 = vunpack.c.l.bf16 %v9856_v17  ;;  %v3727_v45 = vadd.f32 %v9847_v11, %v3583_v42  ;;  %v4063_v0 = vmax.f32 %v3743_v40, 0.0  ;;  %v9862_v25 = vld [vmem:[#allocation30_spill] sm:$0xff]  ;;  %v9864_v12 = vld [vmem:[#allocation29_spill] sm:$0xff] }
 0x3c4   : > { %4626 = vmatpush.bf16.msrb.mxu3 %v4176_v28  ;;  %4472 = vmatpush.bf16.msrb.mxu0 %v8670_v58  ;;  %v8797_v33 = vpack.c.b16 %v4235_v8, %v4235_v8  ;;  %v8799_v58 = vpop.permute.xlu2 %4841  ;;  %v3559_v19 = vunpack.c.l.bf16 %v3320_v24  ;;  %v3728_v62 = vadd.f32 %v9847_v11, %v3584_v43  ;;  %v4064_v7 = vmax.f32 %v3744_v18, 0.0  ;;  %v9857_v11 = vld [vmem:[#allocation27_spill] sm:$0xff] }
 0x3c5   : > { %4525 = vmatpush.bf16.msrb.mxu1 %v8672_v15  ;;  %v3568_v15 = vunpack.c.h.bf16 %v9856_v17  ;;  %v3560_v37 = vunpack.c.h.bf16 %v3320_v24  ;;  %v3719_v50 = vadd.f32 %v9846_v39, %v3575_v46  ;;  %v4159_v6 = vpack.c.bf16 %v4071_v34, %v4063_v0 }
 0x3c6   : > { %v4055_v26 = vmax.f32 %v3735_v59, 0.0  ;;  %v3720_v54 = vadd.f32 %v9846_v39, %v3576_v3  ;;  %v4160_v29 = vpack.c.bf16 %v4072_v14, %v4064_v7  ;;  %v4056_v20 = vmax.f32 %v3736_v55, 0.0  ;;  %v9866_v14 = vld [vmem:[#allocation28_spill] sm:$0xff] }
 0x3c7   : > { %4574 = vmatpush.bf16.msrb.mxu2 %v4167_v57  ;;  %v3551_v4 = vunpack.c.l.bf16 %v9857_v11  ;;  %v3552_v5 = vunpack.c.h.bf16 %v9857_v11  ;;  %v4047_v23 = vmax.f32 %v3727_v45, 0.0  ;;  %v4766_v10 = vperm.slane %v4761_v38, %v9859_v36  ;;  %v9867_v38 = vld [vmem:[#allocation16_spill] sm:$0xff] }
 0x3c8   : > { %4627 = vmatpush.bf16.msrb.mxu3 %v4168_v22  ;;  %v4263_v9 = vpop.f32.mrf.mxu0  ;;  %4473 = vmatpush.bf16.msrb.mxu0 %v8660_v1  ;;  %v3711_v1 = vadd.f32 %v9858_v63, %v3567_v53  ;;  %v3712_v13 = vadd.f32 %v9858_v63, %v3568_v15  ;;  %v4048_v39 = vmax.f32 %v3728_v62, 0.0  ;;  %v3543_v41 = vunpack.c.l.bf16 %v9861_v49 }
 0x3c9   : > { %v4316_v21 = vpop.f32.mrf.mxu1  ;;  %4526 = vmatpush.bf16.msrb.mxu1 %v8666_v47  ;;  %v9860_v47 = vld [vmem:[#allocation26_spill] sm:$0xff]  ;;  %v3703_v28 = vadd.f32 %v9862_v25, %v3559_v19  ;;  %v4151_v44 = vpack.c.bf16 %v4055_v26, %v4047_v23  ;;  %v4039_v32 = vmax.f32 %v3719_v50, 0.0  ;;  %v3544_v42 = vunpack.c.h.bf16 %v9861_v49 }
 0x3ca   : > { %v4678_v56 = vpack.c.bf16 %v4316_v21, %v4263_v9  ;;  %v3535_v2 = vunpack.c.l.bf16 %v9860_v47  ;;  %v3704_v40 = vadd.f32 %v9862_v25, %v3560_v37  ;;  %v4152_v52 = vpack.c.bf16 %v4056_v20, %v4048_v39 }
 0x3cb   : > { %4575 = vmatpush.bf16.msrb.mxu2 %v4159_v6  ;;  %4302 = vmatmul.bf16.gmra.mxu0 %v8797_v33  ;;  %v4040_v8 = vmax.f32 %v3720_v54, 0.0  ;;  %v3536_v51 = vunpack.c.h.bf16 %v9860_v47  ;;  %v3695_v24 = vadd.f32 %v9863_v16, %v3551_v4  ;;  %v3696_v43 = vadd.f32 %v9863_v16, %v3552_v5 }
 0x3cc   : > { %4628 = vmatpush.bf16.msrb.mxu3 %v4160_v29  ;;  %4355 = vmatmul.bf16.gmra.mxu1 %v8797_v33  ;;  %v4031_v18 = vmax.f32 %v3711_v1, 0.0  ;;  %v9865_v46 = vperm.slane %v9864_v12, %v9859_v36  ;;  %v4032_v57 = vmax.f32 %v3712_v13, 0.0  ;;  %v4902_v34 = vunpack.c.l.bf16 %v4678_v56  ;;  %v8832_v19 = vpop.permute.xlu2 %4796 }
 0x3cd   : > { %v4903_v3 = vunpack.c.h.bf16 %v4678_v56  ;;  %v8829_v22 = vunpack.c.l.bf16 %v4766_v10  ;;  %v3687_v17 = vadd.f32 %v9866_v14, %v3543_v41  ;;  %v4023_v0 = vmax.f32 %v3703_v28, 0.0 }
 0x3ce   : > { %4403 = vmatmul.bf16.gmra.mxu2 %v8744_v31  ;;  %v8827_v59 = vunpack.c.l.bf16 %v9865_v46  ;;  %v4143_v45 = vpack.c.bf16 %v4039_v32, %v4031_v18  ;;  %v3688_v15 = vadd.f32 %v9866_v14, %v3544_v42  ;;  %v4144_v7 = vpack.c.bf16 %v4040_v8, %v4032_v57  ;;  %v9869_v8 = vld [vmem:[#allocation35_spill] sm:$0xff] }
 0x3cf   : > { %4456 = vmatmul.bf16.gmra.mxu3 %v8744_v31  ;;  %4576 = vmatpush.bf16.msrb.mxu2 %v4151_v44  ;;  %v4024_v9 = vmax.f32 %v3704_v40, 0.0  ;;  %v3679_v37 = vadd.f32 %v9867_v38, %v3535_v2  ;;  %v3680_v50 = vadd.f32 %v9867_v38, %v3536_v51  ;;  %v4015_v21 = vmax.f32 %v3695_v24, 0.0  ;;  %v9868_v40 = vld [vmem:[#allocation25_spill] sm:$0xff] }
 0x3d0   : > { %4629 = vmatpush.bf16.msrb.mxu3 %v4152_v52  ;;  %v4265_v55 = vpop.f32.mrf.mxu0  ;;  %v4016_v6 = vmax.f32 %v3696_v43, 0.0  ;;  %v5046_v26 = vadd.f32 %v8829_v22, %v4902_v34  ;;  %v5047_v54 = vadd.f32 %v8829_v22, %v4903_v3  ;;  %v4007_v11 = vmax.f32 %v3687_v17, 0.0 }
 0x3d1   : > { %v4318_v53 = vpop.f32.mrf.mxu1  ;;  %v4135_v20 = vpack.c.bf16 %v4023_v0, %v4015_v21  ;;  %v4008_v1 = vmax.f32 %v3688_v15, 0.0  ;;  %v3999_v23 = vmax.f32 %v3679_v37, 0.0  ;;  %v4000_v10 = vmax.f32 %v3680_v50, 0.0 }
 0x3d2   : > { %v4682_v62 = vpack.c.bf16 %v4318_v53, %v4265_v55  ;;  %v4136_v63 = vpack.c.bf16 %v4024_v9, %v4016_v6  ;;  %v5366_v47 = vmax.f32 %v5046_v26, 0.0  ;;  %v5367_v2 = vmax.f32 %v5047_v54, 0.0 }
 0x3d3   : > { %4577 = vmatpush.bf16.msrb.mxu2 %v4143_v45  ;;  %v4127_v25 = vpack.c.bf16 %v4007_v11, %v3999_v23  ;;  %v4128_v44 = vpack.c.bf16 %v4008_v1, %v4000_v10  ;;  %v4784_v51 = vperm.slane %v9869_v8, %v9859_v36 }
 0x3d4   : > { %v4910_v56 = vunpack.c.l.bf16 %v4682_v62  ;;  %v4911_v29 = vunpack.c.h.bf16 %v4682_v62  ;;  %4630 = vmatpush.bf16.msrb.mxu3 %v4144_v7  ;;  %v4788_v52 = vpop.permute.xlu2 %4787 }
 0x3d5   : > { %v4793_v16 = vperm.slane %v4788_v52, %v9859_v36  ;;  %v8852_v57 = vunpack.c.l.bf16 %v4784_v51 }
 0x3d6   : > { %v5054_v4 = vadd.f32 %v8827_v59, %v4910_v56  ;;  %v5055_v5 = vadd.f32 %v8827_v59, %v4911_v29 }
 0x3d7   : > { %4578 = vmatpush.bf16.msrb.mxu2 %v4135_v20  ;;  %v8854_v55 = vunpack.c.l.bf16 %v4793_v16 }
 0x3d8   : > { %4631 = vmatpush.bf16.msrb.mxu3 %v4136_v63  ;;  %v4268_v13 = vpop.f32.mrf.mxu0  ;;  %v5374_v39 = vmax.f32 %v5054_v4, 0.0  ;;  %v5375_v49 = vmax.f32 %v5055_v5, 0.0  ;;  %v9871_v5 = vld [vmem:[#allocation11_spill] sm:$0xff] }
 0x3d9   : > { %v4321_v41 = vpop.f32.mrf.mxu1  ;;  %9870 = vst [vmem:[#allocation19_spill] sm:$0xff] %v8854_v55 }
 0x3da   : > { %v4686_v28 = vpack.c.bf16 %v4321_v41, %v4268_v13  ;;  %v8841_v32 = vpack.c.bf16 %v5374_v39, %v5366_v47  ;;  %v8843_v42 = vpack.c.bf16 %v5375_v49, %v5367_v2  ;;  %v4802_v47 = vperm.slane %v8832_v19, %v9859_v36 }
 0x3db   : > { %4579 = vmatpush.bf16.msrb.mxu2 %v4127_v25  ;;  %4474 = vmatmul.bf16.vlgmr.msrb.gmra.mxu0 %v9868_v40  ;;  %v4811_v2 = vperm.slane %v8767_v35, %v9859_v36 }
 0x3dc   : > { %4632 = vmatpush.bf16.msrb.mxu3 %v4128_v44  ;;  %4527 = vmatmul.bf16.vlgmr.msrb.gmra.mxu1 %v9868_v40  ;;  %v4918_v24 = vunpack.c.l.bf16 %v4686_v28  ;;  %v4919_v43 = vunpack.c.h.bf16 %v4686_v28  ;;  %v8876_v16 = vunpack.c.l.bf16 %v4802_v47  ;;  %v9877_v47 = vld [vmem:[#allocation13_spill] sm:$0xff] }
 0x3dd   : > { %v8878_v35 = vunpack.c.l.bf16 %v4811_v2  ;;  %v4829_v2 = vperm.slane %v9877_v47, %v9859_v36 }
 0x3de   : > { %4408 = vmatmul.bf16.gmra.mxu2 %v8797_v33  ;;  %v5062_v17 = vadd.f32 %v8852_v57, %v4918_v24  ;;  %v5063_v53 = vadd.f32 %v8852_v57, %v4919_v43  ;;  %9872 = vst [vmem:[#allocation14_spill] sm:$0xff] %v8876_v16 }
 0x3df   : > { %4461 = vmatmul.bf16.gmra.mxu3 %v8797_v33  ;;  %9873 = vst [vmem:[#allocation23_spill] sm:$0xff] %v8878_v35 }
 0x3e0   : > { %v4270_v18 = vpop.f32.mrf.mxu0  ;;  %v5382_v7 = vmax.f32 %v5062_v17, 0.0  ;;  %v5383_v9 = vmax.f32 %v5063_v53, 0.0 }
 0x3e1   : > { %v4323_v12 = vpop.f32.mrf.mxu1  ;;  %v4369_v46 = vpop.f32.mrf.mxu2 }
 0x3e2   : > { %v4690_v34 = vpack.c.bf16 %v4323_v12, %v4270_v18  ;;  %v4422_v3 = vpop.f32.mrf.mxu3 }
 0x3e3   : > { %v4679_v14 = vpack.c.bf16 %v4422_v3, %v4369_v46 }
 0x3e4   : > { %v4926_v45 = vunpack.c.l.bf16 %v4690_v34  ;;  %v4927_v0 = vunpack.c.h.bf16 %v4690_v34 }
 0x3e5   : > { %v4904_v21 = vunpack.c.l.bf16 %v4679_v14  ;;  %v4905_v6 = vunpack.c.h.bf16 %v4679_v14 }
 0x3e6   : > { %v5070_v15 = vadd.f32 %v8854_v55, %v4926_v45  ;;  %v5071_v62 = vadd.f32 %v8854_v55, %v4927_v0 }
 0x3e7   : > { %v5048_v63 = vadd.f32 %v8829_v22, %v4904_v21  ;;  %v5049_v1 = vadd.f32 %v8829_v22, %v4905_v6 }
 0x3e8   : > { %v4273_v38 = vpop.f32.mrf.mxu0  ;;  %v5390_v37 = vmax.f32 %v5070_v15, 0.0  ;;  %v5391_v50 = vmax.f32 %v5071_v62, 0.0 }
 0x3e9   : > { %v4326_v26 = vpop.f32.mrf.mxu1  ;;  %v4371_v54 = vpop.f32.mrf.mxu2  ;;  %v5368_v28 = vmax.f32 %v5048_v63, 0.0  ;;  %v5369_v44 = vmax.f32 %v5049_v1, 0.0 }
 0x3ea   : > { %v4694_v56 = vpack.c.bf16 %v4326_v26, %v4273_v38  ;;  %v4424_v29 = vpop.f32.mrf.mxu3  ;;  %v8860_v20 = vpack.c.bf16 %v5390_v37, %v5382_v7  ;;  %v8862_v11 = vpack.c.bf16 %v5391_v50, %v5383_v9 }
 0x3eb   : > { %v4683_v4 = vpack.c.bf16 %v4424_v29, %v4371_v54  ;;  %4479 = vmatmul.bf16.gmra.mxu0 %v9871_v5  ;;  %v9876_v29 = vld [vmem:[#allocation8_spill] sm:$0xff] }
 0x3ec   : > { %4532 = vmatmul.bf16.gmra.mxu1 %v9871_v5  ;;  %v4934_v49 = vunpack.c.l.bf16 %v4694_v56  ;;  %v4935_v41 = vunpack.c.h.bf16 %v4694_v56 }
 0x3ed   : > { %v4912_v23 = vunpack.c.l.bf16 %v4683_v4  ;;  %v4913_v10 = vunpack.c.h.bf16 %v4683_v4 }
 0x3ee   : > { %4580 = vmatmul.bf16.vlgmr.msrb.gmra.mxu2 %v9868_v40  ;;  %v5079_v34 = vadd.f32 %v8876_v16, %v4935_v41 }
 0x3ef   : > { %v5056_v13 = vadd.f32 %v8827_v59, %v4912_v23  ;;  %v5057_v39 = vadd.f32 %v8827_v59, %v4913_v10  ;;  %4633 = vmatmul.bf16.vlgmr.msrb.gmra.mxu3 %v9868_v40  ;;  %v5078_v40 = vadd.f32 %v8876_v16, %v4934_v49  ;;  %v4820_v10 = vperm.slane %v8733_v48, %v9859_v36 }
 0x3f0   : > { %v4275_v25 = vpop.f32.mrf.mxu0  ;;  %v5399_v0 = vmax.f32 %v5079_v34, 0.0 }
 0x3f1   : > { %v4328_v52 = vpop.f32.mrf.mxu1  ;;  %v4374_v8 = vpop.f32.mrf.mxu2  ;;  %v5376_v51 = vmax.f32 %v5056_v13, 0.0  ;;  %v5377_v19 = vmax.f32 %v5057_v39, 0.0  ;;  %v5398_v45 = vmax.f32 %v5078_v40, 0.0 }
 0x3f2   : > { %v4698_v24 = vpack.c.bf16 %v4328_v52, %v4275_v25  ;;  %v4427_v43 = vpop.f32.mrf.mxu3 }
 0x3f3   : > { %v4687_v18 = vpack.c.bf16 %v4427_v43, %v4374_v8  ;;  %v8880_v12 = vpack.c.bf16 %v5376_v51, %v5368_v28  ;;  %v8882_v46 = vpack.c.bf16 %v5377_v19, %v5369_v44  ;;  %v8904_v19 = vunpack.c.l.bf16 %v4820_v10 }
 0x3f4   : > { %v4942_v3 = vunpack.c.l.bf16 %v4698_v24  ;;  %v4943_v14 = vunpack.c.h.bf16 %v4698_v24 }
 0x3f5   : > { %9874 = vst [vmem:[#allocation24_spill] sm:$0xff] %v8880_v12  ;;  %v4920_v9 = vunpack.c.l.bf16 %v4687_v18  ;;  %v4921_v38 = vunpack.c.h.bf16 %v4687_v18  ;;  %v8906_v18 = vunpack.c.l.bf16 %v4829_v2 }
 0x3f6   : > { %9875 = vst [vmem:[#allocation10_spill] sm:$0xff] %v8882_v46  ;;  %v5086_v17 = vadd.f32 %v8878_v35, %v4942_v3  ;;  %v5087_v53 = vadd.f32 %v8878_v35, %v4943_v14 }
 0x3f7   : > { %v5064_v4 = vadd.f32 %v8852_v57, %v4920_v9  ;;  %v5065_v63 = vadd.f32 %v8852_v57, %v4921_v38  ;;  %9878 = vst [vmem:[#allocation9_spill] sm:$0xff] %v8904_v19 }
 0x3f8   : > { %v4278_v15 = vpop.f32.mrf.mxu0  ;;  %v5406_v62 = vmax.f32 %v5086_v17, 0.0  ;;  %v5407_v7 = vmax.f32 %v5087_v53, 0.0  ;;  %9879 = vst [vmem:[#allocation20_spill] sm:$0xff] %v8906_v18 }
 0x3f9   : > { %v4331_v37 = vpop.f32.mrf.mxu1  ;;  %v4376_v50 = vpop.f32.mrf.mxu2  ;;  %v5384_v28 = vmax.f32 %v5064_v4, 0.0  ;;  %v5385_v44 = vmax.f32 %v5065_v63, 0.0 }
 0x3fa   : > { %v4702_v21 = vpack.c.bf16 %v4331_v37, %v4278_v15  ;;  %v4429_v6 = vpop.f32.mrf.mxu3  ;;  %v8888_v26 = vpack.c.bf16 %v5406_v62, %v5398_v45  ;;  %v8890_v54 = vpack.c.bf16 %v5407_v7, %v5399_v0 }
 0x3fb   : > { %v4691_v56 = vpack.c.bf16 %v4429_v6, %v4376_v50  ;;  %4484 = vmatmul.bf16.gmra.mxu0 %v9876_v29 }
 0x3fc   : > { %4537 = vmatmul.bf16.gmra.mxu1 %v9876_v29  ;;  %v4950_v49 = vunpack.c.l.bf16 %v4702_v21  ;;  %v4951_v41 = vunpack.c.h.bf16 %v4702_v21 }
 0x3fd   : > { %v4928_v1 = vunpack.c.l.bf16 %v4691_v56  ;;  %v4929_v23 = vunpack.c.h.bf16 %v4691_v56 }
 0x3fe   : > { %4585 = vmatmul.bf16.gmra.mxu2 %v9871_v5  ;;  %v5095_v14 = vadd.f32 %v8904_v19, %v4951_v41 }
 0x3ff   : > { %v5072_v13 = vadd.f32 %v8854_v55, %v4928_v1  ;;  %v5073_v39 = vadd.f32 %v8854_v55, %v4929_v23  ;;  %4638 = vmatmul.bf16.gmra.mxu3 %v9871_v5  ;;  %v5094_v5 = vadd.f32 %v8904_v19, %v4950_v49  ;;  %v6669_v23 = vld [vmem:[%s9614_s8 + $0x18] sm:$0xff] }
 0x400   : > { %v4280_v25 = vpop.f32.mrf.mxu0  ;;  %v5415_v62 = vmax.f32 %v5095_v14, 0.0 }
 0x401   : > { %v4333_v52 = vpop.f32.mrf.mxu1  ;;  %v4379_v8 = vpop.f32.mrf.mxu2  ;;  %v5392_v51 = vmax.f32 %v5072_v13, 0.0  ;;  %v5393_v48 = vmax.f32 %v5073_v39, 0.0  ;;  %v5414_v15 = vmax.f32 %v5094_v5, 0.0  ;;  %v6670_v39 = vld [vmem:[%s9614_s8 + $0x10] sm:$0xff] }
 0x402   : > { %v4706_v24 = vpack.c.bf16 %v4333_v52, %v4280_v25  ;;  %v4432_v43 = vpop.f32.mrf.mxu3 }
 0x403   : > { %v4695_v40 = vpack.c.bf16 %v4432_v43, %v4379_v8  ;;  %v8908_v34 = vpack.c.bf16 %v5392_v51, %v5384_v28  ;;  %v8910_v3 = vpack.c.bf16 %v5393_v48, %v5385_v44 }
 0x404   : > { %v4958_v17 = vunpack.c.l.bf16 %v4706_v24  ;;  %v4959_v53 = vunpack.c.h.bf16 %v4706_v24 }
 0x405   : > { %9880 = vst [vmem:[#allocation15_spill] sm:$0xff] %v8908_v34  ;;  %v4936_v37 = vunpack.c.l.bf16 %v4695_v40  ;;  %v4937_v50 = vunpack.c.h.bf16 %v4695_v40 }
 0x406   : > { %9881 = vst [vmem:[#allocation33_spill] sm:$0xff] %v8910_v3  ;;  %v5102_v45 = vadd.f32 %v8906_v18, %v4958_v17  ;;  %v5103_v0 = vadd.f32 %v8906_v18, %v4959_v53 }
 0x407   : > { %v5080_v10 = vadd.f32 %v8876_v16, %v4936_v37  ;;  %v5081_v47 = vadd.f32 %v8876_v16, %v4937_v50 }
 0x408   : > { %v4283_v7 = vpop.f32.mrf.mxu0  ;;  %v5422_v9 = vmax.f32 %v5102_v45, 0.0  ;;  %v5423_v38 = vmax.f32 %v5103_v0, 0.0 }
 0x409   : > { %v4336_v21 = vpop.f32.mrf.mxu1  ;;  %v4381_v6 = vpop.f32.mrf.mxu2  ;;  %v5400_v28 = vmax.f32 %v5080_v10, 0.0  ;;  %v5401_v44 = vmax.f32 %v5081_v47, 0.0 }
 0x40a   : > { %v8916_v56 = vpack.c.bf16 %v4336_v21, %v4283_v7  ;;  %v4434_v29 = vpop.f32.mrf.mxu3  ;;  %v8918_v4 = vpack.c.bf16 %v5422_v9, %v5414_v15  ;;  %v8920_v63 = vpack.c.bf16 %v5423_v38, %v5415_v62  ;;  %v6671_v7 = vld [vmem:[%s9614_s8 + $0x20] sm:$0xff] }
 0x40b   : > { %v4699_v1 = vpack.c.bf16 %v4434_v29, %v4381_v6  ;;  %4489 = vmatmul.bf16.gmra.mxu0 %v6669_v23 }
 0x40c   : > { %4542 = vmatmul.bf16.gmra.mxu1 %v6669_v23 }
 0x40d   : > { %v4944_v2 = vunpack.c.l.bf16 %v4699_v1  ;;  %v4945_v13 = vunpack.c.h.bf16 %v4699_v1 }
 0x40e   : > { %4590 = vmatmul.bf16.gmra.mxu2 %v6670_v39 }
 0x40f   : > { %v5088_v49 = vadd.f32 %v8878_v35, %v4944_v2  ;;  %v5089_v41 = vadd.f32 %v8878_v35, %v4945_v13  ;;  %4643 = vmatmul.bf16.gmra.mxu3 %v6670_v39 }
 0x410   : > { %v4285_v25 = vpop.f32.mrf.mxu0 }
 0x411   : > { %v4338_v52 = vpop.f32.mrf.mxu1  ;;  %v4384_v8 = vpop.f32.mrf.mxu2  ;;  %v5408_v51 = vmax.f32 %v5088_v49, 0.0  ;;  %v5409_v48 = vmax.f32 %v5089_v41, 0.0 }
 0x412   : > { %v4437_v24 = vpop.f32.mrf.mxu3 }
 0x413   : > { %v4703_v43 = vpack.c.bf16 %v4437_v24, %v4384_v8  ;;  %v8932_v40 = vpack.c.bf16 %v5408_v51, %v5400_v28  ;;  %v8934_v5 = vpack.c.bf16 %v5409_v48, %v5401_v44 }
 0x415   : > { %9882 = vst [vmem:[#allocation21_spill] sm:$0xff] %v8932_v40  ;;  %v4952_v17 = vunpack.c.l.bf16 %v4703_v43  ;;  %v4953_v53 = vunpack.c.h.bf16 %v4703_v43 }
 0x416   : > { %9883 = vst [vmem:[#allocation27_spill] sm:$0xff] %v8934_v5 }
 0x417   : > { %v5096_v9 = vadd.f32 %v8904_v19, %v4952_v17  ;;  %v5097_v38 = vadd.f32 %v8904_v19, %v4953_v53 }
 0x418   : > { %v8936_v14 = vpop.f32.mrf.mxu0 }
 0x419   : > { %v8938_v45 = vpop.f32.mrf.mxu1  ;;  %v4386_v0 = vpop.f32.mrf.mxu2  ;;  %v5416_v1 = vmax.f32 %v5096_v9, 0.0  ;;  %v5417_v10 = vmax.f32 %v5097_v38, 0.0 }
 0x41a   : > { %v4439_v15 = vpop.f32.mrf.mxu3 }
 0x41b   : > { %v4707_v62 = vpack.c.bf16 %v4439_v15, %v4386_v0  ;;  %4494 = vmatmul.bf16.gmra.mxu0 %v6671_v7 }
 0x41c   : > { %4547 = vmatmul.bf16.gmra.mxu1 %v6671_v7 }
 0x41d   : > { %v4960_v37 = vunpack.c.l.bf16 %v4707_v62  ;;  %v4961_v50 = vunpack.c.h.bf16 %v4707_v62  ;;  %v9885_v62 = vld [vmem:[#allocation12_spill] sm:$0xff] }
 0x41e   : > { %4595 = vmatmul.bf16.gmra.mxu2 %v6669_v23  ;;  %v4838_v9 = vperm.slane %v9885_v62, %v9859_v36 }
 0x41f   : > { %v5104_v21 = vadd.f32 %v8906_v18, %v4960_v37  ;;  %v5105_v6 = vadd.f32 %v8906_v18, %v4961_v50  ;;  %4648 = vmatmul.bf16.gmra.mxu3 %v6669_v23  ;;  %v6672_v23 = vld [vmem:[%s9614_s8 + $0x28] sm:$0xff]  ;;  %v4901_v50 = vperm.slane %v8731_v61, %v9859_v36  ;;  %v4865_v18 = vperm.slane %v8706_v30, %v9859_v36 }
 0x420   : > { %v4290_v29 = vpop.f32.mrf.mxu0 }
 0x421   : > { %v4343_v47 = vpop.f32.mrf.mxu1  ;;  %v4389_v2 = vpop.f32.mrf.mxu2  ;;  %v5424_v13 = vmax.f32 %v5104_v21, 0.0  ;;  %v5425_v39 = vmax.f32 %v5105_v6, 0.0  ;;  %v4714_v21 = vpack.c.bf16 %v4338_v52, %v4285_v25  ;;  %v9888_v25 = vld [vmem:[#allocation32_spill] sm:$0xff]  ;;  %v8988_v62 = vunpack.c.l.bf16 %v4901_v50 }
 0x422   : > { %v4442_v49 = vpop.f32.mrf.mxu3  ;;  %v4874_v52 = vperm.slane %v9888_v25, %v9859_v36 }
 0x423   : > { %v8947_v41 = vpack.c.bf16 %v4442_v49, %v4389_v2  ;;  %v8949_v28 = vpack.c.bf16 %v5424_v13, %v5416_v1  ;;  %v8951_v44 = vpack.c.bf16 %v5425_v39, %v5417_v10  ;;  %v4847_v1 = vperm.slane %v8799_v58, %v9859_v36  ;;  %v9886_v2 = vld [vmem:[#allocation22_spill] sm:$0xff]  ;;  %v9887_v39 = vld [vmem:[#allocation17_spill] sm:$0xff] }
 0x424   : > { %v4966_v10 = vunpack.c.l.bf16 %v8916_v56  ;;  %v4892_v13 = vperm.slane %v9886_v2, %v9859_v36  ;;  %v4883_v49 = vperm.slane %v9887_v39, %v9859_v36  ;;  %v4967_v58 = vunpack.c.h.bf16 %v8916_v56 }
 0x425   : > { %9884 = vst [vmem:[#allocation34_spill] sm:$0xff] %v8951_v44  ;;  %v4974_v19 = vunpack.c.l.bf16 %v4714_v21  ;;  %v9003_v30 = vunpack.c.l.bf16 %v4874_v52 }
 0x426   : > { %v9001_v56 = vunpack.c.l.bf16 %v4883_v49 }
 0x428   : > { %v4293_v8 = vpop.f32.mrf.mxu0 }
 0x429   : > { %v4346_v51 = vpop.f32.mrf.mxu1  ;;  %v8953_v48 = vpop.f32.mrf.mxu2 }
 0x42a   : > { %v8955_v24 = vpop.f32.mrf.mxu3 }
 0x42b   : > { %4499 = vmatmul.bf16.gmra.mxu0 %v6672_v23 }
 0x42c   : > { %4552 = vmatmul.bf16.gmra.mxu1 %v6672_v23 }
 0x42e   : > { %4600 = vmatmul.bf16.gmra.mxu2 %v6671_v7 }
 0x42f   : > { %4653 = vmatmul.bf16.gmra.mxu3 %v6671_v7  ;;  %v4856_v7 = vperm.slane %v8759_v27, %v9859_v36  ;;  %v8985_v27 = vunpack.c.l.bf16 %v4838_v9  ;;  %v8999_v9 = vunpack.c.l.bf16 %v4892_v13 }
 0x430   : > { %v4295_v43 = vpop.f32.mrf.mxu0 }
 0x431   : > { %v4348_v17 = vpop.f32.mrf.mxu1  ;;  %v8960_v53 = vpop.f32.mrf.mxu2  ;;  %v8992_v35 = vunpack.c.l.bf16 %v4856_v7  ;;  %v9006_v36 = vadd.f32 %v8985_v27, %v4967_v58 }
 0x432   : > { %v8962_v0 = vpop.f32.mrf.mxu3  ;;  %v4730_v2 = vpack.c.bf16 %v4348_v17, %v4295_v43  ;;  %v4975_v43 = vunpack.c.h.bf16 %v4714_v21  ;;  %v4722_v17 = vpack.c.bf16 %v4343_v47, %v4290_v29 }
 0x434   : > { %v5007_v21 = vunpack.c.h.bf16 %v4730_v2 }
 0x438   : > { %v4298_v15 = vpop.f32.mrf.mxu0 }
 0x439   : > { %v4351_v38 = vpop.f32.mrf.mxu1  ;;  %v8966_v37 = vpop.f32.mrf.mxu2 }
 0x43a   : > { %v8970_v6 = vpop.f32.mrf.mxu3  ;;  %v4734_v61 = vpack.c.bf16 %v4351_v38, %v4298_v15  ;;  %v8994_v15 = vunpack.c.l.bf16 %v4847_v1  ;;  %v4726_v38 = vpack.c.bf16 %v4346_v51, %v4293_v8  ;;  %v5006_v51 = vunpack.c.l.bf16 %v4730_v2 }
 0x43b   : > { %4504 = vmatmul.bf16.gmra.mxu0 %v8699_v60 }
 0x43c   : > { %4557 = vmatmul.bf16.gmra.mxu1 %v8699_v60  ;;  %v8997_v60 = vadd.f32 %v8985_v27, %v4966_v10  ;;  %v5014_v50 = vunpack.c.l.bf16 %v4734_v61  ;;  %v5015_v39 = vunpack.c.h.bf16 %v4734_v61  ;;  %v9010_v10 = vunpack.c.l.bf16 %v4865_v18 }
 0x43d   : > { %v9013_v8 = vadd.f32 %v8994_v15, %v4974_v19  ;;  %v4718_v61 = vpack.c.bf16 %v8938_v45, %v8936_v14  ;;  %v4998_v52 = vunpack.c.l.bf16 %v4726_v38  ;;  %v9024_v16 = vadd.f32 %v8994_v15, %v4975_v43  ;;  %v9032_v19 = vpop.permute.xlu2 %5561 }
 0x43e   : > { %4605 = vmatmul.bf16.gmra.mxu2 %v6672_v23  ;;  %v5158_v29 = vadd.f32 %v8999_v9, %v5014_v50  ;;  %v5159_v47 = vadd.f32 %v8999_v9, %v5015_v39  ;;  %v5150_v49 = vadd.f32 %v9001_v56, %v5006_v51  ;;  %v4991_v50 = vunpack.c.h.bf16 %v4722_v17 }
 0x43f   : > { %4658 = vmatmul.bf16.gmra.mxu3 %v6672_v23  ;;  %v5438_v45 = vmax.f32 %v9013_v8, 0.0  ;;  %v4982_v2 = vunpack.c.l.bf16 %v4718_v61  ;;  %v5142_v39 = vadd.f32 %v9003_v30, %v4998_v52  ;;  %v4983_v51 = vunpack.c.h.bf16 %v4718_v61 }
 0x440   : > { %v4300_v25 = vpop.f32.mrf.mxu0  ;;  %v5478_v43 = vmax.f32 %v5158_v29, 0.0  ;;  %v5479_v12 = vmax.f32 %v5159_v47, 0.0  ;;  %v5470_v55 = vmax.f32 %v5150_v49, 0.0  ;;  %v5135_v29 = vadd.f32 %v9010_v10, %v4991_v50  ;;  %v6673_v50 = vld [vmem:[%s9614_s8 + $0x30] sm:$0xff] }
 0x441   : > { %v4353_v7 = vpop.f32.mrf.mxu1  ;;  %v9008_v1 = vpop.f32.mrf.mxu2 }
 0x442   : > { %v4738_v23 = vpack.c.bf16 %v4353_v7, %v4300_v25  ;;  %v9015_v13 = vpop.f32.mrf.mxu3  ;;  %v4990_v25 = vunpack.c.l.bf16 %v4722_v17  ;;  %v4999_v7 = vunpack.c.h.bf16 %v4726_v38 }
 0x444   : > { %v5022_v18 = vunpack.c.l.bf16 %v4738_v23  ;;  %v5023_v58 = vunpack.c.h.bf16 %v4738_v23  ;;  %v5151_v23 = vadd.f32 %v9001_v56, %v5007_v21 }
 0x446   : > { %v5166_v46 = vadd.f32 %v8988_v62, %v5022_v18  ;;  %v5167_v14 = vadd.f32 %v8988_v62, %v5023_v58  ;;  %v5134_v18 = vadd.f32 %v9010_v10, %v4990_v25  ;;  %v5143_v58 = vadd.f32 %v9003_v30, %v4999_v7 }
 0x447   : > { %v5471_v47 = vmax.f32 %v5151_v23, 0.0  ;;  %v5126_v25 = vadd.f32 %v8992_v35, %v4982_v2 }
 0x448   : > { %v5486_v3 = vmax.f32 %v5166_v46, 0.0  ;;  %v5487_v38 = vmax.f32 %v5167_v14, 0.0  ;;  %v4303_v34 = vpop.f32.mrf.mxu0  ;;  %v4715_v46 = vpack.c.bf16 %v8955_v24, %v8953_v48 }
 0x449   : > { %v5564_v8 = vadd.f32 %v9032_v19, %v4303_v34  ;;  %v4356_v5 = vpop.f32.mrf.mxu1  ;;  %v4401_v17 = vpop.f32.mrf.mxu2  ;;  %v5462_v34 = vmax.f32 %v5142_v39, 0.0  ;;  %v5454_v39 = vmax.f32 %v5134_v18, 0.0  ;;  %v4969_v18 = vunpack.c.h.bf16 %v8947_v41 }
 0x44a   : > { %v5565_v52 = vadd.f32 %v9032_v19, %v4356_v5  ;;  %v4454_v40 = vpop.f32.mrf.mxu3  ;;  %v5550_v21 = vpack.c.bf16 %v5486_v3, %v5478_v43  ;;  %v5551_v44 = vpack.c.bf16 %v5487_v38, %v5479_v12  ;;  %v5439_v3 = vmax.f32 %v9024_v16, 0.0 }
 0x44b   : > { %v5580_v61 = vrot.slane %v5564_v8, 1  ;;  %4509 = vmatmul.bf16.gmra.mxu0 %v8744_v31  ;;  %v5127_v12 = vadd.f32 %v8992_v35, %v4983_v51  ;;  %v5463_v5 = vmax.f32 %v5143_v58, 0.0  ;;  %v5604_v14 = vrot.slane %v5564_v8, 2 }
 0x44c   : > { %v5581_v7 = vrot.slane %v5565_v52, 1  ;;  %4562 = vmatmul.bf16.gmra.mxu1 %v8744_v31  ;;  %5851 = vmatpush.bf16.msra.mxu0 %v5550_v21  ;;  %v5605_v24 = vrot.slane %v5565_v52, 2  ;;  %v5542_v2 = vpack.c.bf16 %v5470_v55, %v5462_v34  ;;  %v4976_v23 = vunpack.c.l.bf16 %v4715_v46 }
 0x44d   : > { %v5596_v49 = vmax.f32 %v5564_v8, %v5580_v61  ;;  %5864 = vmatpush.bf16.msra.mxu1 %v5551_v44  ;;  %v5543_v43 = vpack.c.bf16 %v5471_v47, %v5463_v5  ;;  %v5455_v16 = vmax.f32 %v5135_v29, 0.0  ;;  %v5446_v38 = vmax.f32 %v5126_v25, 0.0 }
 0x44e   : > { %v5597_v48 = vmax.f32 %v5565_v52, %v5581_v7  ;;  %4610 = vmatmul.bf16.gmra.mxu2 %v6673_v50  ;;  %v9051_v51 = vpack.c.bf16 %v8962_v0, %v8960_v53  ;;  %v9889_v21 = vmax.f32 %v8997_v60, 0.0  ;;  %v5447_v7 = vmax.f32 %v5127_v12, 0.0 }
 0x44f   : > { %v5620_v31 = vmax.f32 %v5596_v49, %v5604_v14  ;;  %4663 = vmatmul.bf16.gmra.mxu3 %v6673_v50  ;;  %v4968_v55 = vunpack.c.l.bf16 %v8947_v41  ;;  %v4977_v25 = vunpack.c.h.bf16 %v4715_v46  ;;  %v4731_v49 = vpack.c.bf16 %v4454_v40, %v4401_v17 }
 0x450   : > { %v5621_v44 = vmax.f32 %v5597_v48, %v5605_v24  ;;  %5852 = vmatpush.bf16.msra.mxu0 %v5542_v2  ;;  %v4305_v58 = vpop.f32.mrf.mxu0  ;;  %v5526_v61 = vpack.c.bf16 %v5438_v45, %v9889_v21  ;;  %v5534_v0 = vpack.c.bf16 %v5454_v39, %v5446_v38  ;;  %v5120_v14 = vadd.f32 %v8994_v15, %v4976_v23 }
 0x451   : > { %v5628_v34 = vperm.slane %v5620_v31, 0  ;;  %5865 = vmatpush.bf16.msra.mxu1 %v5543_v43  ;;  %v4358_v47 = vpop.f32.mrf.mxu1  ;;  %v4404_v29 = vpop.f32.mrf.mxu2  ;;  %v5535_v60 = vpack.c.bf16 %v5455_v16, %v5447_v7  ;;  %v4984_v45 = vunpack.c.l.bf16 %v9051_v51  ;;  %v4723_v12 = vpack.c.bf16 %v8970_v6, %v8966_v37 }
 0x452   : > { %v5629_v5 = vperm.slane %v5621_v44, 0  ;;  %v4457_v53 = vpop.f32.mrf.mxu3  ;;  %v9890_v50 = vmax.f32 %v9006_v36, 0.0  ;;  %v5112_v46 = vadd.f32 %v8985_v27, %v4968_v55  ;;  %v9065_v40 = vadd.f32 %v8985_v27, %v4969_v18 }
 0x453   : > { %v5636_v48 = vsub.f32 %v5564_v8, %v5628_v34  ;;  %v4735_v24 = vpack.c.bf16 %v4457_v53, %v4404_v29  ;;  %v4727_v8 = vpack.c.bf16 %v9015_v13, %v9008_v1  ;;  %v9070_v39 = vadd.f32 %v8994_v15, %v4977_v25 }
 0x454   : > { %v5637_v41 = vsub.f32 %v5565_v52, %v5629_v5  ;;  %5853 = vmatpush.bf16.msra.mxu0 %v5534_v0  ;;  %v5527_v2 = vpack.c.bf16 %v5439_v3, %v9890_v50  ;;  %v5008_v37 = vunpack.c.l.bf16 %v4731_v49  ;;  %v5009_v6 = vunpack.c.h.bf16 %v4731_v49 }
 0x455   : > { %v5644_v17 = vmul.f32 1.442695, %v5636_v48  ;;  %5866 = vmatpush.bf16.msra.mxu1 %v5535_v60  ;;  %v4985_v52 = vunpack.c.h.bf16 %v9051_v51  ;;  %v5016_v36 = vunpack.c.l.bf16 %v4735_v24  ;;  %v5440_v3 = vmax.f32 %v5120_v14, 0.0 }
 0x456   : > { %v5646_v23 = vmul.f32 1.442695, %v5637_v41  ;;  %v9074_v31 = vadd.f32 %v8992_v35, %v4984_v45  ;;  %v4992_v43 = vunpack.c.l.bf16 %v4723_v12  ;;  %v5017_v16 = vunpack.c.h.bf16 %v4735_v24 }
 0x457   : > { %6603 = vpow2.f32 %v5644_v17  ;;  %v5432_v13 = vmax.f32 %v5112_v46, 0.0  ;;  %v5433_v38 = vmax.f32 %v9065_v40, 0.0  ;;  %v4993_v44 = vunpack.c.h.bf16 %v4723_v12 }
 0x458   : > { %6605 = vpow2.f32 %v5646_v23  ;;  %5854 = vmatpush.bf16.msra.mxu0 %v5526_v61  ;;  %v4475_v1 = vpop.f32.mrf.mxu0  ;;  %v5000_v58 = vunpack.c.l.bf16 %v4727_v8  ;;  %v5001_v51 = vunpack.c.h.bf16 %v4727_v8  ;;  %v9078_v55 = vadd.f32 %v9001_v56, %v5008_v37 }
 0x459   : > { %5867 = vmatpush.bf16.msra.mxu1 %v5527_v2  ;;  %v4406_v21 = vpop.f32.mrf.mxu2  ;;  %v4528_v7 = vpop.f32.mrf.mxu1  ;;  %v9081_v18 = vadd.f32 %v9001_v56, %v5009_v6  ;;  %v5160_v61 = vadd.f32 %v8999_v9, %v5016_v36  ;;  %v9087_v25 = vpack.c.bf16 %v5440_v3, %v5432_v13  ;;  %v5441_v5 = vmax.f32 %v9070_v39, 0.0 }
 0x45a   : > { %v4459_v34 = vpop.f32.mrf.mxu3  ;;  %v9083_v47 = vpack.c.bf16 %v4528_v7, %v4475_v1  ;;  %v9091_v49 = vadd.f32 %v8992_v35, %v4985_v52  ;;  %v5448_v53 = vmax.f32 %v9074_v31, 0.0  ;;  %v9095_v0 = vadd.f32 %v9010_v10, %v4992_v43 }
 0x45b   : > { %v4739_v29 = vpack.c.bf16 %v4459_v34, %v4406_v21  ;;  %4514 = vmatmul.bf16.gmra.mxu0 %v8797_v33  ;;  %v5161_v14 = vadd.f32 %v8999_v9, %v5017_v16  ;;  %v9103_v24 = vadd.f32 %v9010_v10, %v4993_v44  ;;  %v5144_v60 = vadd.f32 %v9003_v30, %v5000_v58 }
 0x45c   : > { %4567 = vmatmul.bf16.gmra.mxu1 %v8797_v33  ;;  %5855 = vmatpush.bf16.msra.mxu0 %v8918_v4  ;;  %v5145_v50 = vadd.f32 %v9003_v30, %v5001_v51  ;;  %v6674_v4 = vld [vmem:[%s9614_s8 + $0x38] sm:$0xff]  ;;  %v5472_v46 = vmax.f32 %v9078_v55, 0.0  ;;  %v5473_v8 = vmax.f32 %v9081_v18, 0.0  ;;  %v5480_v23 = vmax.f32 %v5160_v61, 0.0 }
 0x45d   : > { %v9100_v48 = vpop.eup %6603  ;;  %v5024_v45 = vunpack.c.l.bf16 %v4739_v29  ;;  %v5025_v12 = vunpack.c.h.bf16 %v4739_v29  ;;  %5868 = vmatpush.bf16.msra.mxu1 %v8920_v63  ;;  %v5481_v36 = vmax.f32 %v5161_v14, 0.0  ;;  %v4906_v3 = vunpack.c.l.bf16 %v9083_v47 }
 0x45e   : > { %v9107_v41 = vpop.eup %6605  ;;  %v5668_v2 = vrot.slane %v9100_v48, 1  ;;  %4615 = vmatmul.bf16.gmra.mxu2 %v6674_v4  ;;  %v5692_v52 = vrot.slane %v9100_v48, 2  ;;  %v4907_v51 = vunpack.c.h.bf16 %v9083_v47 }
 0x45f   : > { %v5669_v17 = vrot.slane %v9107_v41, 1  ;;  %v5168_v63 = vadd.f32 %v8988_v62, %v5024_v45  ;;  %v5169_v37 = vadd.f32 %v8988_v62, %v5025_v12  ;;  %4668 = vmatmul.bf16.gmra.mxu3 %v6674_v4  ;;  %v5693_v1 = vrot.slane %v9107_v41, 2 }
 0x460   : > { %v5684_v6 = vadd.f32 %v9100_v48, %v5668_v2  ;;  %5856 = vmatpush.bf16.msra.mxu0 %v8888_v26  ;;  %v4477_v43 = vpop.f32.mrf.mxu0  ;;  %v5464_v45 = vmax.f32 %v5144_v60, 0.0  ;;  %v5465_v12 = vmax.f32 %v5145_v50, 0.0  ;;  %v5456_v50 = vmax.f32 %v9095_v0, 0.0 }
 0x461   : > { %v5685_v16 = vadd.f32 %v9107_v41, %v5669_v17  ;;  %v5488_v13 = vmax.f32 %v5168_v63, 0.0  ;;  %v5489_v44 = vmax.f32 %v5169_v37, 0.0  ;;  %5869 = vmatpush.bf16.msra.mxu1 %v8890_v54  ;;  %v4409_v58 = vpop.f32.mrf.mxu2  ;;  %v4530_v21 = vpop.f32.mrf.mxu1  ;;  %v5051_v37 = vadd.f32 %v8829_v22, %v4907_v51 }
 0x462   : > { %v5708_v7 = vadd.f32 %v5692_v52, %v5684_v6  ;;  %v9128_v55 = vadd.f32 %v9032_v19, %v4409_v58  ;;  %v4462_v18 = vpop.f32.mrf.mxu3  ;;  %v4684_v34 = vpack.c.bf16 %v4530_v21, %v4477_v43  ;;  %v5544_v60 = vpack.c.bf16 %v5472_v46, %v5464_v45 }
 0x463   : > { %v5709_v26 = vadd.f32 %v5693_v1, %v5685_v16  ;;  %v9131_v61 = vadd.f32 %v9032_v19, %v4462_v18  ;;  %v5552_v29 = vpack.c.bf16 %v5488_v13, %v5480_v23  ;;  %v5553_v14 = vpack.c.bf16 %v5489_v44, %v5481_v36 }
 0x464   : > { %v9133_v2 = vperm.slane %v5708_v7, 0  ;;  %v5582_v54 = vrot.slane %v9128_v55, 1  ;;  %5857 = vmatpush.bf16.msra.mxu0 %v8860_v20  ;;  %v4914_v17 = vunpack.c.l.bf16 %v4684_v34  ;;  %v4915_v63 = vunpack.c.h.bf16 %v4684_v34 }
 0x465   : > { %v9137_v47 = vperm.slane %v5709_v26, 0  ;;  %v5583_v4 = vrot.slane %v9131_v61, 1  ;;  %5870 = vmatpush.bf16.msra.mxu1 %v8862_v11  ;;  %5877 = vmatpush.bf16.msra.mxu2 %v5552_v29  ;;  %v5457_v23 = vmax.f32 %v9103_v24, 0.0  ;;  %v5050_v20 = vadd.f32 %v8829_v22, %v4906_v3  ;;  %v9155_v24 = vld [vmem:[%s9617_s11] sm:$0x7] }
 0x466   : > { %6607 = vrcp.f32 %v9133_v2  ;;  %5890 = vmatpush.bf16.msra.mxu3 %v5553_v14  ;;  %v5545_v6 = vpack.c.bf16 %v5473_v8, %v5465_v12  ;;  %v5598_v52 = vmax.f32 %v9128_v55, %v5582_v54  ;;  %v5606_v11 = vrot.slane %v9128_v55, 2 }
 0x467   : > { %6609 = vrcp.f32 %v9137_v47  ;;  %v5599_v36 = vmax.f32 %v9131_v61, %v5583_v4  ;;  %v5607_v43 = vrot.slane %v9131_v61, 2  ;;  %v5449_v46 = vmax.f32 %v9091_v49, 0.0 }
 0x468   : > { %5858 = vmatpush.bf16.msra.mxu0 %v8841_v32  ;;  %v4480_v0 = vpop.f32.mrf.mxu0  ;;  %v5058_v8 = vadd.f32 %v8827_v59, %v4914_v17  ;;  %v5059_v3 = vadd.f32 %v8827_v59, %v4915_v63  ;;  %v5529_v32 = vpack.c.bf16 %v5441_v5, %v5433_v38  ;;  %v5622_v13 = vmax.f32 %v5598_v52, %v5606_v11 }
 0x469   : > { %5871 = vmatpush.bf16.msra.mxu1 %v8843_v42  ;;  %5878 = vmatpush.bf16.msra.mxu2 %v5544_v60  ;;  %v4411_v16 = vpop.f32.mrf.mxu2  ;;  %v4533_v1 = vpop.f32.mrf.mxu1  ;;  %v5623_v44 = vmax.f32 %v5599_v36, %v5607_v43  ;;  %v5536_v49 = vpack.c.bf16 %v5456_v50, %v5448_v53  ;;  %v5370_v7 = vmax.f32 %v5050_v20, 0.0  ;;  %v5371_v51 = vmax.f32 %v5051_v37, 0.0 }
 0x46a   : > { %5891 = vmatpush.bf16.msra.mxu3 %v5545_v6  ;;  %v4464_v58 = vpop.f32.mrf.mxu3  ;;  %v4688_v21 = vpack.c.bf16 %v4533_v1, %v4480_v0  ;;  %v5378_v18 = vmax.f32 %v5058_v8, 0.0  ;;  %v5379_v42 = vmax.f32 %v5059_v3, 0.0  ;;  %vm5729_vm4 = vweird.f32 %v9133_v2 }
 0x46b   : > { %5859 = vmatmul.bf16.vlgmr.msra.gmra.mxu0 %v9155_v24  ;;  %v5630_v40 = vperm.slane %v5622_v13, 0  ;;  %v5631_v39 = vperm.slane %v5623_v44, 0  ;;  %v5537_v38 = vpack.c.bf16 %v5457_v23, %v5449_v46  ;;  %v5733_v31 = vand.u32 2147483647, %v9133_v2 }
 0x46c   : > { %v6608_v34 = vpop.eup %6607  ;;  %5872 = vmatmul.bf16.vlgmr.msra.gmra.mxu1 %v9155_v24  ;;  %v9172_v53 = vpack.c.bf16 %v5378_v18, %v5370_v7  ;;  %v9174_v29 = vpack.c.bf16 %v5379_v42, %v5371_v51  ;;  %v5735_v14 = vand.u32 2147483648, %v9133_v2  ;;  %vm5744_vm5 = vweird.f32 %v9137_v47  ;;  %v9894_v51 = vld [vmem:[#allocation34_spill] sm:$0xff] }
 0x46d   : > { %v6610_v5 = vpop.eup %6609  ;;  %v5725_v26 = vmul.f32 %v6608_v34, %v9133_v2  ;;  %5879 = vmatpush.bf16.msra.mxu2 %v5536_v49  ;;  %v5638_v12 = vsub.f32 %v9128_v55, %v5630_v40  ;;  %v5639_v54 = vsub.f32 %v9131_v61, %v5631_v39  ;;  %v5748_v17 = vand.u32 2147483647, %v9137_v47 }
 0x46e   : > { %v5740_v45 = vmul.f32 %v6610_v5, %v9137_v47  ;;  %5892 = vmatpush.bf16.msra.mxu3 %v5537_v38  ;;  %4620 = vmatmul.bf16.gmra.mxu2 %v8797_v33  ;;  %v5750_v63 = vand.u32 2147483648, %v9137_v47  ;;  %v4922_v20 = vunpack.c.l.bf16 %v4688_v21  ;;  %vm5730_vm6 = vweird.f32 %v6608_v34 }
 0x46f   : > { %v5726_v4 = vsub.f32 1.0, %v5725_v26  ;;  %4673 = vmatmul.bf16.gmra.mxu3 %v8797_v33  ;;  %v5648_v50 = vmul.f32 1.442695, %v5638_v12  ;;  %v5650_v23 = vmul.f32 1.442695, %v5639_v54  ;;  %vm9185_vm7 = vcmp.eq.f32.partialorder %v5733_v31, 8.507059e+37  ;;  %vm5731_vm9 = vmor %vm5729_vm4, %vm5730_vm6 }
 0x470   : > { %v5741_v60 = vsub.f32 1.0, %v5740_v45  ;;  %v4482_v37 = vpop.f32.mrf.mxu0  ;;  %v4923_v6 = vunpack.c.h.bf16 %v4688_v21  ;;  %vm5745_vm8 = vweird.f32 %v6610_v5  ;;  %v5736_v46 = vor.u32 1.1754944e-38, %v5735_v14  ;;  %v9893_v21 = vld [vmem:[#allocation19_spill] sm:$0xff]  ;;  %v9895_v12 = vld [vmem:[#allocation21_spill] sm:$0xff] }
 0x471   : > { %v5727_v55 = vmul.f32 %v6608_v34, %v5726_v4  ;;  %5880 = vmatpush.bf16.msra.mxu2 %v9087_v25  ;;  %v4535_v52 = vpop.f32.mrf.mxu1  ;;  %v4581_v11 = vpop.f32.mrf.mxu2  ;;  %6611 = vpow2.f32 %v5648_v50  ;;  %v5066_v16 = vadd.f32 %v8852_v57, %v4922_v20  ;;  %vm5746_vm10 = vmor %vm5744_vm5, %vm5745_vm8  ;;  %vm5749_vm11 = vcmp.eq.f32.partialorder %v5748_v17, 8.507059e+37 }
 0x472   : > { %v5742_v36 = vmul.f32 %v6610_v5, %v5741_v60  ;;  %5893 = vmatpush.bf16.msra.mxu3 %v5529_v32  ;;  %v4692_v33 = vpack.c.bf16 %v4535_v52, %v4482_v37  ;;  %v4634_v43 = vpop.f32.mrf.mxu3  ;;  %6613 = vpow2.f32 %v5650_v23  ;;  %v5751_v32 = vor.u32 1.1754944e-38, %v5750_v63  ;;  %v9896_v60 = vld [vmem:[#allocation27_spill] sm:$0xff] }
 0x473   : > { %v5728_v0 = vadd.f32 %v6608_v34, %v5727_v55  ;;  %v4681_v8 = vpack.c.bf16 %v4634_v43, %v4581_v11  ;;  %v5067_v44 = vadd.f32 %v8852_v57, %v4923_v6  ;;  %v5386_v40 = vmax.f32 %v5066_v16, 0.0 }
 0x474   : > { %v5743_v3 = vadd.f32 %v6610_v5, %v5742_v36  ;;  %v4930_v25 = vunpack.c.l.bf16 %v4692_v33  ;;  %v4931_v1 = vunpack.c.h.bf16 %v4692_v33  ;;  %v9897_v33 = vld [vmem:[#allocation15_spill] sm:$0xff] }
 0x475   : > { %v5732_v13 = vsel %vm5731_vm9, %v6608_v34, %v5728_v0  ;;  %5881 = vmatpush.bf16.msra.mxu2 %v8949_v28  ;;  %v5387_v14 = vmax.f32 %v5067_v44, 0.0  ;;  %v4908_v45 = vunpack.c.l.bf16 %v4681_v8  ;;  %v4909_v63 = vunpack.c.h.bf16 %v4681_v8 }
 0x476   : > { %v5737_v2 = vsel %vm9185_vm7, %v5736_v46, %v5732_v13  ;;  %v5747_v58 = vsel %vm5746_vm10, %v6610_v5, %v5743_v3  ;;  %v5074_v49 = vadd.f32 %v9893_v21, %v4930_v25  ;;  %v5075_v7 = vadd.f32 %v9893_v21, %v4931_v1  ;;  %5894 = vmatpush.bf16.msra.mxu3 %v9894_v51  ;;  %v9898_v46 = vld [vmem:[#allocation33_spill] sm:$0xff]  ;;  %v9900_v51 = vld [vmem:[#allocation10_spill] sm:$0xff] }
 0x477   : > { %v5738_v18 = vmul.f32 %v9100_v48, %v5737_v2  ;;  %v5752_v47 = vsel %vm5749_vm11, %v5751_v32, %v5747_v58  ;;  %v9205_v42 = vpop.eup %6611  ;;  %v5052_v3 = vadd.f32 %v8829_v22, %v4908_v45  ;;  %v5053_v16 = vadd.f32 %v8829_v22, %v4909_v63  ;;  %v9899_v2 = vld [vmem:[#allocation24_spill] sm:$0xff] }
 0x478   : > { %v5753_v34 = vmul.f32 %v9107_v41, %v5752_v47  ;;  %v5394_v39 = vmax.f32 %v5074_v49, 0.0  ;;  %v5395_v28 = vmax.f32 %v5075_v7, 0.0  ;;  %v4485_v38 = vpop.f32.mrf.mxu0  ;;  %v9208_v26 = vpop.eup %6613  ;;  %v5670_v31 = vrot.slane %v9205_v42, 1 }
 0x479   : > { %v6131_v5 = vrot.slane %v5738_v18, 5  ;;  %5882 = vmatpush.bf16.msra.mxu2 %v9895_v12  ;;  %v4538_v48 = vpop.f32.mrf.mxu1  ;;  %v4583_v54 = vpop.f32.mrf.mxu2  ;;  %v5694_v41 = vrot.slane %v9205_v42, 2  ;;  %v5671_v17 = vrot.slane %v9208_v26, 1  ;;  %v5695_v6 = vrot.slane %v9208_v26, 2 }
 0x47a   : > { %v6132_v4 = vrot.slane %v5753_v34, 5  ;;  %5895 = vmatpush.bf16.msra.mxu3 %v9896_v60  ;;  %v4636_v50 = vpop.f32.mrf.mxu3  ;;  %v5686_v23 = vadd.f32 %v9205_v42, %v5670_v31  ;;  %v4696_v20 = vpack.c.bf16 %v4538_v48, %v4485_v38  ;;  %v9217_v55 = vpack.c.bf16 %v5394_v39, %v5386_v40 }
 0x47b   : > { %6147 = vst [vmem:[%s6962_s21] sm:$0x38] %v6131_v5  ;;  %v4685_v37 = vpack.c.bf16 %v4636_v50, %v4583_v54  ;;  %v5687_v61 = vadd.f32 %v9208_v26, %v5671_v17  ;;  %v9222_v52 = vpack.c.bf16 %v5395_v28, %v5387_v14  ;;  %v5372_v18 = vmax.f32 %v5052_v3, 0.0  ;;  %v9901_v28 = vld [vmem:[#allocation14_spill] sm:$0xff] }
 0x47c   : > { %6148 = vst [vmem:[%s6962_s21 + $0x8] sm:$0x38] %v6132_v4  ;;  %v5710_v11 = vadd.f32 %v5694_v41, %v5686_v23  ;;  %v4938_v44 = vunpack.c.l.bf16 %v4696_v20  ;;  %v4939_v7 = vunpack.c.h.bf16 %v4696_v20  ;;  %v5373_v47 = vmax.f32 %v5053_v16, 0.0 }
 0x47d   : > { %v4916_v36 = vunpack.c.l.bf16 %v4685_v37  ;;  %5883 = vmatpush.bf16.msra.mxu2 %v9897_v33  ;;  %v5711_v43 = vadd.f32 %v5695_v6, %v5687_v61  ;;  %v4917_v0 = vunpack.c.h.bf16 %v4685_v37 }
 0x47e   : > { %5896 = vmatpush.bf16.msra.mxu3 %v9898_v46  ;;  %v9226_v8 = vperm.slane %v5710_v11, 0  ;;  %v5082_v38 = vadd.f32 %v9901_v28, %v4938_v44  ;;  %v5083_v14 = vadd.f32 %v9901_v28, %v4939_v7  ;;  %v9906_v11 = vld [vmem:[#allocation23_spill] sm:$0xff] }
 0x47f   : > { %v9230_v25 = vperm.slane %v5711_v43, 0  ;;  %v5060_v1 = vadd.f32 %v8827_v59, %v4916_v36  ;;  %v5061_v13 = vadd.f32 %v8827_v59, %v4917_v0 }
 0x480   : > { %v4487_v32 = vpop.f32.mrf.mxu0  ;;  %6615 = vrcp.f32 %v9226_v8  ;;  %v5763_v34 = vand.u32 2147483647, %v9226_v8  ;;  %v5765_v59 = vand.u32 2147483648, %v9226_v8  ;;  %vm5759_vm12 = vweird.f32 %v9226_v8 }
 0x481   : > { %5884 = vmatpush.bf16.msra.mxu2 %v9899_v2  ;;  %v4540_v58 = vpop.f32.mrf.mxu1  ;;  %v4586_v49 = vpop.f32.mrf.mxu2  ;;  %6617 = vrcp.f32 %v9230_v25  ;;  %v5380_v40 = vmax.f32 %v5060_v1, 0.0  ;;  %v5381_v39 = vmax.f32 %v5061_v13, 0.0  ;;  %vm5774_vm13 = vweird.f32 %v9230_v25 }
 0x482   : > { %5897 = vmatpush.bf16.msra.mxu3 %v9900_v51  ;;  %v4639_v22 = vpop.f32.mrf.mxu3  ;;  %v4700_v5 = vpack.c.bf16 %v4540_v58, %v4487_v32  ;;  %v5778_v54 = vand.u32 2147483647, %v9230_v25  ;;  %v5780_v4 = vand.u32 2147483648, %v9230_v25  ;;  %vm9253_vm14 = vcmp.eq.f32.partialorder %v5763_v34, 8.507059e+37 }
 0x483   : > { %v4689_v31 = vpack.c.bf16 %v4639_v22, %v4586_v49  ;;  %v9245_v45 = vpack.c.bf16 %v5380_v40, %v5372_v18  ;;  %v9247_v12 = vpack.c.bf16 %v5381_v39, %v5373_v47  ;;  %v5766_v50 = vor.u32 1.1754944e-38, %v5765_v59 }
 0x484   : > { %5885 = vmatmul.bf16.vlgmr.msra.gmra.mxu2 %v9155_v24  ;;  %v4946_v41 = vunpack.c.l.bf16 %v4700_v5  ;;  %v4947_v17 = vunpack.c.h.bf16 %v4700_v5  ;;  %v5402_v6 = vmax.f32 %v5082_v38, 0.0  ;;  %v5403_v3 = vmax.f32 %v5083_v14, 0.0 }
 0x485   : > { %5898 = vmatmul.bf16.vlgmr.msra.gmra.mxu3 %v9155_v24  ;;  %9902 = vst [vmem:[#allocation7_spill] sm:$0xff] %v9245_v45  ;;  %v4924_v23 = vunpack.c.l.bf16 %v4689_v31  ;;  %v4925_v20 = vunpack.c.h.bf16 %v4689_v31  ;;  %vm9262_vm1 = vcmp.eq.f32.partialorder %v5778_v54, 8.507059e+37  ;;  %v5781_v54 = vor.u32 1.1754944e-38, %v5780_v4 }
 0x486   : > { %9903 = vst [vmem:[#allocation26_spill] sm:$0xff] %v9247_v12  ;;  %v6616_v48 = vpop.eup %6615  ;;  %v5090_v36 = vadd.f32 %v9906_v11, %v4946_v41  ;;  %v5091_v33 = vadd.f32 %v9906_v11, %v4947_v17 }
 0x487   : > { %v6618_v63 = vpop.eup %6617  ;;  %v5755_v24 = vmul.f32 %v6616_v48, %v9226_v8  ;;  %vm5760_vm15 = vweird.f32 %v6616_v48  ;;  %v5068_v49 = vadd.f32 %v8852_v57, %v4924_v23  ;;  %v5069_v7 = vadd.f32 %v8852_v57, %v4925_v20  ;;  %v9909_v20 = vld [vmem:[#allocation9_spill] sm:$0xff] }
 0x488   : > { %v4490_v37 = vpop.f32.mrf.mxu0  ;;  %v5770_v61 = vmul.f32 %v6618_v63, %v9230_v25  ;;  %v5410_v32 = vmax.f32 %v5090_v36, 0.0  ;;  %v5411_v44 = vmax.f32 %v5091_v33, 0.0  ;;  %vm5775_vm0 = vweird.f32 %v6618_v63  ;;  %vm5761_vm2 = vmor %vm5759_vm12, %vm5760_vm15 }
 0x489   : > { %v4543_v43 = vpop.f32.mrf.mxu1  ;;  %v4588_v0 = vpop.f32.mrf.mxu2  ;;  %v5756_v46 = vsub.f32 1.0, %v5755_v24  ;;  %vm5776_vm3 = vmor %vm5774_vm13, %vm5775_vm0  ;;  %v5388_v41 = vmax.f32 %v5068_v49, 0.0  ;;  %v5389_v17 = vmax.f32 %v5069_v7, 0.0 }
 0x48a   : > { %v4704_v16 = vpack.c.bf16 %v4543_v43, %v4490_v37  ;;  %v4641_v1 = vpop.f32.mrf.mxu3  ;;  %v5771_v13 = vsub.f32 1.0, %v5770_v61  ;;  %v9266_v40 = vpack.c.bf16 %v5410_v32, %v5402_v6  ;;  %v9268_v39 = vpack.c.bf16 %v5411_v44, %v5403_v3 }
 0x48b   : > { %v4693_v2 = vpack.c.bf16 %v4641_v1, %v4588_v0  ;;  %v5757_v58 = vmul.f32 %v6616_v48, %v5756_v46  ;;  %v9912_v1 = vld [vmem:[#allocation20_spill] sm:$0xff] }
 0x48c   : > { %v5772_v51 = vmul.f32 %v6618_v63, %v5771_v13  ;;  %v4954_v22 = vunpack.c.l.bf16 %v4704_v16  ;;  %v4955_v5 = vunpack.c.h.bf16 %v4704_v16 }
 0x48d   : > { %v4932_v18 = vunpack.c.l.bf16 %v4693_v2  ;;  %v4933_v47 = vunpack.c.h.bf16 %v4693_v2  ;;  %v5758_v34 = vadd.f32 %v6616_v48, %v5757_v58 }
 0x48e   : > { %v5773_v38 = vadd.f32 %v6618_v63, %v5772_v51  ;;  %v5098_v37 = vadd.f32 %v9909_v20, %v4954_v22  ;;  %v5099_v60 = vadd.f32 %v9909_v20, %v4955_v5 }
 0x48f   : > { %v5076_v57 = vadd.f32 %v9893_v21, %v4932_v18  ;;  %v5077_v31 = vadd.f32 %v9893_v21, %v4933_v47  ;;  %v5762_v14 = vsel %vm5761_vm2, %v6616_v48, %v5758_v34 }
 0x490   : > { %v4492_v24 = vpop.f32.mrf.mxu0  ;;  %v5767_v23 = vsel %vm9253_vm14, %v5766_v50, %v5762_v14  ;;  %v5777_v8 = vsel %vm5776_vm3, %v6618_v63, %v5773_v38  ;;  %v5418_v44 = vmax.f32 %v5098_v37, 0.0  ;;  %v5419_v2 = vmax.f32 %v5099_v60, 0.0 }
 0x491   : > { %v5396_v61 = vmax.f32 %v5076_v57, 0.0  ;;  %v4545_v6 = vpop.f32.mrf.mxu1  ;;  %v4591_v36 = vpop.f32.mrf.mxu2  ;;  %v5768_v21 = vmul.f32 %v9205_v42, %v5767_v23  ;;  %v5782_v25 = vsel %vm9262_vm1, %v5781_v54, %v5777_v8  ;;  %v5397_v48 = vmax.f32 %v5077_v31, 0.0 }
 0x492   : > { %v4708_v4 = vpack.c.bf16 %v4545_v6, %v4492_v24  ;;  %v4644_v33 = vpop.f32.mrf.mxu3  ;;  %v5783_v43 = vmul.f32 %v9208_v26, %v5782_v25 }
 0x493   : > { %v4697_v63 = vpack.c.bf16 %v4644_v33, %v4591_v36  ;;  %v9286_v50 = vpack.c.bf16 %v5396_v61, %v5388_v41  ;;  %v6133_v0 = vrot.slane %v5768_v21, 5  ;;  %v9288_v16 = vpack.c.bf16 %v5397_v48, %v5389_v17 }
 0x494   : > { %v4962_v46 = vunpack.c.l.bf16 %v4708_v4  ;;  %v4963_v3 = vunpack.c.h.bf16 %v4708_v4  ;;  %v6134_v42 = vrot.slane %v5783_v43, 5 }
 0x495   : > { %9910 = vst [vmem:[#allocation18_spill] sm:$0xff] %v9286_v50  ;;  %v4940_v7 = vunpack.c.l.bf16 %v4697_v63  ;;  %v4941_v51 = vunpack.c.h.bf16 %v4697_v63 }
 0x496   : > { %9911 = vst [vmem:[#allocation30_spill] sm:$0xff] %v9288_v16  ;;  %v5106_v13 = vadd.f32 %v9912_v1, %v4962_v46  ;;  %v5107_v32 = vadd.f32 %v9912_v1, %v4963_v3 }
 0x497   : > { %6149 = vst [vmem:[%s6962_s21 + $0x10] sm:$0x38] %v6133_v0  ;;  %v5084_v57 = vadd.f32 %v9901_v28, %v4940_v7  ;;  %v5085_v31 = vadd.f32 %v9901_v28, %v4941_v51 }
 0x498   : > { %6150 = vst [vmem:[%s6962_s21 + $0x18] sm:$0x38] %v6134_v42  ;;  %v5426_v26 = vmax.f32 %v5106_v13, 0.0  ;;  %v5427_v58 = vmax.f32 %v5107_v32, 0.0  ;;  %v4495_v49 = vpop.f32.mrf.mxu0 }
 0x499   : > { %v4548_v22 = vpop.f32.mrf.mxu1  ;;  %v4593_v18 = vpop.f32.mrf.mxu2  ;;  %v5404_v23 = vmax.f32 %v5084_v57, 0.0  ;;  %v5405_v8 = vmax.f32 %v5085_v31, 0.0 }
 0x49a   : > { %v9294_v47 = vpack.c.bf16 %v4548_v22, %v4495_v49  ;;  %v4646_v34 = vpop.f32.mrf.mxu3  ;;  %v9296_v59 = vpack.c.bf16 %v5426_v26, %v5418_v44  ;;  %v9298_v38 = vpack.c.bf16 %v5427_v58, %v5419_v2 }
 0x49b   : > { %v4701_v5 = vpack.c.bf16 %v4646_v34, %v4593_v18 }
 0x49d   : > { %v4948_v14 = vunpack.c.l.bf16 %v4701_v5  ;;  %v4949_v54 = vunpack.c.h.bf16 %v4701_v5 }
 0x49f   : > { %v5092_v41 = vadd.f32 %v9906_v11, %v4948_v14  ;;  %v5093_v17 = vadd.f32 %v9906_v11, %v4949_v54 }
 0x4a0   : > { %v4497_v24 = vpop.f32.mrf.mxu0 }
 0x4a1   : > { %v5412_v37 = vmax.f32 %v5092_v41, 0.0  ;;  %v5413_v61 = vmax.f32 %v5093_v17, 0.0  ;;  %v4550_v6 = vpop.f32.mrf.mxu1  ;;  %v4596_v36 = vpop.f32.mrf.mxu2 }
 0x4a2   : > { %v4649_v21 = vpop.f32.mrf.mxu3 }
 0x4a3   : > { %v4705_v25 = vpack.c.bf16 %v4649_v21, %v4596_v36  ;;  %v9304_v48 = vpack.c.bf16 %v5412_v37, %v5404_v23  ;;  %v9306_v4 = vpack.c.bf16 %v5413_v61, %v5405_v8  ;;  %v4716_v36 = vpack.c.bf16 %v4550_v6, %v4497_v24 }
 0x4a5   : > { %9913 = vst [vmem:[#allocation31_spill] sm:$0xff] %v9306_v4  ;;  %v4956_v33 = vunpack.c.l.bf16 %v4705_v25  ;;  %v4957_v43 = vunpack.c.h.bf16 %v4705_v25  ;;  %v4970_v25 = vunpack.c.l.bf16 %v9294_v47 }
 0x4a7   : > { %v5100_v46 = vadd.f32 %v9909_v20, %v4956_v33  ;;  %v5101_v3 = vadd.f32 %v9909_v20, %v4957_v43 }
 0x4a8   : > { %v4500_v28 = vpop.f32.mrf.mxu0 }
 0x4a9   : > { %v4553_v60 = vpop.f32.mrf.mxu1  ;;  %v4598_v63 = vpop.f32.mrf.mxu2  ;;  %v5420_v26 = vmax.f32 %v5100_v46, 0.0  ;;  %v5421_v58 = vmax.f32 %v5101_v3, 0.0 }
 0x4aa   : > { %v4651_v0 = vpop.f32.mrf.mxu3 }
 0x4ab   : > { %v4709_v11 = vpack.c.bf16 %v4651_v0, %v4598_v63  ;;  %v4971_v63 = vunpack.c.h.bf16 %v9294_v47  ;;  %v4978_v0 = vunpack.c.l.bf16 %v4716_v36 }
 0x4ad   : > { %v4964_v42 = vunpack.c.l.bf16 %v4709_v11  ;;  %v4965_v13 = vunpack.c.h.bf16 %v4709_v11  ;;  %v9333_v11 = vadd.f32 %v8985_v27, %v4970_v25 }
 0x4af   : > { %v5108_v32 = vadd.f32 %v9912_v1, %v4964_v42  ;;  %v5109_v44 = vadd.f32 %v9912_v1, %v4965_v13 }
 0x4b0   : > { %v4502_v2 = vpop.f32.mrf.mxu0 }
 0x4b1   : > { %v5428_v49 = vmax.f32 %v5108_v32, 0.0  ;;  %v5429_v7 = vmax.f32 %v5109_v44, 0.0  ;;  %v4555_v51 = vpop.f32.mrf.mxu1  ;;  %v4601_v22 = vpop.f32.mrf.mxu2  ;;  %v4979_v32 = vunpack.c.h.bf16 %v4716_v36 }
 0x4b2   : > { %v4654_v18 = vpop.f32.mrf.mxu3  ;;  %v4724_v44 = vpack.c.bf16 %v4555_v51, %v4502_v2 }
 0x4b3   : > { %v9312_v34 = vpack.c.bf16 %v4654_v18, %v4601_v22  ;;  %v9314_v5 = vpack.c.bf16 %v5428_v49, %v5420_v26  ;;  %v9316_v57 = vpack.c.bf16 %v5429_v7, %v5421_v58  ;;  %v9338_v58 = vadd.f32 %v8985_v27, %v4971_v63 }
 0x4b4   : > { %v9341_v49 = vadd.f32 %v8994_v15, %v4978_v0  ;;  %v4994_v36 = vunpack.c.l.bf16 %v4724_v44  ;;  %v4995_v25 = vunpack.c.h.bf16 %v4724_v44 }
 0x4b8   : > { %v4505_v20 = vpop.f32.mrf.mxu0 }
 0x4b9   : > { %v4558_v31 = vpop.f32.mrf.mxu1  ;;  %v9318_v14 = vpop.f32.mrf.mxu2 }
 0x4ba   : > { %v9320_v54 = vpop.f32.mrf.mxu3  ;;  %v4728_v46 = vpack.c.bf16 %v4558_v31, %v4505_v20  ;;  %v4720_v20 = vpack.c.bf16 %v4553_v60, %v4500_v28 }
 0x4bc   : > { %v5002_v31 = vunpack.c.l.bf16 %v4728_v46  ;;  %v4986_v0 = vunpack.c.l.bf16 %v4720_v20 }
 0x4c0   : > { %v4507_v1 = vpop.f32.mrf.mxu0 }
 0x4c1   : > { %v4560_v41 = vpop.f32.mrf.mxu1  ;;  %v9322_v17 = vpop.f32.mrf.mxu2 }
 0x4c2   : > { %v9324_v23 = vpop.f32.mrf.mxu3  ;;  %v4732_v43 = vpack.c.bf16 %v4560_v41, %v4507_v1  ;;  %v5003_v1 = vunpack.c.h.bf16 %v4728_v46  ;;  %v4987_v46 = vunpack.c.h.bf16 %v4720_v20 }
 0x4c4   : > { %v5010_v26 = vunpack.c.l.bf16 %v4732_v43  ;;  %v5011_v47 = vunpack.c.h.bf16 %v4732_v43  ;;  %v5442_v43 = vmax.f32 %v9341_v49, 0.0  ;;  %v5139_v49 = vadd.f32 %v9010_v10, %v4995_v25 }
 0x4c5   : > { %v4972_v25 = vunpack.c.l.bf16 %v9312_v34 }
 0x4c6   : > { %v5155_v63 = vadd.f32 %v9001_v56, %v5011_v47 }
 0x4c8   : > { %v4510_v8 = vpop.f32.mrf.mxu0  ;;  %v5475_v12 = vmax.f32 %v5155_v63, 0.0 }
 0x4c9   : > { %v4563_v37 = vpop.f32.mrf.mxu1  ;;  %v9326_v61 = vpop.f32.mrf.mxu2 }
 0x4ca   : > { %v9328_v21 = vpop.f32.mrf.mxu3  ;;  %v4736_v33 = vpack.c.bf16 %v4563_v37, %v4510_v8  ;;  %v9349_v37 = vadd.f32 %v8994_v15, %v4979_v32 }
 0x4cc   : > { %v5018_v3 = vunpack.c.l.bf16 %v4736_v33  ;;  %v5019_v42 = vunpack.c.h.bf16 %v4736_v33  ;;  %v5154_v33 = vadd.f32 %v9001_v56, %v5010_v26  ;;  %v5138_v26 = vadd.f32 %v9010_v10, %v4994_v36 }
 0x4cd   : > { %v4717_v36 = vpack.c.bf16 %v9320_v54, %v9318_v14  ;;  %v4973_v14 = vunpack.c.h.bf16 %v9312_v34 }
 0x4ce   : > { %v5162_v2 = vadd.f32 %v8999_v9, %v5018_v3  ;;  %v5163_v51 = vadd.f32 %v8999_v9, %v5019_v42  ;;  %v5146_v3 = vadd.f32 %v9003_v30, %v5002_v31  ;;  %v5147_v42 = vadd.f32 %v9003_v30, %v5003_v1 }
 0x4cf   : > { %v5474_v47 = vmax.f32 %v5154_v33, 0.0  ;;  %v5458_v63 = vmax.f32 %v5138_v26, 0.0  ;;  %v4980_v54 = vunpack.c.l.bf16 %v4717_v36  ;;  %v4981_v26 = vunpack.c.h.bf16 %v4717_v36 }
 0x4d0   : > { %v4512_v13 = vpop.f32.mrf.mxu0  ;;  %v5483_v32 = vmax.f32 %v5163_v51, 0.0  ;;  %v5131_v51 = vadd.f32 %v8992_v35, %v4987_v46  ;;  %v5466_v33 = vmax.f32 %v5146_v3, 0.0  ;;  %v5435_v46 = vmax.f32 %v9338_v58, 0.0 }
 0x4d1   : > { %v4565_v24 = vpop.f32.mrf.mxu1  ;;  %v9335_v6 = vpop.f32.mrf.mxu2  ;;  %v5443_v3 = vmax.f32 %v9349_v37, 0.0  ;;  %v9914_v58 = vmax.f32 %v9333_v11, 0.0  ;;  %v9381_v36 = vadd.f32 %v8994_v15, %v4980_v54 }
 0x4d2   : > { %v4740_v7 = vpack.c.bf16 %v4565_v24, %v4512_v13  ;;  %v9343_v22 = vpop.f32.mrf.mxu3  ;;  %v5482_v13 = vmax.f32 %v5162_v2, 0.0  ;;  %v5130_v2 = vadd.f32 %v8992_v35, %v4986_v0  ;;  %v5546_v0 = vpack.c.bf16 %v5474_v47, %v5466_v33 }
 0x4d3   : > { %v5451_v4 = vmax.f32 %v5131_v51, 0.0  ;;  %v5530_v34 = vpack.c.bf16 %v5442_v43, %v9914_v58  ;;  %v9375_v33 = vadd.f32 %v8985_v27, %v4972_v25  ;;  %v5531_v43 = vpack.c.bf16 %v5443_v3, %v5435_v46 }
 0x4d4   : > { %v5026_v41 = vunpack.c.l.bf16 %v4740_v7  ;;  %v5027_v8 = vunpack.c.h.bf16 %v4740_v7  ;;  %v9386_v25 = vadd.f32 %v8994_v15, %v4981_v26 }
 0x4d6   : > { %v5170_v28 = vadd.f32 %v8988_v62, %v5026_v41  ;;  %v5171_v60 = vadd.f32 %v8988_v62, %v5027_v8 }
 0x4d8   : > { %v5490_v24 = vmax.f32 %v5170_v28, 0.0  ;;  %v5491_v44 = vmax.f32 %v5171_v60, 0.0  ;;  %v4515_v7 = vpop.f32.mrf.mxu0  ;;  %v5467_v60 = vmax.f32 %v5147_v42, 0.0  ;;  %v5450_v42 = vmax.f32 %v5130_v2, 0.0 }
 0x4d9   : > { %v5568_v41 = vadd.f32 %v9032_v19, %v4515_v7  ;;  %v4568_v18 = vpop.f32.mrf.mxu1  ;;  %v4613_v8 = vpop.f32.mrf.mxu2 }
 0x4da   : > { %v5554_v20 = vpack.c.bf16 %v5490_v24, %v5482_v13  ;;  %v5555_v45 = vpack.c.bf16 %v5491_v44, %v5483_v32  ;;  %v5569_v31 = vadd.f32 %v9032_v19, %v4568_v18  ;;  %v4666_v1 = vpop.f32.mrf.mxu3  ;;  %v5459_v13 = vmax.f32 %v5139_v49, 0.0 }
 0x4db   : > { %v5584_v28 = vrot.slane %v5568_v41, 1  ;;  %v5608_v18 = vrot.slane %v5568_v41, 2  ;;  %v5547_v16 = vpack.c.bf16 %v5475_v12, %v5467_v60  ;;  %v4721_v49 = vpack.c.bf16 %v9324_v23, %v9322_v17 }
 0x4dc   : > { %v5585_v7 = vrot.slane %v5569_v31, 1  ;;  %5903 = vmatpush.bf16.msrb.mxu0 %v5554_v20  ;;  %5916 = vmatpush.bf16.msrb.mxu1 %v5555_v45  ;;  %v5609_v44 = vrot.slane %v5569_v31, 2  ;;  %v5538_v51 = vpack.c.bf16 %v5458_v63, %v5450_v42  ;;  %v5539_v60 = vpack.c.bf16 %v5459_v13, %v5451_v4 }
 0x4dd   : > { %v5600_v32 = vmax.f32 %v5568_v41, %v5584_v28  ;;  %v5436_v63 = vmax.f32 %v9375_v33, 0.0  ;;  %v4989_v13 = vunpack.c.h.bf16 %v4721_v49 }
 0x4de   : > { %v5601_v24 = vmax.f32 %v5569_v31, %v5585_v7  ;;  %v4988_v7 = vunpack.c.l.bf16 %v4721_v49 }
 0x4df   : > { %v5624_v50 = vmax.f32 %v5600_v32, %v5608_v18  ;;  %v4733_v18 = vpack.c.bf16 %v4666_v1, %v4613_v8  ;;  %v9401_v54 = vadd.f32 %v8992_v35, %v4989_v13 }
 0x4e0   : > { %v5625_v20 = vmax.f32 %v5601_v24, %v5609_v44  ;;  %5904 = vmatpush.bf16.msrb.mxu0 %v5546_v0  ;;  %5917 = vmatpush.bf16.msrb.mxu1 %v5547_v16  ;;  %v4517_v45 = vpop.f32.mrf.mxu0  ;;  %v9378_v16 = vadd.f32 %v8985_v27, %v4973_v14  ;;  %v4729_v27 = vpack.c.bf16 %v9343_v22, %v9335_v6  ;;  %v5445_v22 = vmax.f32 %v9386_v25, 0.0  ;;  %v9480_v25 = vld [vmem:[%s9617_s11] sm:$0x7] }
 0x4e1   : > { %v5632_v47 = vperm.slane %v5624_v50, 0  ;;  %v4570_v12 = vpop.f32.mrf.mxu1  ;;  %v4616_v28 = vpop.f32.mrf.mxu2  ;;  %v4725_v50 = vpack.c.bf16 %v9328_v21, %v9326_v61  ;;  %v5444_v21 = vmax.f32 %v9381_v36, 0.0  ;;  %v9397_v0 = vadd.f32 %v8992_v35, %v4988_v7 }
 0x4e2   : > { %v5633_v37 = vperm.slane %v5625_v20, 0  ;;  %v4669_v2 = vpop.f32.mrf.mxu3  ;;  %v5437_v61 = vmax.f32 %v9378_v16, 0.0  ;;  %v5004_v8 = vunpack.c.l.bf16 %v4729_v27  ;;  %v5012_v3 = vunpack.c.l.bf16 %v4733_v18 }
 0x4e3   : > { %v5640_v17 = vsub.f32 %v5568_v41, %v5632_v47  ;;  %v4737_v11 = vpack.c.bf16 %v4669_v2, %v4616_v28  ;;  %v4996_v41 = vunpack.c.l.bf16 %v4725_v50  ;;  %v4997_v15 = vunpack.c.h.bf16 %v4725_v50 }
 0x4e4   : > { %v5641_v23 = vsub.f32 %v5569_v31, %v5633_v37  ;;  %5905 = vmatpush.bf16.msrb.mxu0 %v5538_v51  ;;  %5918 = vmatpush.bf16.msrb.mxu1 %v5539_v60  ;;  %v9393_v31 = vpop.permute.xlu0 %5848  ;;  %v5013_v42 = vunpack.c.h.bf16 %v4733_v18  ;;  %v5005_v49 = vunpack.c.h.bf16 %v4729_v27  ;;  %v5148_v2 = vadd.f32 %v9003_v30, %v5004_v8 }
 0x4e5   : > { %v5652_v4 = vmul.f32 1.442695, %v5640_v17  ;;  %v5020_v24 = vunpack.c.l.bf16 %v4737_v11  ;;  %v5021_v44 = vunpack.c.h.bf16 %v4737_v11  ;;  %v9405_v26 = vadd.f32 %v9010_v10, %v4996_v41 }
 0x4e6   : > { %v5654_v32 = vmul.f32 1.442695, %v5641_v23  ;;  %v9408_v28 = vadd.f32 %v9010_v10, %v4997_v15  ;;  %v5156_v17 = vadd.f32 %v9001_v56, %v5012_v3 }
 0x4e7   : > { %6619 = vpow2.f32 %v5652_v4  ;;  %v5164_v58 = vadd.f32 %v8999_v9, %v5020_v24 }
 0x4e8   : > { %6621 = vpow2.f32 %v5654_v32  ;;  %5906 = vmatpush.bf16.msrb.mxu0 %v5530_v34  ;;  %5919 = vmatpush.bf16.msrb.mxu1 %v5531_v43  ;;  %v5860_v6 = vpop.f32.mrf.mxu0  ;;  %v5165_v34 = vadd.f32 %v8999_v9, %v5021_v44  ;;  %v5157_v9 = vadd.f32 %v9001_v56, %v5013_v42  ;;  %v5476_v24 = vmax.f32 %v5156_v17, 0.0 }
 0x4e9   : > { %v4618_v1 = vpop.f32.mrf.mxu2  ;;  %v5861_v46 = vadd.f32 %v5860_v6, %v9393_v31  ;;  %v5873_v14 = vpop.f32.mrf.mxu1  ;;  %v5484_v27 = vmax.f32 %v5164_v58, 0.0  ;;  %v5452_v42 = vmax.f32 %v9397_v0, 0.0  ;;  %v5533_v17 = vpack.c.bf16 %v5445_v22, %v5437_v61 }
 0x4ea   : > { %v4671_v20 = vpop.f32.mrf.mxu3  ;;  %v5874_v45 = vadd.f32 %v5873_v14, %v9393_v31  ;;  %v5485_v4 = vmax.f32 %v5165_v34, 0.0  ;;  %v5477_v44 = vmax.f32 %v5157_v9, 0.0 }
 0x4eb   : > { %v4741_v47 = vpack.c.bf16 %v4671_v20, %v4618_v1  ;;  %v6524_v12 = vmul.f32 -1.442695, %v5861_v46  ;;  %v5468_v20 = vmax.f32 %v5148_v2, 0.0 }
 0x4ec   : > { %v6525_v35 = vmul.f32 -1.442695, %v5874_v45  ;;  %5907 = vmatpush.bf16.msrb.mxu0 %v9296_v59  ;;  %5920 = vmatpush.bf16.msrb.mxu1 %v9298_v38  ;;  %v5149_v59 = vadd.f32 %v9003_v30, %v5005_v49 }
 0x4ed   : > { %v9414_v37 = vpop.eup %6619  ;;  %v5028_v51 = vunpack.c.l.bf16 %v4741_v47  ;;  %v5029_v60 = vunpack.c.h.bf16 %v4741_v47  ;;  %6623 = vpow2.f32 %v6524_v12  ;;  %v5460_v47 = vmax.f32 %v9405_v26, 0.0 }
 0x4ee   : > { %v9417_v50 = vpop.eup %6621  ;;  %v5672_v10 = vrot.slane %v9414_v37, 1  ;;  %6625 = vpow2.f32 %v6525_v35  ;;  %v5696_v7 = vrot.slane %v9414_v37, 2  ;;  %v5461_v12 = vmax.f32 %v9408_v28, 0.0 }
 0x4ef   : > { %v5673_v38 = vrot.slane %v9417_v50, 1  ;;  %v5172_v23 = vadd.f32 %v8988_v62, %v5028_v51  ;;  %v5173_v11 = vadd.f32 %v8988_v62, %v5029_v60  ;;  %v5697_v30 = vrot.slane %v9417_v50, 2 }
 0x4f0   : > { %v5688_v43 = vadd.f32 %v9414_v37, %v5672_v10  ;;  %5908 = vmatpush.bf16.msrb.mxu0 %v9266_v40  ;;  %5921 = vmatpush.bf16.msrb.mxu1 %v9268_v39  ;;  %v5862_v56 = vpop.f32.mrf.mxu0  ;;  %v5469_v58 = vmax.f32 %v5149_v59, 0.0  ;;  %v5548_v35 = vpack.c.bf16 %v5476_v24, %v5468_v20  ;;  %v5540_v51 = vpack.c.bf16 %v5460_v47, %v5452_v42 }
 0x4f1   : > { %v5689_v13 = vadd.f32 %v9417_v50, %v5673_v38  ;;  %v5492_v32 = vmax.f32 %v5172_v23, 0.0  ;;  %v5493_v18 = vmax.f32 %v5173_v11, 0.0  ;;  %v4621_v41 = vpop.f32.mrf.mxu2  ;;  %v5875_v15 = vpop.f32.mrf.mxu1 }
 0x4f2   : > { %v5712_v62 = vadd.f32 %v5696_v7, %v5688_v43  ;;  %v9433_v6 = vadd.f32 %v9032_v19, %v4621_v41  ;;  %v4674_v8 = vpop.f32.mrf.mxu3  ;;  %v5549_v26 = vpack.c.bf16 %v5477_v44, %v5469_v58 }
 0x4f3   : > { %v6624_v1 = vpop.eup %6623  ;;  %v5713_v40 = vadd.f32 %v5697_v30, %v5689_v13  ;;  %v5556_v46 = vpack.c.bf16 %v5492_v32, %v5484_v27  ;;  %v5557_v39 = vpack.c.bf16 %v5493_v18, %v5485_v4  ;;  %v9436_v14 = vadd.f32 %v9032_v19, %v4674_v8 }
 0x4f4   : > { %v6626_v3 = vpop.eup %6625  ;;  %v9439_v45 = vperm.slane %v5712_v62, 0  ;;  %v9441_v49 = vadd.f32 1.0, %v6624_v1  ;;  %5909 = vmatpush.bf16.msrb.mxu0 %v9217_v55  ;;  %5922 = vmatpush.bf16.msrb.mxu1 %v9222_v52  ;;  %v5453_v19 = vmax.f32 %v9401_v54, 0.0  ;;  %v5586_v55 = vrot.slane %v9433_v6, 1 }
 0x4f5   : > { %v9447_v34 = vperm.slane %v5713_v40, 0  ;;  %5929 = vmatpush.bf16.msrb.mxu2 %v5556_v46  ;;  %5942 = vmatpush.bf16.msrb.mxu3 %v5557_v39  ;;  %v9451_v0 = vadd.f32 1.0, %v6626_v3  ;;  %v5587_v52 = vrot.slane %v9436_v14, 1  ;;  %v5532_v54 = vpack.c.bf16 %v5444_v21, %v5436_v63 }
 0x4f6   : > { %6627 = vrcp.f32 %v9439_v45  ;;  %v5795_v28 = vand.u32 2147483648, %v9439_v45  ;;  %v5793_v2 = vand.u32 2147483647, %v9439_v45  ;;  %v5541_v60 = vpack.c.bf16 %v5461_v12, %v5453_v19 }
 0x4f7   : > { %6629 = vrcp.f32 %v9447_v34  ;;  %v5610_v33 = vrot.slane %v9433_v6, 2  ;;  %vm5789_vm4 = vweird.f32 %v9439_v45  ;;  %v5602_v63 = vmax.f32 %v9433_v6, %v5586_v55 }
 0x4f8   : > { %6631 = vrcp.f32 %v9441_v49  ;;  %5910 = vmatpush.bf16.msrb.mxu0 %v9172_v53  ;;  %5923 = vmatpush.bf16.msrb.mxu1 %v9174_v29  ;;  %v5808_v53 = vand.u32 2147483647, %v9447_v34  ;;  %v5810_v29 = vand.u32 2147483648, %v9447_v34  ;;  %v5603_v21 = vmax.f32 %v9436_v14, %v5587_v52 }
 0x4f9   : > { %5930 = vmatpush.bf16.msrb.mxu2 %v5548_v35  ;;  %5943 = vmatpush.bf16.msrb.mxu3 %v5549_v26  ;;  %v4623_v10 = vpop.f32.mrf.mxu2  ;;  %6633 = vrcp.f32 %v9451_v0  ;;  %v5611_v16 = vrot.slane %v9436_v14, 2  ;;  %v5796_v22 = vor.u32 1.1754944e-38, %v5795_v28  ;;  %vm5804_vm5 = vweird.f32 %v9447_v34 }
 0x4fa   : > { %v4676_v36 = vpop.f32.mrf.mxu3  ;;  %v5996_v9 = vand.u32 2147483647, %v9441_v49  ;;  %v5998_v59 = vand.u32 2147483648, %v9441_v49  ;;  %vm9488_vm6 = vcmp.eq.f32.partialorder %v5793_v2, 8.507059e+37  ;;  %vm5992_vm7 = vweird.f32 %v9441_v49 }
 0x4fb   : > { %5911 = vmatmul.bf16.vlgmr.msrb.gmra.mxu0 %v9480_v25  ;;  %5924 = vmatmul.bf16.vlgmr.msrb.gmra.mxu1 %v9480_v25  ;;  %v5626_v43 = vmax.f32 %v5602_v63, %v5610_v33  ;;  %v5627_v7 = vmax.f32 %v5603_v21, %v5611_v16  ;;  %vm9494_vm8 = vcmp.eq.f32.partialorder %v5808_v53, 8.507059e+37  ;;  %v5811_v13 = vor.u32 1.1754944e-38, %v5810_v29 }
 0x4fc   : > { %v6628_v61 = vpop.eup %6627  ;;  %v6011_v30 = vand.u32 2147483647, %v9451_v0  ;;  %vm6007_vm9 = vweird.f32 %v9451_v0  ;;  %v6013_v41 = vand.u32 2147483648, %v9451_v0  ;;  %vm9502_vm10 = vcmp.eq.f32.partialorder %v5996_v9, 8.507059e+37 }
 0x4fd   : > { %v6630_v38 = vpop.eup %6629  ;;  %v5785_v23 = vmul.f32 %v6628_v61, %v9439_v45  ;;  %5931 = vmatpush.bf16.msrb.mxu2 %v5540_v51  ;;  %5944 = vmatpush.bf16.msrb.mxu3 %v5541_v60  ;;  %v5634_v15 = vperm.slane %v5626_v43, 0  ;;  %v5999_v8 = vor.u32 1.1754944e-38, %v5998_v59  ;;  %v5635_v1 = vperm.slane %v5627_v7, 0  ;;  %v9924_v59 = vld [vmem:[#allocation18_spill] sm:$0xff] }
 0x4fe   : > { %v6632_v27 = vpop.eup %6631  ;;  %v5800_v4 = vmul.f32 %v6630_v38, %v9447_v34  ;;  %vm5790_vm11 = vweird.f32 %v6628_v61  ;;  %vm5805_vm12 = vweird.f32 %v6630_v38  ;;  %vm9511_vm15 = vcmp.eq.f32.partialorder %v6011_v30, 8.507059e+37 }
 0x4ff   : > { %v5786_v32 = vsub.f32 1.0, %v5785_v23  ;;  %v5988_v18 = vmul.f32 %v6632_v27, %v9441_v49  ;;  %v6634_v62 = vpop.eup %6633  ;;  %v5642_v42 = vsub.f32 %v9433_v6, %v5634_v15  ;;  %v5643_v20 = vsub.f32 %v9436_v14, %v5635_v1  ;;  %vm5791_vm14 = vmor %vm5789_vm4, %vm5790_vm11 }
 0x500   : > { %v5801_v24 = vsub.f32 1.0, %v5800_v4  ;;  %v6003_v39 = vmul.f32 %v6634_v62, %v9451_v0  ;;  %vm5993_vm13 = vweird.f32 %v6632_v27  ;;  %vm5806_vm0 = vmor %vm5804_vm5, %vm5805_vm12  ;;  %vm6008_vm1 = vweird.f32 %v6634_v62 }
 0x501   : > { %v5787_v40 = vmul.f32 %v6628_v61, %v5786_v32  ;;  %v5989_v46 = vsub.f32 1.0, %v5988_v18  ;;  %5932 = vmatpush.bf16.msrb.mxu2 %v5532_v54  ;;  %5945 = vmatpush.bf16.msrb.mxu3 %v5533_v17  ;;  %v5656_v55 = vmul.f32 1.442695, %v5642_v42  ;;  %v5658_v52 = vmul.f32 1.442695, %v5643_v20  ;;  %vm5994_vm2 = vmor %vm5992_vm7, %vm5993_vm13  ;;  %v9926_v32 = vld [vmem:[#allocation7_spill] sm:$0xff] }
 0x502   : > { %v5802_v3 = vmul.f32 %v6630_v38, %v5801_v24  ;;  %v6004_v58 = vsub.f32 1.0, %v6003_v39  ;;  %v6014_v54 = vor.u32 1.1754944e-38, %v6013_v41  ;;  %vm6009_vm3 = vmor %vm6007_vm9, %vm6008_vm1  ;;  %v9927_v18 = vld [vmem:[#allocation26_spill] sm:$0xff] }
 0x503   : > { %v5788_v47 = vadd.f32 %v6628_v61, %v5787_v40  ;;  %v5990_v12 = vmul.f32 %v6632_v27, %v5989_v46  ;;  %6635 = vpow2.f32 %v5656_v55 }
 0x504   : > { %v5803_v19 = vadd.f32 %v6630_v38, %v5802_v3  ;;  %v6005_v14 = vmul.f32 %v6634_v62, %v6004_v58  ;;  %6637 = vpow2.f32 %v5658_v52 }
 0x505   : > { %v5792_v26 = vsel %vm5791_vm14, %v6628_v61, %v5788_v47  ;;  %v5991_v6 = vadd.f32 %v6632_v27, %v5990_v12  ;;  %5933 = vmatpush.bf16.msrb.mxu2 %v9314_v5  ;;  %5946 = vmatpush.bf16.msrb.mxu3 %v9316_v57 }
 0x506   : > { %v5797_v45 = vsel %vm9488_vm6, %v5796_v22, %v5792_v26  ;;  %v5807_v28 = vsel %vm5806_vm0, %v6630_v38, %v5803_v19  ;;  %v6006_v60 = vadd.f32 %v6634_v62, %v6005_v14  ;;  %v9925_v38 = vld [vmem:[#allocation30_spill] sm:$0xff] }
 0x507   : > { %v5798_v34 = vmul.f32 %v9414_v37, %v5797_v45  ;;  %v5812_v2 = vsel %vm9494_vm8, %v5811_v13, %v5807_v28  ;;  %v5995_v51 = vsel %vm5994_vm2, %v6632_v27, %v5991_v6  ;;  %v5886_v5 = vpop.f32.mrf.mxu2 }
 0x508   : > { %v5813_v57 = vmul.f32 %v9417_v50, %v5812_v2  ;;  %v6000_v10 = vsel %vm9502_vm10, %v5999_v8, %v5995_v51  ;;  %v5887_v49 = vadd.f32 %v5886_v5, %v9393_v31  ;;  %v5899_v37 = vpop.f32.mrf.mxu3  ;;  %v6010_v29 = vsel %vm6009_vm3, %v6634_v62, %v6006_v60  ;;  %v9923_v50 = vld [vmem:[#allocation31_spill] sm:$0xff] }
 0x509   : > { %v6135_v17 = vrot.slane %v5798_v34, 5  ;;  %v6532_v53 = vadd.f32 -0.5, %v6000_v10  ;;  %v5900_v33 = vadd.f32 %v5899_v37, %v9393_v31  ;;  %5934 = vmatpush.bf16.msrb.mxu2 %v9304_v48  ;;  %5947 = vmatpush.bf16.msrb.mxu3 %v9923_v50  ;;  %v6015_v0 = vsel %vm9511_vm15, %v6014_v54, %v6010_v29  ;;  %v9540_v22 = vpop.eup %6635 }
 0x50a   : > { %v6136_v36 = vrot.slane %v5813_v57, 5  ;;  %v6526_v63 = vmul.f32 -1.442695, %v5887_v49  ;;  %v6533_v16 = vadd.f32 -0.5, %v6015_v0  ;;  %v5674_v9 = vrot.slane %v9540_v22, 1  ;;  %v9547_v23 = vpop.eup %6637 }
 0x50b   : > { %6151 = vst [vmem:[%s6962_s21 + $0x20] sm:$0x38] %v6135_v17  ;;  %v6163_v21 = vrot.slane %v6532_v53, 2  ;;  %v6527_v61 = vmul.f32 -1.442695, %v5900_v33  ;;  %v5698_v43 = vrot.slane %v9540_v22, 2 }
 0x50c   : > { %6152 = vst [vmem:[%s6962_s21 + $0x28] sm:$0x38] %v6136_v36  ;;  %6639 = vpow2.f32 %v6526_v63  ;;  %v6164_v48 = vrot.slane %v6533_v16, 2  ;;  %v5690_v11 = vadd.f32 %v9540_v22, %v5674_v9  ;;  %v5675_v7 = vrot.slane %v9547_v23, 1 }
 0x50d   : > { %6179 = vst [vmem:[%s6962_s21] sm:$0xc0] %v6163_v21  ;;  %6641 = vpow2.f32 %v6527_v61  ;;  %5935 = vmatpush.bf16.msrb.mxu2 %v9924_v59  ;;  %5948 = vmatpush.bf16.msrb.mxu3 %v9925_v38  ;;  %v5699_v30 = vrot.slane %v9547_v23, 2 }
 0x50e   : > { %6187 = vst [vmem:[%s6962_s21 + $0x40] sm:$0xf] %v6163_v21  ;;  %v5714_v56 = vadd.f32 %v5698_v43, %v5690_v11  ;;  %v5691_v13 = vadd.f32 %v9547_v23, %v5675_v7 }
 0x50f   : > { %6180 = vst [vmem:[%s6962_s21 + $0x8] sm:$0xc0] %v6164_v48  ;;  %v5888_v27 = vpop.f32.mrf.mxu2 }
 0x510   : > { %6188 = vst [vmem:[%s6962_s21 + $0x48] sm:$0xf] %v6164_v48  ;;  %v5901_v4 = vpop.f32.mrf.mxu3  ;;  %v5722_v62 = vperm.slane %v5714_v56, 0  ;;  %v5715_v24 = vadd.f32 %v5699_v30, %v5691_v13 }
 0x511   : > { %5936 = vmatpush.bf16.msrb.mxu2 %v9926_v32  ;;  %5949 = vmatpush.bf16.msrb.mxu3 %v9927_v18 }
 0x512   : > { %v6640_v41 = vpop.eup %6639  ;;  %6643 = vrcp.f32 %v5722_v62  ;;  %v5723_v1 = vperm.slane %v5715_v24, 0  ;;  %v5823_v40 = vand.u32 2147483647, %v5722_v62  ;;  %v5825_v46 = vand.u32 2147483648, %v5722_v62 }
 0x513   : > { %v6642_v15 = vpop.eup %6641  ;;  %v5981_v44 = vadd.f32 1.0, %v6640_v41  ;;  %vm5819_vm4 = vweird.f32 %v5722_v62 }
 0x514   : > { %v5982_v8 = vadd.f32 1.0, %v6642_v15  ;;  %5937 = vmatmul.bf16.vlgmr.msrb.gmra.mxu2 %v9480_v25  ;;  %5950 = vmatmul.bf16.vlgmr.msrb.gmra.mxu3 %v9480_v25  ;;  %vm9561_vm5 = vcmp.eq.f32.partialorder %v5823_v40, 8.507059e+37  ;;  %v5826_v58 = vor.u32 1.1754944e-38, %v5825_v46  ;;  %vm5834_vm7 = vweird.f32 %v5723_v1 }
 0x515   : > { %6645 = vrcp.f32 %v5981_v44  ;;  %v6026_v20 = vand.u32 2147483647, %v5981_v44  ;;  %vm6022_vm6 = vweird.f32 %v5981_v44  ;;  %v6028_v55 = vand.u32 2147483648, %v5981_v44 }
 0x516   : > { %6647 = vrcp.f32 %v5982_v8  ;;  %v5838_v6 = vand.u32 2147483647, %v5723_v1  ;;  %v5840_v14 = vand.u32 2147483648, %v5723_v1  ;;  %v6043_v60 = vand.u32 2147483648, %v5982_v8 }
 0x517   : > { %6649 = vrcp.f32 %v5723_v1  ;;  %vm9565_vm9 = vcmp.eq.f32.partialorder %v6026_v20, 8.507059e+37  ;;  %v6041_v10 = vand.u32 2147483647, %v5982_v8  ;;  %v6029_v17 = vor.u32 1.1754944e-38, %v6028_v55 }
 0x518   : > { %v6644_v39 = vpop.eup %6643  ;;  %v5841_v29 = vor.u32 1.1754944e-38, %v5840_v14  ;;  %vm6037_vm15 = vweird.f32 %v5982_v8  ;;  %v6044_v63 = vor.u32 1.1754944e-38, %v6043_v60  ;;  %vm5839_vm3 = vcmp.eq.f32.partialorder %v5838_v6, 8.507059e+37 }
 0x519   : > { %v5815_v42 = vmul.f32 %v6644_v39, %v5722_v62  ;;  %vm5820_vm8 = vweird.f32 %v6644_v39  ;;  %vm6042_vm2 = vcmp.eq.f32.partialorder %v6041_v10, 8.507059e+37 }
 0x51a   : > { %vm5821_vm12 = vmor %vm5819_vm4, %vm5820_vm8 }
 0x51b   : > { %v6646_v3 = vpop.eup %6645  ;;  %v5816_v35 = vsub.f32 1.0, %v5815_v42 }
 0x51c   : > { %v6648_v47 = vpop.eup %6647  ;;  %v6018_v19 = vmul.f32 %v6646_v3, %v5981_v44  ;;  %vm6023_vm10 = vweird.f32 %v6646_v3 }
 0x51d   : > { %v6650_v25 = vpop.eup %6649  ;;  %v6033_v52 = vmul.f32 %v6648_v47, %v5982_v8  ;;  %v5817_v28 = vmul.f32 %v6644_v39, %v5816_v35  ;;  %vm6038_vm11 = vweird.f32 %v6648_v47  ;;  %vm6024_vm14 = vmor %vm6022_vm6, %vm6023_vm10 }
 0x51e   : > { %v5830_v26 = vmul.f32 %v6650_v25, %v5723_v1  ;;  %v6019_v45 = vsub.f32 1.0, %v6018_v19  ;;  %vm5835_vm13 = vweird.f32 %v6650_v25  ;;  %vm6039_vm0 = vmor %vm6037_vm15, %vm6038_vm11 }
 0x51f   : > { %v6034_v34 = vsub.f32 1.0, %v6033_v52  ;;  %v5818_v5 = vadd.f32 %v6644_v39, %v5817_v28  ;;  %vm5836_vm1 = vmor %vm5834_vm7, %vm5835_vm13 }
 0x520   : > { %v5831_v2 = vsub.f32 1.0, %v5830_v26  ;;  %v6020_v51 = vmul.f32 %v6646_v3, %v6019_v45 }
 0x521   : > { %v6035_v57 = vmul.f32 %v6648_v47, %v6034_v34  ;;  %v5822_v53 = vsel %vm5821_vm12, %v6644_v39, %v5818_v5 }
 0x522   : > { %v5832_v49 = vmul.f32 %v6650_v25, %v5831_v2  ;;  %v6021_v37 = vadd.f32 %v6646_v3, %v6020_v51  ;;  %v5827_v50 = vsel %vm9561_vm5, %v5826_v58, %v5822_v53 }
 0x523   : > { %v6036_v33 = vadd.f32 %v6648_v47, %v6035_v57  ;;  %v5828_v21 = vmul.f32 %v9540_v22, %v5827_v50 }
 0x524   : > { %v5833_v36 = vadd.f32 %v6650_v25, %v5832_v49  ;;  %v6025_v0 = vsel %vm6024_vm14, %v6646_v3, %v6021_v37 }
 0x525   : > { %v6030_v16 = vsel %vm9565_vm9, %v6029_v17, %v6025_v0  ;;  %v6040_v61 = vsel %vm6039_vm0, %v6648_v47, %v6036_v33  ;;  %v6137_v38 = vrot.slane %v5828_v21, 5 }
 0x526   : > { %v5837_v48 = vsel %vm5836_vm1, %v6650_v25, %v5833_v36  ;;  %v6534_v9 = vadd.f32 -0.5, %v6030_v16  ;;  %v6045_v59 = vsel %vm6042_vm2, %v6044_v63, %v6040_v61 }
 0x527   : > { %v5842_v11 = vsel %vm5839_vm3, %v5841_v29, %v5837_v48  ;;  %v6535_v43 = vadd.f32 -0.5, %v6045_v59  ;;  %6153 = vst [vmem:[%s6962_s21 + $0x30] sm:$0x38] %v6137_v38 }
 0x528   : > { %v5843_v22 = vmul.f32 %v9547_v23, %v5842_v11  ;;  %v6165_v7 = vrot.slane %v6534_v9, 2 }
 0x529   : > { %v6166_v27 = vrot.slane %v6535_v43, 2 }
 0x52a   : > { %v6138_v4 = vrot.slane %v5843_v22, 5  ;;  %6181 = vst [vmem:[%s6962_s21 + $0x10] sm:$0xc0] %v6165_v7 }
 0x52b   : > { %6189 = vst [vmem:[%s6962_s21 + $0x50] sm:$0xf] %v6165_v7 }
 0x52c   : > { %6154 = vst [vmem:[%s6962_s21 + $0x38] sm:$0x38] %v6138_v4 }
 0x52d   : > { %6182 = vst [vmem:[%s6962_s21 + $0x18] sm:$0xc0] %v6166_v27 }
 0x52e   : > { %6190 = vst [vmem:[%s6962_s21 + $0x58] sm:$0xf] %v6166_v27 }
 0x578   : > { %v5912_v56 = vpop.f32.mrf.mxu0  ;;  %v5925_v13 = vpop.f32.mrf.mxu1 }
 0x579   : > { %v5913_v30 = vadd.f32 %v5912_v56, %v9393_v31  ;;  %v5926_v32 = vadd.f32 %v5925_v13, %v9393_v31 }
 0x57b   : > { %v6528_v18 = vmul.f32 -1.442695, %v5913_v30  ;;  %v6529_v41 = vmul.f32 -1.442695, %v5926_v32 }
 0x57d   : > { %6651 = vpow2.f32 %v6528_v18 }
 0x57e   : > { %6653 = vpow2.f32 %v6529_v41 }
 0x580   : > { %v5914_v23 = vpop.f32.mrf.mxu0  ;;  %v5927_v15 = vpop.f32.mrf.mxu1 }
 0x583   : > { %v6652_v62 = vpop.eup %6651 }
 0x584   : > { %v6654_v24 = vpop.eup %6653  ;;  %v5983_v44 = vadd.f32 1.0, %v6652_v62 }
 0x585   : > { %v5984_v8 = vadd.f32 1.0, %v6654_v24 }
 0x586   : > { %6655 = vrcp.f32 %v5983_v44  ;;  %v6058_v42 = vand.u32 2147483648, %v5983_v44  ;;  %v6056_v12 = vand.u32 2147483647, %v5983_v44  ;;  %vm6052_vm6 = vweird.f32 %v5983_v44 }
 0x587   : > { %6657 = vrcp.f32 %v5984_v8  ;;  %v6073_v58 = vand.u32 2147483648, %v5984_v8  ;;  %v6071_v25 = vand.u32 2147483647, %v5984_v8  ;;  %vm6067_vm8 = vweird.f32 %v5984_v8 }
 0x588   : > { %v6059_v55 = vor.u32 1.1754944e-38, %v6058_v42  ;;  %vm6057_vm9 = vcmp.eq.f32.partialorder %v6056_v12, 8.507059e+37 }
 0x589   : > { %v6074_v6 = vor.u32 1.1754944e-38, %v6073_v58  ;;  %vm6072_vm11 = vcmp.eq.f32.partialorder %v6071_v25, 8.507059e+37 }
 0x58c   : > { %v6656_v1 = vpop.eup %6655 }
 0x58d   : > { %v6658_v40 = vpop.eup %6657  ;;  %v6048_v46 = vmul.f32 %v6656_v1, %v5983_v44  ;;  %vm6053_vm4 = vweird.f32 %v6656_v1 }
 0x58e   : > { %v6063_v39 = vmul.f32 %v6658_v40, %v5984_v8  ;;  %vm6068_vm5 = vweird.f32 %v6658_v40  ;;  %vm6054_vm7 = vmor %vm6052_vm6, %vm6053_vm4 }
 0x58f   : > { %v6049_v3 = vsub.f32 1.0, %v6048_v46  ;;  %vm6069_vm10 = vmor %vm6067_vm8, %vm6068_vm5 }
 0x590   : > { %v6064_v20 = vsub.f32 1.0, %v6063_v39 }
 0x591   : > { %v6050_v47 = vmul.f32 %v6656_v1, %v6049_v3 }
 0x592   : > { %v6065_v19 = vmul.f32 %v6658_v40, %v6064_v20 }
 0x593   : > { %v6051_v35 = vadd.f32 %v6656_v1, %v6050_v47 }
 0x594   : > { %v6066_v52 = vadd.f32 %v6658_v40, %v6065_v19 }
 0x595   : > { %v6055_v26 = vsel %vm6054_vm7, %v6656_v1, %v6051_v35 }
 0x596   : > { %v6060_v14 = vsel %vm6057_vm9, %v6059_v55, %v6055_v26  ;;  %v6070_v45 = vsel %vm6069_vm10, %v6658_v40, %v6066_v52 }
 0x597   : > { %v6536_v28 = vadd.f32 -0.5, %v6060_v14  ;;  %v6075_v54 = vsel %vm6072_vm11, %v6074_v6, %v6070_v45  ;;  %v5938_v34 = vpop.f32.mrf.mxu2  ;;  %v5951_v2 = vpop.f32.mrf.mxu3 }
 0x598   : > { %v6537_v51 = vadd.f32 -0.5, %v6075_v54  ;;  %v5939_v60 = vadd.f32 %v5938_v34, %v9393_v31  ;;  %v5952_v5 = vadd.f32 %v5951_v2, %v9393_v31 }
 0x599   : > { %v6167_v57 = vrot.slane %v6536_v28, 2 }
 0x59a   : > { %v6168_v10 = vrot.slane %v6537_v51, 2  ;;  %v6530_v49 = vmul.f32 -1.442695, %v5939_v60  ;;  %v6531_v37 = vmul.f32 -1.442695, %v5952_v5 }
 0x59b   : > { %6183 = vst [vmem:[%s6962_s21 + $0x20] sm:$0xc0] %v6167_v57 }
 0x59c   : > { %6191 = vst [vmem:[%s6962_s21 + $0x60] sm:$0xf] %v6167_v57  ;;  %6659 = vpow2.f32 %v6530_v49 }
 0x59d   : > { %6184 = vst [vmem:[%s6962_s21 + $0x28] sm:$0xc0] %v6168_v10  ;;  %6661 = vpow2.f32 %v6531_v37 }
 0x59e   : > { %6192 = vst [vmem:[%s6962_s21 + $0x68] sm:$0xf] %v6168_v10 }
 0x59f   : > { %v5940_v17 = vpop.f32.mrf.mxu2  ;;  %v5953_v53 = vpop.f32.mrf.mxu3 }
 0x5a2   : > { %v6660_v29 = vpop.eup %6659 }
 0x5a3   : > { %v6662_v33 = vpop.eup %6661  ;;  %v5985_v50 = vadd.f32 1.0, %v6660_v29 }
 0x5a4   : > { %v5986_v36 = vadd.f32 1.0, %v6662_v33 }
 0x5a5   : > { %6663 = vrcp.f32 %v5985_v50  ;;  %v6088_v61 = vand.u32 2147483648, %v5985_v50  ;;  %v6086_v59 = vand.u32 2147483647, %v5985_v50  ;;  %vm6082_vm14 = vweird.f32 %v5985_v50 }
 0x5a6   : > { %6665 = vrcp.f32 %v5986_v36  ;;  %v6103_v38 = vand.u32 2147483648, %v5986_v36  ;;  %v6101_v43 = vand.u32 2147483647, %v5986_v36  ;;  %vm6097_vm0 = vweird.f32 %v5986_v36 }
 0x5a7   : > { %v6089_v7 = vor.u32 1.1754944e-38, %v6088_v61  ;;  %vm6087_vm1 = vcmp.eq.f32.partialorder %v6086_v59, 8.507059e+37 }
 0x5a8   : > { %v6104_v56 = vor.u32 1.1754944e-38, %v6103_v38  ;;  %vm6102_vm3 = vcmp.eq.f32.partialorder %v6101_v43, 8.507059e+37 }
 0x5ab   : > { %v6664_v0 = vpop.eup %6663 }
 0x5ac   : > { %v6666_v31 = vpop.eup %6665  ;;  %v6078_v63 = vmul.f32 %v6664_v0, %v5985_v50  ;;  %vm6083_vm12 = vweird.f32 %v6664_v0 }
 0x5ad   : > { %v6093_v21 = vmul.f32 %v6666_v31, %v5986_v36  ;;  %vm6098_vm13 = vweird.f32 %v6666_v31  ;;  %vm6084_vm15 = vmor %vm6082_vm14, %vm6083_vm12 }
 0x5ae   : > { %v6079_v16 = vsub.f32 1.0, %v6078_v63  ;;  %vm6099_vm2 = vmor %vm6097_vm0, %vm6098_vm13 }
 0x5af   : > { %v6094_v48 = vsub.f32 1.0, %v6093_v21 }
 0x5b0   : > { %v6080_v9 = vmul.f32 %v6664_v0, %v6079_v16 }
 0x5b1   : > { %v6095_v11 = vmul.f32 %v6666_v31, %v6094_v48 }
 0x5b2   : > { %v6081_v22 = vadd.f32 %v6664_v0, %v6080_v9 }
 0x5b3   : > { %v6096_v27 = vadd.f32 %v6666_v31, %v6095_v11 }
 0x5b4   : > { %v6085_v4 = vsel %vm6084_vm15, %v6664_v0, %v6081_v22 }
 0x5b5   : > { %v6090_v13 = vsel %vm6087_vm1, %v6089_v7, %v6085_v4  ;;  %v6100_v30 = vsel %vm6099_vm2, %v6666_v31, %v6096_v27 }
 0x5b6   : > { %v6538_v32 = vadd.f32 -0.5, %v6090_v13  ;;  %v6105_v18 = vsel %vm6102_vm3, %v6104_v56, %v6100_v30 }
 0x5b7   : > { %v6539_v41 = vadd.f32 -0.5, %v6105_v18 }
 0x5b8   : > { %v6169_v23 = vrot.slane %v6538_v32, 2 }
 0x5b9   : > { %v6170_v15 = vrot.slane %v6539_v41, 2 }
 0x5ba   : > { %6185 = vst [vmem:[%s6962_s21 + $0x30] sm:$0xc0] %v6169_v23 }
 0x5bb   : > { %6193 = vst [vmem:[%s6962_s21 + $0x70] sm:$0xf] %v6169_v23 }
 0x5bc   : > { %6186 = vst [vmem:[%s6962_s21 + $0x38] sm:$0xc0] %v6170_v15 }
 0x5bd   : > { %6194 = vst [vmem:[%s6962_s21 + $0x78] sm:$0xf] %v6170_v15 }
 0x5be PF: > { %s31_s14 = sadd.s32 1, %s6712_s14   ;;  %s9932_s29 = sld [smem:[#allocation5_spill]] }
 0x5bf   : > { %p28_p5 = scmp.ge.s32.totalorder %s31_s14, 4   ;;  %s9933_s30 = sld [smem:[#allocation6_spill]] }
 0x5c1   :  { %30 = sbr.rel (!%p28_p5) target bundleno = 8 (0x8), region = 98 }

</bundles_post_ra>
